<compile_context>
chip_gen: v7x
topology: tpu7x:2x2x1
jax: 0.10.0
libtpu: 0.0.40
codegen_flags: <defaults>
</compile_context>

<pallas_src>
import math

import jax
import jax.numpy as jnp
import numpy as np
from jax.experimental import pallas as pl
from jax.experimental.pallas import tpu as pltpu


# ------------------------------ fused kernel -------------------------------- #

def make_bilstm_kernel(num_layers, T, B, H):
    """Factory for the fused BiLSTM kernel (num_layers/T/B/H are static)."""
    n_layer_refs = 6 * num_layers
    n_in = 2 + n_layer_refs + 4

    def kernel(*refs):
        x_ref, valid_ref = refs[0], refs[1]                  # (T*B, E), (T*B, 1)
        layer_refs = refs[2:2 + n_layer_refs]
        w1_ref, b1_ref, w2_ref, b2_ref = refs[2 + n_layer_refs:n_in]
        y_ref = refs[n_in]                                   # (B, 2)
        xgf_ref = refs[n_in + 1]                             # (T*B, 4H) scratch
        xgb_ref = refs[n_in + 2]                             # (T*B, 4H) scratch
        seq_ref = refs[n_in + 3]                             # (T*B, 2H) scratch

        vm = valid_ref[...]                                  # (T*B, 1) 0/1 float

        def lstm_cell(xg, rec, c):
            # gate columns are [ i | f | o | g ]  (each H wide)
            g = xg + rec                                      # (B, 4H)
            sg = jax.nn.sigmoid(g[:, :3 * H])                 # i, f, o  (exact width)
            gg = jnp.tanh(g[:, 3 * H:])                       # g        (exact width)
            c_new = sg[:, H:2 * H] * c + sg[:, :H] * gg
            h_new = sg[:, 2 * H:3 * H] * jnp.tanh(c_new)
            return h_new, c_new

        def run_layer(x2d, wf, bf, whf, wb, bb, whb, is_last):
            # Hoisted input projections for BOTH directions (off the serial
            # path; (T*B)-row matmuls give far better MXU fill than B-row).
            xgf_ref[...] = (jnp.dot(x2d, wf[...],
                                    preferred_element_type=jnp.float32) + bf[...])
            xgb_ref[...] = (jnp.dot(x2d, wb[...],
                                    preferred_element_type=jnp.float32) + bb[...])
            whh_f = whf[...]                                  # (H, 4H)
            whh_b = whb[...]

            h_f = jnp.zeros((B, H), jnp.float32)
            c_f = jnp.zeros((B, H), jnp.float32)
            h_b = jnp.zeros((B, H), jnp.float32)
            c_b = jnp.zeros((B, H), jnp.float32)
            s_f = jnp.zeros((B, H), jnp.float32)
            s_b = jnp.zeros((B, H), jnp.float32)

            for k in range(T):                                # fully unrolled
                tb = T - 1 - k                                # backward-dir time idx
                m_f = vm[k * B:(k + 1) * B, :] > 0.0          # (B, 1)
                m_b = vm[tb * B:(tb + 1) * B, :] > 0.0
                xg_f = xgf_ref[pl.ds(k * B, B), :]            # (B, 4H)
                xg_b = xgb_ref[pl.ds(tb * B, B), :]

                # two independent tiny recurrence matmuls (no concat, no
                # cross-direction dependency -> better ILP on the serial path)
                rec_f = jnp.dot(h_f, whh_f, preferred_element_type=jnp.float32)
                rec_b = jnp.dot(h_b, whh_b, preferred_element_type=jnp.float32)

                h_f_new, c_f_new = lstm_cell(xg_f, rec_f, c_f)
                h_b_new, c_b_new = lstm_cell(xg_b, rec_b, c_b)

                # freeze state / zero outputs past each sequence length
                h_f = jnp.where(m_f, h_f_new, h_f)
                c_f = jnp.where(m_f, c_f_new, c_f)
                h_b = jnp.where(m_b, h_b_new, h_b)
                c_b = jnp.where(m_b, c_b_new, c_b)
                out_f = jnp.where(m_f, h_f_new, 0.0)
                out_b = jnp.where(m_b, h_b_new, 0.0)

                if is_last:
                    # head only needs sum over time -> accumulate in registers
                    s_f = s_f + out_f
                    s_b = s_b + out_b
                else:
                    seq_ref[pl.ds(k * B, B), pl.ds(0, H)] = out_f
                    seq_ref[pl.ds(tb * B, B), pl.ds(H, H)] = out_b
            return s_f, s_b

        x2d = x_ref[...]                                      # (T*B, E)
        s_f = s_b = None
        for li in range(num_layers):
            wf, bf, whf, wb, bb, whb = layer_refs[6 * li:6 * li + 6]
            is_last = li == num_layers - 1
            s_f, s_b = run_layer(x2d, wf, bf, whf, wb, bb, whb, is_last)
            if not is_last:
                x2d = seq_ref[...]                            # (T*B, 2H)

        # head: y = linear2(tanh(linear1(sum_t lstm_out)))
        s = jnp.concatenate([s_f, s_b], axis=1)               # (B, 2H)
        h1 = jnp.tanh(jnp.dot(s, w1_ref[...],
                              preferred_element_type=jnp.float32) + b1_ref[...])
        y_ref[...] = (jnp.dot(h1, w2_ref[...],
                              preferred_element_type=jnp.float32) + b2_ref[...])

    return kernel


# ------------------------------ weight packing ------------------------------ #

def _perm_gates(w, H):
    """Permute last-dim gate blocks from PyTorch [i,f,g,o] to kernel [i,f,o,g]."""
    return jnp.concatenate(
        [w[..., :2 * H], w[..., 3 * H:4 * H], w[..., 2 * H:3 * H]], axis=-1)


def pack_layer(lyr, H):
    """PyTorch-layout per-direction weights -> kernel layout.

    wih_* : (4H, D) -> (D, 4H)  transposed, gate columns reordered [i,f,o,g]
    whh_* : (4H, H) -> (H, 4H)  transposed, gate columns reordered [i,f,o,g]
    bias  : b_ih + b_hh -> (1, 4H) per direction, same column order.
    Returns [wf, bf, whf, wb, bb, whb].
    """
    out = []
    for tag in ("f", "b"):
        wih = _perm_gates(jnp.transpose(lyr["wih_" + tag]), H)
        whh = _perm_gates(jnp.transpose(lyr["whh_" + tag]), H)
        bias = _perm_gates(lyr["bih_" + tag] + lyr["bhh_" + tag], H).reshape(1, 4 * H)
        out += [wih, bias, whh]
    return out


# ------------------------------ forward wrapper ----------------------------- #

def bilstm_forward(params, x_tok, mask):
    """Mirrors BiLSTM.forward(x, mask) in eval mode with one fused kernel."""
    B, T = x_tok.shape
    E = params["embedding"].shape[1]
    H = params["layers"][0]["whh_f"].shape[1]
    num_layers = len(params["layers"])

    lengths = mask.sum(axis=1).astype(jnp.int32)
    # TODO(synk): nn.LSTM inter-layer dropout is train-only; eval forward has none.
    emb = jnp.take(params["embedding"], x_tok, axis=0)        # (B, T, E) - XLA gather
    x2d = jnp.transpose(emb, (1, 0, 2)).reshape(T * B, E)     # time-major, flattened
    valid = (jnp.arange(T, dtype=jnp.int32)[:, None]
             < lengths[None, :]).astype(jnp.float32).reshape(T * B, 1)

    layer_args = []
    for lyr in params["layers"]:
        layer_args += pack_layer(lyr, H)
    head_args = [jnp.transpose(params["w1"]), params["b1"].reshape(1, H),
                 jnp.transpose(params["w2"]), params["b2"].reshape(1, 2)]

    n_in = 2 + 6 * num_layers + 4
    vmem = pltpu.MemorySpace.VMEM
    return pl.pallas_call(
        make_bilstm_kernel(num_layers, T, B, H),
        out_shape=jax.ShapeDtypeStruct((B, 2), jnp.float32),
        in_specs=[pl.BlockSpec(memory_space=vmem)] * n_in,
        out_specs=pl.BlockSpec(memory_space=vmem),
        scratch_shapes=[pltpu.VMEM((T * B, 4 * H), jnp.float32),   # fwd input proj
                        pltpu.VMEM((T * B, 4 * H), jnp.float32),   # bwd input proj
                        pltpu.VMEM((T * B, 2 * H), jnp.float32)],  # inter-layer seq
    )(x2d, valid, *layer_args, *head_args)


# --------------------------- pure-JAX reference ------------------------------ #

def reverse_within_length(x_btd, lengths):
    T = x_btd.shape[1]
    t_idx = jnp.arange(T, dtype=jnp.int32)[None, :]
    L = lengths[:, None]
    idx = jnp.where(t_idx < L, L - 1 - t_idx, t_idx)
    return jnp.take_along_axis(x_btd, idx[:, :, None], axis=1)


def _lstm_dir_ref(x, lengths, wih, whh, bih, bhh):
    B, T, _ = x.shape
    H = whh.shape[1]
    wih_t, whh_t, bias = wih.T, whh.T, (bih + bhh)[None, :]

    def step(carry, t):
        h, c = carry
        xt = x[:, t, :]
        gates = xt @ wih_t + h @ whh_t + bias
        i = jax.nn.sigmoid(gates[:, :H])
        f = jax.nn.sigmoid(gates[:, H:2 * H])
        g = jnp.tanh(gates[:, 2 * H:3 * H])
        o = jax.nn.sigmoid(gates[:, 3 * H:])
        c_new = f * c + i * g
        h_new = o * jnp.tanh(c_new)
        valid = (t < lengths)[:, None]
        out_t = jnp.where(valid, h_new, 0.0)
        return (jnp.where(valid, h_new, h), jnp.where(valid, c_new, c)), out_t

    init = (jnp.zeros((B, H), jnp.float32), jnp.zeros((B, H), jnp.float32))
    _, outs = jax.lax.scan(step, init, jnp.arange(T))
    return jnp.transpose(outs, (1, 0, 2))


def bilstm_ref(params, x_tok, mask):
    lengths = mask.sum(axis=1).astype(jnp.int32)
    h = jnp.take(params["embedding"], x_tok, axis=0)
    for lyr in params["layers"]:
        fwd = _lstm_dir_ref(h, lengths, lyr["wih_f"], lyr["whh_f"],
                            lyr["bih_f"], lyr["bhh_f"])
        bwd = reverse_within_length(
            _lstm_dir_ref(reverse_within_length(h, lengths), lengths,
                          lyr["wih_b"], lyr["whh_b"], lyr["bih_b"], lyr["bhh_b"]),
            lengths)
        h = jnp.concatenate([fwd, bwd], axis=-1)
    s = h.sum(axis=1)
    hh = jnp.tanh(s @ params["w1"].T + params["b1"])
    return hh @ params["w2"].T + params["b2"]


# -------------------------------- parameters --------------------------------- #

def init_params(key, vocab, emb_size, hidden, num_layers):
    keys = iter(jax.random.split(key, 1 + num_layers * 8 + 4))

    def unif(k, shape, bound):
        return jax.random.uniform(k, shape, jnp.float32, -bound, bound)

    emb = jax.random.normal(next(keys), (vocab, emb_size), jnp.float32)
    emb = emb.at[1].set(0.0)                                  # padding_idx=1

    layers = []
    kb = 1.0 / math.sqrt(hidden)
    d_in = emb_size
    for _ in range(num_layers):
        lyr = {}
        for tag in ("f", "b"):                                # forward / reverse dirs
            lyr["wih_" + tag] = unif(next(keys), (4 * hidden, d_in), kb)
            lyr["whh_" + tag] = unif(next(keys), (4 * hidden, hidden), kb)
            lyr["bih_" + tag] = unif(next(keys), (4 * hidden,), kb)
            lyr["bhh_" + tag] = unif(next(keys), (4 * hidden,), kb)
        layers.append(lyr)
        d_in = 2 * hidden

    kb1 = 1.0 / math.sqrt(2 * hidden)
    w1 = unif(next(keys), (hidden, 2 * hidden), kb1)
    b1 = unif(next(keys), (hidden,), kb1)
    kb2 = 1.0 / math.sqrt(hidden)
    w2 = unif(next(keys), (2, hidden), kb2)
    b2 = unif(next(keys), (2,), kb2)

    return {"embedding": emb, "layers": layers,
            "w1": w1, "b1": b1, "w2": w2, "b2": b2}


# ----------------------------------- main ------------------------------------ #

if __name__ == "__main__":
    vocab, emb_size, hidden, num_layers = 50, 256, 32, 2
    B, T = 2, 8

    params = init_params(jax.random.PRNGKey(0), vocab, emb_size, hidden, num_layers)

    # deterministic inputs: token ids (B, T) + prefix-contiguous mask (B, T)
    lengths = jnp.array([8, 5], dtype=jnp.int32)
    t_idx = jnp.arange(T, dtype=jnp.int32)[None, :]
    mask = (t_idx < lengths[:, None]).astype(jnp.int32)
    x_tok = jax.random.randint(jax.random.PRNGKey(1), (B, T), 0, vocab, dtype=jnp.int32)
    x_tok = jnp.where(mask > 0, x_tok, 1)                     # pad with padding_idx

    fwd = jax.jit(bilstm_forward)
    y = jax.block_until_ready(fwd(params, x_tok, mask))       # (B, 2)

    y_ref = bilstm_ref(params, x_tok, mask)
    np.testing.assert_allclose(np.asarray(y), np.asarray(y_ref), rtol=5e-3, atol=5e-3)

    print("KERNEL_OK")
</pallas_src>

<mosaic_0001>
module attributes {stable_mosaic.version = 11 : i64} {
  func.func @kernel(%arg0: memref<16x256xf32, #tpu.memory_space<vmem>>, %arg1: memref<16x1xf32, #tpu.memory_space<vmem>>, %arg2: memref<256x128xf32, #tpu.memory_space<vmem>>, %arg3: memref<1x128xf32, #tpu.memory_space<vmem>>, %arg4: memref<32x128xf32, #tpu.memory_space<vmem>>, %arg5: memref<256x128xf32, #tpu.memory_space<vmem>>, %arg6: memref<1x128xf32, #tpu.memory_space<vmem>>, %arg7: memref<32x128xf32, #tpu.memory_space<vmem>>, %arg8: memref<64x128xf32, #tpu.memory_space<vmem>>, %arg9: memref<1x128xf32, #tpu.memory_space<vmem>>, %arg10: memref<32x128xf32, #tpu.memory_space<vmem>>, %arg11: memref<64x128xf32, #tpu.memory_space<vmem>>, %arg12: memref<1x128xf32, #tpu.memory_space<vmem>>, %arg13: memref<32x128xf32, #tpu.memory_space<vmem>>, %arg14: memref<64x32xf32, #tpu.memory_space<vmem>>, %arg15: memref<1x32xf32, #tpu.memory_space<vmem>>, %arg16: memref<32x2xf32, #tpu.memory_space<vmem>>, %arg17: memref<1x2xf32, #tpu.memory_space<vmem>>, %arg18: memref<2x2xf32, #tpu.memory_space<vmem>>, %arg19: memref<16x128xf32, #tpu.memory_space<vmem>>, %arg20: memref<16x128xf32, #tpu.memory_space<vmem>>, %arg21: memref<16x64xf32, #tpu.memory_space<vmem>>) attributes {dimension_semantics = [], scalar_prefetch = 0 : i64, scratch_operands = 3 : i64, tpu.core_type = #tpu.core_type<tc>} {
    %c0 = arith.constant 0 : index
    %c0_0 = arith.constant 0 : index
    %0 = vector.load %arg1[%c0, %c0_0] : memref<16x1xf32, #tpu.memory_space<vmem>>, vector<16x1xf32>
    %c0_1 = arith.constant 0 : index
    %c0_2 = arith.constant 0 : index
    %1 = vector.load %arg0[%c0_1, %c0_2] : memref<16x256xf32, #tpu.memory_space<vmem>>, vector<16x256xf32>
    %c0_3 = arith.constant 0 : index
    %c0_4 = arith.constant 0 : index
    %2 = vector.load %arg2[%c0_3, %c0_4] : memref<256x128xf32, #tpu.memory_space<vmem>>, vector<256x128xf32>
    %cst = arith.constant dense<0.000000e+00> : vector<16x128xf32>
    %3 = tpu.matmul %1, %2, %cst {dimension_numbers = #tpu.dot_dimension_numbers<[1], [0], [0], [1], [0, 0, 1, 1], [], []>} : vector<16x256xf32>, vector<256x128xf32>, vector<16x128xf32> -> vector<16x128xf32>
    %c0_5 = arith.constant 0 : index
    %c0_6 = arith.constant 0 : index
    %4 = vector.load %arg3[%c0_5, %c0_6] : memref<1x128xf32, #tpu.memory_space<vmem>>, vector<1x128xf32>
    %5 = vector.broadcast %4 : vector<1x128xf32> to vector<16x128xf32>
    %6 = arith.addf %3, %5 : vector<16x128xf32>
    %c0_7 = arith.constant 0 : index
    %c0_8 = arith.constant 0 : index
    %7 = vector.load %arg19[%c0_7, %c0_8] : memref<16x128xf32, #tpu.memory_space<vmem>>, vector<16x128xf32>
    tpu.vector_store %arg19[%c0_7, %c0_8], %6 {strides = array<i32>} : memref<16x128xf32, #tpu.memory_space<vmem>>, vector<16x128xf32>,
    %c0_9 = arith.constant 0 : index
    %c0_10 = arith.constant 0 : index
    %8 = vector.load %arg5[%c0_9, %c0_10] : memref<256x128xf32, #tpu.memory_space<vmem>>, vector<256x128xf32>
    %cst_11 = arith.constant dense<0.000000e+00> : vector<16x128xf32>
    %9 = tpu.matmul %1, %8, %cst_11 {dimension_numbers = #tpu.dot_dimension_numbers<[1], [0], [0], [1], [0, 0, 1, 1], [], []>} : vector<16x256xf32>, vector<256x128xf32>, vector<16x128xf32> -> vector<16x128xf32>
    %c0_12 = arith.constant 0 : index
    %c0_13 = arith.constant 0 : index
    %10 = vector.load %arg6[%c0_12, %c0_13] : memref<1x128xf32, #tpu.memory_space<vmem>>, vector<1x128xf32>
    %11 = vector.broadcast %10 : vector<1x128xf32> to vector<16x128xf32>
    %12 = arith.addf %9, %11 : vector<16x128xf32>
    %c0_14 = arith.constant 0 : index
    %c0_15 = arith.constant 0 : index
    %13 = vector.load %arg20[%c0_14, %c0_15] : memref<16x128xf32, #tpu.memory_space<vmem>>, vector<16x128xf32>
    tpu.vector_store %arg20[%c0_14, %c0_15], %12 {strides = array<i32>} : memref<16x128xf32, #tpu.memory_space<vmem>>, vector<16x128xf32>,
    %c0_16 = arith.constant 0 : index
    %c0_17 = arith.constant 0 : index
    %14 = vector.load %arg4[%c0_16, %c0_17] : memref<32x128xf32, #tpu.memory_space<vmem>>, vector<32x128xf32>
    %c0_18 = arith.constant 0 : index
    %c0_19 = arith.constant 0 : index
    %15 = vector.load %arg7[%c0_18, %c0_19] : memref<32x128xf32, #tpu.memory_space<vmem>>, vector<32x128xf32>
    %cst_20 = arith.constant 0.000000e+00 : f32
    %16 = vector.broadcast %cst_20 : f32 to vector<2x32xf32>
    %cst_21 = arith.constant 0.000000e+00 : f32
    %17 = vector.broadcast %cst_21 : f32 to vector<2x32xf32>
    %cst_22 = arith.constant 0.000000e+00 : f32
    %18 = vector.broadcast %cst_22 : f32 to vector<2x32xf32>
    %cst_23 = arith.constant 0.000000e+00 : f32
    %19 = vector.broadcast %cst_23 : f32 to vector<2x32xf32>
    %20 = vector.extract_strided_slice %0 {offsets = [0, 0], sizes = [2, 1], strides = [1, 1]} : vector<16x1xf32> to vector<2x1xf32>
    %cst_24 = arith.constant 0.000000e+00 : f32
    %21 = vector.broadcast %cst_24 : f32 to vector<2x1xf32>
    %22 = arith.cmpf ogt, %20, %21 : vector<2x1xf32>
    %23 = vector.extract_strided_slice %0 {offsets = [14, 0], sizes = [2, 1], strides = [1, 1]} : vector<16x1xf32> to vector<2x1xf32>
    %cst_25 = arith.constant 0.000000e+00 : f32
    %24 = vector.broadcast %cst_25 : f32 to vector<2x1xf32>
    %25 = arith.cmpf ogt, %23, %24 : vector<2x1xf32>
    %c0_26 = arith.constant 0 : index
    %c0_27 = arith.constant 0 : index
    %26 = vector.load %arg19[%c0_26, %c0_27] : memref<16x128xf32, #tpu.memory_space<vmem>>, vector<2x128xf32>
    %c14 = arith.constant 14 : index
    %c0_28 = arith.constant 0 : index
    %27 = vector.load %arg20[%c14, %c0_28] : memref<16x128xf32, #tpu.memory_space<vmem>>, vector<2x128xf32>
    %cst_29 = arith.constant dense<0.000000e+00> : vector<2x128xf32>
    %28 = tpu.matmul %16, %14, %cst_29 {dimension_numbers = #tpu.dot_dimension_numbers<[1], [0], [0], [1], [0, 0, 1, 1], [], []>} : vector<2x32xf32>, vector<32x128xf32>, vector<2x128xf32> -> vector<2x128xf32>
    %cst_30 = arith.constant dense<0.000000e+00> : vector<2x128xf32>
    %29 = tpu.matmul %18, %15, %cst_30 {dimension_numbers = #tpu.dot_dimension_numbers<[1], [0], [0], [1], [0, 0, 1, 1], [], []>} : vector<2x32xf32>, vector<32x128xf32>, vector<2x128xf32> -> vector<2x128xf32>
    %30 = arith.addf %26, %28 : vector<2x128xf32>
    %31 = vector.extract_strided_slice %30 {offsets = [0, 0], sizes = [2, 96], strides = [1, 1]} : vector<2x128xf32> to vector<2x96xf32>
    %32 = arith.negf %31 : vector<2x96xf32>
    %33 = math.exp %32 : vector<2x96xf32>
    %cst_31 = arith.constant 1.000000e+00 : f32
    %34 = vector.broadcast %cst_31 : f32 to vector<2x96xf32>
    %35 = arith.addf %34, %33 : vector<2x96xf32>
    %36 = arith.divf %34, %35 : vector<2x96xf32>
    %37 = vector.extract_strided_slice %30 {offsets = [0, 96], sizes = [2, 32], strides = [1, 1]} : vector<2x128xf32> to vector<2x32xf32>
    %38 = math.tanh %37 : vector<2x32xf32>
    %39 = vector.extract_strided_slice %36 {offsets = [0, 32], sizes = [2, 32], strides = [1, 1]} : vector<2x96xf32> to vector<2x32xf32>
    %40 = arith.mulf %39, %17 : vector<2x32xf32>
    %41 = vector.extract_strided_slice %36 {offsets = [0, 0], sizes = [2, 32], strides = [1, 1]} : vector<2x96xf32> to vector<2x32xf32>
    %42 = arith.mulf %41, %38 : vector<2x32xf32>
    %43 = arith.addf %40, %42 : vector<2x32xf32>
    %44 = vector.extract_strided_slice %36 {offsets = [0, 64], sizes = [2, 32], strides = [1, 1]} : vector<2x96xf32> to vector<2x32xf32>
    %45 = math.tanh %43 : vector<2x32xf32>
    %46 = arith.mulf %44, %45 : vector<2x32xf32>
    %47 = arith.addf %27, %29 : vector<2x128xf32>
    %48 = vector.extract_strided_slice %47 {offsets = [0, 0], sizes = [2, 96], strides = [1, 1]} : vector<2x128xf32> to vector<2x96xf32>
    %49 = arith.negf %48 : vector<2x96xf32>
    %50 = math.exp %49 : vector<2x96xf32>
    %cst_32 = arith.constant 1.000000e+00 : f32
    %51 = vector.broadcast %cst_32 : f32 to vector<2x96xf32>
    %52 = arith.addf %51, %50 : vector<2x96xf32>
    %53 = arith.divf %51, %52 : vector<2x96xf32>
    %54 = vector.extract_strided_slice %47 {offsets = [0, 96], sizes = [2, 32], strides = [1, 1]} : vector<2x128xf32> to vector<2x32xf32>
    %55 = math.tanh %54 : vector<2x32xf32>
    %56 = vector.extract_strided_slice %53 {offsets = [0, 32], sizes = [2, 32], strides = [1, 1]} : vector<2x96xf32> to vector<2x32xf32>
    %57 = arith.mulf %56, %19 : vector<2x32xf32>
    %58 = vector.extract_strided_slice %53 {offsets = [0, 0], sizes = [2, 32], strides = [1, 1]} : vector<2x96xf32> to vector<2x32xf32>
    %59 = arith.mulf %58, %55 : vector<2x32xf32>
    %60 = arith.addf %57, %59 : vector<2x32xf32>
    %61 = vector.extract_strided_slice %53 {offsets = [0, 64], sizes = [2, 32], strides = [1, 1]} : vector<2x96xf32> to vector<2x32xf32>
    %62 = math.tanh %60 : vector<2x32xf32>
    %63 = arith.mulf %61, %62 : vector<2x32xf32>
    %64 = vector.shape_cast %22 : vector<2x1xi1> to vector<2x1xi1>
    %65 = vector.broadcast %64 : vector<2x1xi1> to vector<2x32xi1>
    %66 = arith.select %65, %46, %16 : vector<2x32xi1>, vector<2x32xf32>
    %67 = vector.shape_cast %22 : vector<2x1xi1> to vector<2x1xi1>
    %68 = vector.broadcast %67 : vector<2x1xi1> to vector<2x32xi1>
    %69 = arith.select %68, %43, %17 : vector<2x32xi1>, vector<2x32xf32>
    %70 = vector.shape_cast %25 : vector<2x1xi1> to vector<2x1xi1>
    %71 = vector.broadcast %70 : vector<2x1xi1> to vector<2x32xi1>
    %72 = arith.select %71, %63, %18 : vector<2x32xi1>, vector<2x32xf32>
    %73 = vector.shape_cast %25 : vector<2x1xi1> to vector<2x1xi1>
    %74 = vector.broadcast %73 : vector<2x1xi1> to vector<2x32xi1>
    %75 = arith.select %74, %60, %19 : vector<2x32xi1>, vector<2x32xf32>
    %cst_33 = arith.constant 0.000000e+00 : f32
    %76 = vector.shape_cast %22 : vector<2x1xi1> to vector<2x1xi1>
    %77 = vector.broadcast %76 : vector<2x1xi1> to vector<2x32xi1>
    %78 = vector.broadcast %cst_33 : f32 to vector<2x32xf32>
    %79 = arith.select %77, %46, %78 : vector<2x32xi1>, vector<2x32xf32>
    %cst_34 = arith.constant 0.000000e+00 : f32
    %80 = vector.shape_cast %25 : vector<2x1xi1> to vector<2x1xi1>
    %81 = vector.broadcast %80 : vector<2x1xi1> to vector<2x32xi1>
    %82 = vector.broadcast %cst_34 : f32 to vector<2x32xf32>
    %83 = arith.select %81, %63, %82 : vector<2x32xi1>, vector<2x32xf32>
    %c0_35 = arith.constant 0 : index
    %c0_36 = arith.constant 0 : index
    %84 = vector.load %arg21[%c0_35, %c0_36] : memref<16x64xf32, #tpu.memory_space<vmem>>, vector<2x32xf32>
    tpu.vector_store %arg21[%c0_35, %c0_36], %79 {strides = array<i32>} : memref<16x64xf32, #tpu.memory_space<vmem>>, vector<2x32xf32>,
    %c14_37 = arith.constant 14 : index
    %c32 = arith.constant 32 : index
    %85 = vector.load %arg21[%c14_37, %c32] : memref<16x64xf32, #tpu.memory_space<vmem>>, vector<2x32xf32>
    tpu.vector_store %arg21[%c14_37, %c32], %83 {strides = array<i32>} : memref<16x64xf32, #tpu.memory_space<vmem>>, vector<2x32xf32>,
    %86 = vector.extract_strided_slice %0 {offsets = [2, 0], sizes = [2, 1], strides = [1, 1]} : vector<16x1xf32> to vector<2x1xf32>
    %cst_38 = arith.constant 0.000000e+00 : f32
    %87 = vector.broadcast %cst_38 : f32 to vector<2x1xf32>
    %88 = arith.cmpf ogt, %86, %87 : vector<2x1xf32>
    %89 = vector.extract_strided_slice %0 {offsets = [12, 0], sizes = [2, 1], strides = [1, 1]} : vector<16x1xf32> to vector<2x1xf32>
    %cst_39 = arith.constant 0.000000e+00 : f32
    %90 = vector.broadcast %cst_39 : f32 to vector<2x1xf32>
    %91 = arith.cmpf ogt, %89, %90 : vector<2x1xf32>
    %c2 = arith.constant 2 : index
    %c0_40 = arith.constant 0 : index
    %92 = vector.load %arg19[%c2, %c0_40] : memref<16x128xf32, #tpu.memory_space<vmem>>, vector<2x128xf32>
    %c12 = arith.constant 12 : index
    %c0_41 = arith.constant 0 : index
    %93 = vector.load %arg20[%c12, %c0_41] : memref<16x128xf32, #tpu.memory_space<vmem>>, vector<2x128xf32>
    %cst_42 = arith.constant dense<0.000000e+00> : vector<2x128xf32>
    %94 = tpu.matmul %66, %14, %cst_42 {dimension_numbers = #tpu.dot_dimension_numbers<[1], [0], [0], [1], [0, 0, 1, 1], [], []>} : vector<2x32xf32>, vector<32x128xf32>, vector<2x128xf32> -> vector<2x128xf32>
    %cst_43 = arith.constant dense<0.000000e+00> : vector<2x128xf32>
    %95 = tpu.matmul %72, %15, %cst_43 {dimension_numbers = #tpu.dot_dimension_numbers<[1], [0], [0], [1], [0, 0, 1, 1], [], []>} : vector<2x32xf32>, vector<32x128xf32>, vector<2x128xf32> -> vector<2x128xf32>
    %96 = arith.addf %92, %94 : vector<2x128xf32>
    %97 = vector.extract_strided_slice %96 {offsets = [0, 0], sizes = [2, 96], strides = [1, 1]} : vector<2x128xf32> to vector<2x96xf32>
    %98 = arith.negf %97 : vector<2x96xf32>
    %99 = math.exp %98 : vector<2x96xf32>
    %cst_44 = arith.constant 1.000000e+00 : f32
    %100 = vector.broadcast %cst_44 : f32 to vector<2x96xf32>
    %101 = arith.addf %100, %99 : vector<2x96xf32>
    %102 = arith.divf %100, %101 : vector<2x96xf32>
    %103 = vector.extract_strided_slice %96 {offsets = [0, 96], sizes = [2, 32], strides = [1, 1]} : vector<2x128xf32> to vector<2x32xf32>
    %104 = math.tanh %103 : vector<2x32xf32>
    %105 = vector.extract_strided_slice %102 {offsets = [0, 32], sizes = [2, 32], strides = [1, 1]} : vector<2x96xf32> to vector<2x32xf32>
    %106 = arith.mulf %105, %69 : vector<2x32xf32>
    %107 = vector.extract_strided_slice %102 {offsets = [0, 0], sizes = [2, 32], strides = [1, 1]} : vector<2x96xf32> to vector<2x32xf32>
    %108 = arith.mulf %107, %104 : vector<2x32xf32>
    %109 = arith.addf %106, %108 : vector<2x32xf32>
    %110 = vector.extract_strided_slice %102 {offsets = [0, 64], sizes = [2, 32], strides = [1, 1]} : vector<2x96xf32> to vector<2x32xf32>
    %111 = math.tanh %109 : vector<2x32xf32>
    %112 = arith.mulf %110, %111 : vector<2x32xf32>
    %113 = arith.addf %93, %95 : vector<2x128xf32>
    %114 = vector.extract_strided_slice %113 {offsets = [0, 0], sizes = [2, 96], strides = [1, 1]} : vector<2x128xf32> to vector<2x96xf32>
    %115 = arith.negf %114 : vector<2x96xf32>
    %116 = math.exp %115 : vector<2x96xf32>
    %cst_45 = arith.constant 1.000000e+00 : f32
    %117 = vector.broadcast %cst_45 : f32 to vector<2x96xf32>
    %118 = arith.addf %117, %116 : vector<2x96xf32>
    %119 = arith.divf %117, %118 : vector<2x96xf32>
    %120 = vector.extract_strided_slice %113 {offsets = [0, 96], sizes = [2, 32], strides = [1, 1]} : vector<2x128xf32> to vector<2x32xf32>
    %121 = math.tanh %120 : vector<2x32xf32>
    %122 = vector.extract_strided_slice %119 {offsets = [0, 32], sizes = [2, 32], strides = [1, 1]} : vector<2x96xf32> to vector<2x32xf32>
    %123 = arith.mulf %122, %75 : vector<2x32xf32>
    %124 = vector.extract_strided_slice %119 {offsets = [0, 0], sizes = [2, 32], strides = [1, 1]} : vector<2x96xf32> to vector<2x32xf32>
    %125 = arith.mulf %124, %121 : vector<2x32xf32>
    %126 = arith.addf %123, %125 : vector<2x32xf32>
    %127 = vector.extract_strided_slice %119 {offsets = [0, 64], sizes = [2, 32], strides = [1, 1]} : vector<2x96xf32> to vector<2x32xf32>
    %128 = math.tanh %126 : vector<2x32xf32>
    %129 = arith.mulf %127, %128 : vector<2x32xf32>
    %130 = vector.shape_cast %88 : vector<2x1xi1> to vector<2x1xi1>
    %131 = vector.broadcast %130 : vector<2x1xi1> to vector<2x32xi1>
    %132 = arith.select %131, %112, %66 : vector<2x32xi1>, vector<2x32xf32>
    %133 = vector.shape_cast %88 : vector<2x1xi1> to vector<2x1xi1>
    %134 = vector.broadcast %133 : vector<2x1xi1> to vector<2x32xi1>
    %135 = arith.select %134, %109, %69 : vector<2x32xi1>, vector<2x32xf32>
    %136 = vector.shape_cast %91 : vector<2x1xi1> to vector<2x1xi1>
    %137 = vector.broadcast %136 : vector<2x1xi1> to vector<2x32xi1>
    %138 = arith.select %137, %129, %72 : vector<2x32xi1>, vector<2x32xf32>
    %139 = vector.shape_cast %91 : vector<2x1xi1> to vector<2x1xi1>
    %140 = vector.broadcast %139 : vector<2x1xi1> to vector<2x32xi1>
    %141 = arith.select %140, %126, %75 : vector<2x32xi1>, vector<2x32xf32>
    %cst_46 = arith.constant 0.000000e+00 : f32
    %142 = vector.shape_cast %88 : vector<2x1xi1> to vector<2x1xi1>
    %143 = vector.broadcast %142 : vector<2x1xi1> to vector<2x32xi1>
    %144 = vector.broadcast %cst_46 : f32 to vector<2x32xf32>
    %145 = arith.select %143, %112, %144 : vector<2x32xi1>, vector<2x32xf32>
    %cst_47 = arith.constant 0.000000e+00 : f32
    %146 = vector.shape_cast %91 : vector<2x1xi1> to vector<2x1xi1>
    %147 = vector.broadcast %146 : vector<2x1xi1> to vector<2x32xi1>
    %148 = vector.broadcast %cst_47 : f32 to vector<2x32xf32>
    %149 = arith.select %147, %129, %148 : vector<2x32xi1>, vector<2x32xf32>
    %c2_48 = arith.constant 2 : index
    %c0_49 = arith.constant 0 : index
    %150 = vector.load %arg21[%c2_48, %c0_49] : memref<16x64xf32, #tpu.memory_space<vmem>>, vector<2x32xf32>
    tpu.vector_store %arg21[%c2_48, %c0_49], %145 {strides = array<i32>} : memref<16x64xf32, #tpu.memory_space<vmem>>, vector<2x32xf32>,
    %c12_50 = arith.constant 12 : index
    %c32_51 = arith.constant 32 : index
    %151 = vector.load %arg21[%c12_50, %c32_51] : memref<16x64xf32, #tpu.memory_space<vmem>>, vector<2x32xf32>
    tpu.vector_store %arg21[%c12_50, %c32_51], %149 {strides = array<i32>} : memref<16x64xf32, #tpu.memory_space<vmem>>, vector<2x32xf32>,
    %152 = vector.extract_strided_slice %0 {offsets = [4, 0], sizes = [2, 1], strides = [1, 1]} : vector<16x1xf32> to vector<2x1xf32>
    %cst_52 = arith.constant 0.000000e+00 : f32
    %153 = vector.broadcast %cst_52 : f32 to vector<2x1xf32>
    %154 = arith.cmpf ogt, %152, %153 : vector<2x1xf32>
    %155 = vector.extract_strided_slice %0 {offsets = [10, 0], sizes = [2, 1], strides = [1, 1]} : vector<16x1xf32> to vector<2x1xf32>
    %cst_53 = arith.constant 0.000000e+00 : f32
    %156 = vector.broadcast %cst_53 : f32 to vector<2x1xf32>
    %157 = arith.cmpf ogt, %155, %156 : vector<2x1xf32>
    %c4 = arith.constant 4 : index
    %c0_54 = arith.constant 0 : index
    %158 = vector.load %arg19[%c4, %c0_54] : memref<16x128xf32, #tpu.memory_space<vmem>>, vector<2x128xf32>
    %c10 = arith.constant 10 : index
    %c0_55 = arith.constant 0 : index
    %159 = vector.load %arg20[%c10, %c0_55] : memref<16x128xf32, #tpu.memory_space<vmem>>, vector<2x128xf32>
    %cst_56 = arith.constant dense<0.000000e+00> : vector<2x128xf32>
    %160 = tpu.matmul %132, %14, %cst_56 {dimension_numbers = #tpu.dot_dimension_numbers<[1], [0], [0], [1], [0, 0, 1, 1], [], []>} : vector<2x32xf32>, vector<32x128xf32>, vector<2x128xf32> -> vector<2x128xf32>
    %cst_57 = arith.constant dense<0.000000e+00> : vector<2x128xf32>
    %161 = tpu.matmul %138, %15, %cst_57 {dimension_numbers = #tpu.dot_dimension_numbers<[1], [0], [0], [1], [0, 0, 1, 1], [], []>} : vector<2x32xf32>, vector<32x128xf32>, vector<2x128xf32> -> vector<2x128xf32>
    %162 = arith.addf %158, %160 : vector<2x128xf32>
    %163 = vector.extract_strided_slice %162 {offsets = [0, 0], sizes = [2, 96], strides = [1, 1]} : vector<2x128xf32> to vector<2x96xf32>
    %164 = arith.negf %163 : vector<2x96xf32>
    %165 = math.exp %164 : vector<2x96xf32>
    %cst_58 = arith.constant 1.000000e+00 : f32
    %166 = vector.broadcast %cst_58 : f32 to vector<2x96xf32>
    %167 = arith.addf %166, %165 : vector<2x96xf32>
    %168 = arith.divf %166, %167 : vector<2x96xf32>
    %169 = vector.extract_strided_slice %162 {offsets = [0, 96], sizes = [2, 32], strides = [1, 1]} : vector<2x128xf32> to vector<2x32xf32>
    %170 = math.tanh %169 : vector<2x32xf32>
    %171 = vector.extract_strided_slice %168 {offsets = [0, 32], sizes = [2, 32], strides = [1, 1]} : vector<2x96xf32> to vector<2x32xf32>
    %172 = arith.mulf %171, %135 : vector<2x32xf32>
    %173 = vector.extract_strided_slice %168 {offsets = [0, 0], sizes = [2, 32], strides = [1, 1]} : vector<2x96xf32> to vector<2x32xf32>
    %174 = arith.mulf %173, %170 : vector<2x32xf32>
    %175 = arith.addf %172, %174 : vector<2x32xf32>
    %176 = vector.extract_strided_slice %168 {offsets = [0, 64], sizes = [2, 32], strides = [1, 1]} : vector<2x96xf32> to vector<2x32xf32>
    %177 = math.tanh %175 : vector<2x32xf32>
    %178 = arith.mulf %176, %177 : vector<2x32xf32>
    %179 = arith.addf %159, %161 : vector<2x128xf32>
    %180 = vector.extract_strided_slice %179 {offsets = [0, 0], sizes = [2, 96], strides = [1, 1]} : vector<2x128xf32> to vector<2x96xf32>
    %181 = arith.negf %180 : vector<2x96xf32>
    %182 = math.exp %181 : vector<2x96xf32>
    %cst_59 = arith.constant 1.000000e+00 : f32
    %183 = vector.broadcast %cst_59 : f32 to vector<2x96xf32>
    %184 = arith.addf %183, %182 : vector<2x96xf32>
    %185 = arith.divf %183, %184 : vector<2x96xf32>
    %186 = vector.extract_strided_slice %179 {offsets = [0, 96], sizes = [2, 32], strides = [1, 1]} : vector<2x128xf32> to vector<2x32xf32>
    %187 = math.tanh %186 : vector<2x32xf32>
    %188 = vector.extract_strided_slice %185 {offsets = [0, 32], sizes = [2, 32], strides = [1, 1]} : vector<2x96xf32> to vector<2x32xf32>
    %189 = arith.mulf %188, %141 : vector<2x32xf32>
    %190 = vector.extract_strided_slice %185 {offsets = [0, 0], sizes = [2, 32], strides = [1, 1]} : vector<2x96xf32> to vector<2x32xf32>
    %191 = arith.mulf %190, %187 : vector<2x32xf32>
    %192 = arith.addf %189, %191 : vector<2x32xf32>
    %193 = vector.extract_strided_slice %185 {offsets = [0, 64], sizes = [2, 32], strides = [1, 1]} : vector<2x96xf32> to vector<2x32xf32>
    %194 = math.tanh %192 : vector<2x32xf32>
    %195 = arith.mulf %193, %194 : vector<2x32xf32>
    %196 = vector.shape_cast %154 : vector<2x1xi1> to vector<2x1xi1>
    %197 = vector.broadcast %196 : vector<2x1xi1> to vector<2x32xi1>
    %198 = arith.select %197, %178, %132 : vector<2x32xi1>, vector<2x32xf32>
    %199 = vector.shape_cast %154 : vector<2x1xi1> to vector<2x1xi1>
    %200 = vector.broadcast %199 : vector<2x1xi1> to vector<2x32xi1>
    %201 = arith.select %200, %175, %135 : vector<2x32xi1>, vector<2x32xf32>
    %202 = vector.shape_cast %157 : vector<2x1xi1> to vector<2x1xi1>
    %203 = vector.broadcast %202 : vector<2x1xi1> to vector<2x32xi1>
    %204 = arith.select %203, %195, %138 : vector<2x32xi1>, vector<2x32xf32>
    %205 = vector.shape_cast %157 : vector<2x1xi1> to vector<2x1xi1>
    %206 = vector.broadcast %205 : vector<2x1xi1> to vector<2x32xi1>
    %207 = arith.select %206, %192, %141 : vector<2x32xi1>, vector<2x32xf32>
    %cst_60 = arith.constant 0.000000e+00 : f32
    %208 = vector.shape_cast %154 : vector<2x1xi1> to vector<2x1xi1>
    %209 = vector.broadcast %208 : vector<2x1xi1> to vector<2x32xi1>
    %210 = vector.broadcast %cst_60 : f32 to vector<2x32xf32>
    %211 = arith.select %209, %178, %210 : vector<2x32xi1>, vector<2x32xf32>
    %cst_61 = arith.constant 0.000000e+00 : f32
    %212 = vector.shape_cast %157 : vector<2x1xi1> to vector<2x1xi1>
    %213 = vector.broadcast %212 : vector<2x1xi1> to vector<2x32xi1>
    %214 = vector.broadcast %cst_61 : f32 to vector<2x32xf32>
    %215 = arith.select %213, %195, %214 : vector<2x32xi1>, vector<2x32xf32>
    %c4_62 = arith.constant 4 : index
    %c0_63 = arith.constant 0 : index
    %216 = vector.load %arg21[%c4_62, %c0_63] : memref<16x64xf32, #tpu.memory_space<vmem>>, vector<2x32xf32>
    tpu.vector_store %arg21[%c4_62, %c0_63], %211 {strides = array<i32>} : memref<16x64xf32, #tpu.memory_space<vmem>>, vector<2x32xf32>,
    %c10_64 = arith.constant 10 : index
    %c32_65 = arith.constant 32 : index
    %217 = vector.load %arg21[%c10_64, %c32_65] : memref<16x64xf32, #tpu.memory_space<vmem>>, vector<2x32xf32>
    tpu.vector_store %arg21[%c10_64, %c32_65], %215 {strides = array<i32>} : memref<16x64xf32, #tpu.memory_space<vmem>>, vector<2x32xf32>,
    %218 = vector.extract_strided_slice %0 {offsets = [6, 0], sizes = [2, 1], strides = [1, 1]} : vector<16x1xf32> to vector<2x1xf32>
    %cst_66 = arith.constant 0.000000e+00 : f32
    %219 = vector.broadcast %cst_66 : f32 to vector<2x1xf32>
    %220 = arith.cmpf ogt, %218, %219 : vector<2x1xf32>
    %221 = vector.extract_strided_slice %0 {offsets = [8, 0], sizes = [2, 1], strides = [1, 1]} : vector<16x1xf32> to vector<2x1xf32>
    %cst_67 = arith.constant 0.000000e+00 : f32
    %222 = vector.broadcast %cst_67 : f32 to vector<2x1xf32>
    %223 = arith.cmpf ogt, %221, %222 : vector<2x1xf32>
    %c6 = arith.constant 6 : index
    %c0_68 = arith.constant 0 : index
    %224 = vector.load %arg19[%c6, %c0_68] : memref<16x128xf32, #tpu.memory_space<vmem>>, vector<2x128xf32>
    %c8 = arith.constant 8 : index
    %c0_69 = arith.constant 0 : index
    %225 = vector.load %arg20[%c8, %c0_69] : memref<16x128xf32, #tpu.memory_space<vmem>>, vector<2x128xf32>
    %cst_70 = arith.constant dense<0.000000e+00> : vector<2x128xf32>
    %226 = tpu.matmul %198, %14, %cst_70 {dimension_numbers = #tpu.dot_dimension_numbers<[1], [0], [0], [1], [0, 0, 1, 1], [], []>} : vector<2x32xf32>, vector<32x128xf32>, vector<2x128xf32> -> vector<2x128xf32>
    %cst_71 = arith.constant dense<0.000000e+00> : vector<2x128xf32>
    %227 = tpu.matmul %204, %15, %cst_71 {dimension_numbers = #tpu.dot_dimension_numbers<[1], [0], [0], [1], [0, 0, 1, 1], [], []>} : vector<2x32xf32>, vector<32x128xf32>, vector<2x128xf32> -> vector<2x128xf32>
    %228 = arith.addf %224, %226 : vector<2x128xf32>
    %229 = vector.extract_strided_slice %228 {offsets = [0, 0], sizes = [2, 96], strides = [1, 1]} : vector<2x128xf32> to vector<2x96xf32>
    %230 = arith.negf %229 : vector<2x96xf32>
    %231 = math.exp %230 : vector<2x96xf32>
    %cst_72 = arith.constant 1.000000e+00 : f32
    %232 = vector.broadcast %cst_72 : f32 to vector<2x96xf32>
    %233 = arith.addf %232, %231 : vector<2x96xf32>
    %234 = arith.divf %232, %233 : vector<2x96xf32>
    %235 = vector.extract_strided_slice %228 {offsets = [0, 96], sizes = [2, 32], strides = [1, 1]} : vector<2x128xf32> to vector<2x32xf32>
    %236 = math.tanh %235 : vector<2x32xf32>
    %237 = vector.extract_strided_slice %234 {offsets = [0, 32], sizes = [2, 32], strides = [1, 1]} : vector<2x96xf32> to vector<2x32xf32>
    %238 = arith.mulf %237, %201 : vector<2x32xf32>
    %239 = vector.extract_strided_slice %234 {offsets = [0, 0], sizes = [2, 32], strides = [1, 1]} : vector<2x96xf32> to vector<2x32xf32>
    %240 = arith.mulf %239, %236 : vector<2x32xf32>
    %241 = arith.addf %238, %240 : vector<2x32xf32>
    %242 = vector.extract_strided_slice %234 {offsets = [0, 64], sizes = [2, 32], strides = [1, 1]} : vector<2x96xf32> to vector<2x32xf32>
    %243 = math.tanh %241 : vector<2x32xf32>
    %244 = arith.mulf %242, %243 : vector<2x32xf32>
    %245 = arith.addf %225, %227 : vector<2x128xf32>
    %246 = vector.extract_strided_slice %245 {offsets = [0, 0], sizes = [2, 96], strides = [1, 1]} : vector<2x128xf32> to vector<2x96xf32>
    %247 = arith.negf %246 : vector<2x96xf32>
    %248 = math.exp %247 : vector<2x96xf32>
    %cst_73 = arith.constant 1.000000e+00 : f32
    %249 = vector.broadcast %cst_73 : f32 to vector<2x96xf32>
    %250 = arith.addf %249, %248 : vector<2x96xf32>
    %251 = arith.divf %249, %250 : vector<2x96xf32>
    %252 = vector.extract_strided_slice %245 {offsets = [0, 96], sizes = [2, 32], strides = [1, 1]} : vector<2x128xf32> to vector<2x32xf32>
    %253 = math.tanh %252 : vector<2x32xf32>
    %254 = vector.extract_strided_slice %251 {offsets = [0, 32], sizes = [2, 32], strides = [1, 1]} : vector<2x96xf32> to vector<2x32xf32>
    %255 = arith.mulf %254, %207 : vector<2x32xf32>
    %256 = vector.extract_strided_slice %251 {offsets = [0, 0], sizes = [2, 32], strides = [1, 1]} : vector<2x96xf32> to vector<2x32xf32>
    %257 = arith.mulf %256, %253 : vector<2x32xf32>
    %258 = arith.addf %255, %257 : vector<2x32xf32>
    %259 = vector.extract_strided_slice %251 {offsets = [0, 64], sizes = [2, 32], strides = [1, 1]} : vector<2x96xf32> to vector<2x32xf32>
    %260 = math.tanh %258 : vector<2x32xf32>
    %261 = arith.mulf %259, %260 : vector<2x32xf32>
    %262 = vector.shape_cast %220 : vector<2x1xi1> to vector<2x1xi1>
    %263 = vector.broadcast %262 : vector<2x1xi1> to vector<2x32xi1>
    %264 = arith.select %263, %244, %198 : vector<2x32xi1>, vector<2x32xf32>
    %265 = vector.shape_cast %220 : vector<2x1xi1> to vector<2x1xi1>
    %266 = vector.broadcast %265 : vector<2x1xi1> to vector<2x32xi1>
    %267 = arith.select %266, %241, %201 : vector<2x32xi1>, vector<2x32xf32>
    %268 = vector.shape_cast %223 : vector<2x1xi1> to vector<2x1xi1>
    %269 = vector.broadcast %268 : vector<2x1xi1> to vector<2x32xi1>
    %270 = arith.select %269, %261, %204 : vector<2x32xi1>, vector<2x32xf32>
    %271 = vector.shape_cast %223 : vector<2x1xi1> to vector<2x1xi1>
    %272 = vector.broadcast %271 : vector<2x1xi1> to vector<2x32xi1>
    %273 = arith.select %272, %258, %207 : vector<2x32xi1>, vector<2x32xf32>
    %cst_74 = arith.constant 0.000000e+00 : f32
    %274 = vector.shape_cast %220 : vector<2x1xi1> to vector<2x1xi1>
    %275 = vector.broadcast %274 : vector<2x1xi1> to vector<2x32xi1>
    %276 = vector.broadcast %cst_74 : f32 to vector<2x32xf32>
    %277 = arith.select %275, %244, %276 : vector<2x32xi1>, vector<2x32xf32>
    %cst_75 = arith.constant 0.000000e+00 : f32
    %278 = vector.shape_cast %223 : vector<2x1xi1> to vector<2x1xi1>
    %279 = vector.broadcast %278 : vector<2x1xi1> to vector<2x32xi1>
    %280 = vector.broadcast %cst_75 : f32 to vector<2x32xf32>
    %281 = arith.select %279, %261, %280 : vector<2x32xi1>, vector<2x32xf32>
    %c6_76 = arith.constant 6 : index
    %c0_77 = arith.constant 0 : index
    %282 = vector.load %arg21[%c6_76, %c0_77] : memref<16x64xf32, #tpu.memory_space<vmem>>, vector<2x32xf32>
    tpu.vector_store %arg21[%c6_76, %c0_77], %277 {strides = array<i32>} : memref<16x64xf32, #tpu.memory_space<vmem>>, vector<2x32xf32>,
    %c8_78 = arith.constant 8 : index
    %c32_79 = arith.constant 32 : index
    %283 = vector.load %arg21[%c8_78, %c32_79] : memref<16x64xf32, #tpu.memory_space<vmem>>, vector<2x32xf32>
    tpu.vector_store %arg21[%c8_78, %c32_79], %281 {strides = array<i32>} : memref<16x64xf32, #tpu.memory_space<vmem>>, vector<2x32xf32>,
    %284 = vector.extract_strided_slice %0 {offsets = [8, 0], sizes = [2, 1], strides = [1, 1]} : vector<16x1xf32> to vector<2x1xf32>
    %cst_80 = arith.constant 0.000000e+00 : f32
    %285 = vector.broadcast %cst_80 : f32 to vector<2x1xf32>
    %286 = arith.cmpf ogt, %284, %285 : vector<2x1xf32>
    %287 = vector.extract_strided_slice %0 {offsets = [6, 0], sizes = [2, 1], strides = [1, 1]} : vector<16x1xf32> to vector<2x1xf32>
    %cst_81 = arith.constant 0.000000e+00 : f32
    %288 = vector.broadcast %cst_81 : f32 to vector<2x1xf32>
    %289 = arith.cmpf ogt, %287, %288 : vector<2x1xf32>
    %c8_82 = arith.constant 8 : index
    %c0_83 = arith.constant 0 : index
    %290 = vector.load %arg19[%c8_82, %c0_83] : memref<16x128xf32, #tpu.memory_space<vmem>>, vector<2x128xf32>
    %c6_84 = arith.constant 6 : index
    %c0_85 = arith.constant 0 : index
    %291 = vector.load %arg20[%c6_84, %c0_85] : memref<16x128xf32, #tpu.memory_space<vmem>>, vector<2x128xf32>
    %cst_86 = arith.constant dense<0.000000e+00> : vector<2x128xf32>
    %292 = tpu.matmul %264, %14, %cst_86 {dimension_numbers = #tpu.dot_dimension_numbers<[1], [0], [0], [1], [0, 0, 1, 1], [], []>} : vector<2x32xf32>, vector<32x128xf32>, vector<2x128xf32> -> vector<2x128xf32>
    %cst_87 = arith.constant dense<0.000000e+00> : vector<2x128xf32>
    %293 = tpu.matmul %270, %15, %cst_87 {dimension_numbers = #tpu.dot_dimension_numbers<[1], [0], [0], [1], [0, 0, 1, 1], [], []>} : vector<2x32xf32>, vector<32x128xf32>, vector<2x128xf32> -> vector<2x128xf32>
    %294 = arith.addf %290, %292 : vector<2x128xf32>
    %295 = vector.extract_strided_slice %294 {offsets = [0, 0], sizes = [2, 96], strides = [1, 1]} : vector<2x128xf32> to vector<2x96xf32>
    %296 = arith.negf %295 : vector<2x96xf32>
    %297 = math.exp %296 : vector<2x96xf32>
    %cst_88 = arith.constant 1.000000e+00 : f32
    %298 = vector.broadcast %cst_88 : f32 to vector<2x96xf32>
    %299 = arith.addf %298, %297 : vector<2x96xf32>
    %300 = arith.divf %298, %299 : vector<2x96xf32>
    %301 = vector.extract_strided_slice %294 {offsets = [0, 96], sizes = [2, 32], strides = [1, 1]} : vector<2x128xf32> to vector<2x32xf32>
    %302 = math.tanh %301 : vector<2x32xf32>
    %303 = vector.extract_strided_slice %300 {offsets = [0, 32], sizes = [2, 32], strides = [1, 1]} : vector<2x96xf32> to vector<2x32xf32>
    %304 = arith.mulf %303, %267 : vector<2x32xf32>
    %305 = vector.extract_strided_slice %300 {offsets = [0, 0], sizes = [2, 32], strides = [1, 1]} : vector<2x96xf32> to vector<2x32xf32>
    %306 = arith.mulf %305, %302 : vector<2x32xf32>
    %307 = arith.addf %304, %306 : vector<2x32xf32>
    %308 = vector.extract_strided_slice %300 {offsets = [0, 64], sizes = [2, 32], strides = [1, 1]} : vector<2x96xf32> to vector<2x32xf32>
    %309 = math.tanh %307 : vector<2x32xf32>
    %310 = arith.mulf %308, %309 : vector<2x32xf32>
    %311 = arith.addf %291, %293 : vector<2x128xf32>
    %312 = vector.extract_strided_slice %311 {offsets = [0, 0], sizes = [2, 96], strides = [1, 1]} : vector<2x128xf32> to vector<2x96xf32>
    %313 = arith.negf %312 : vector<2x96xf32>
    %314 = math.exp %313 : vector<2x96xf32>
    %cst_89 = arith.constant 1.000000e+00 : f32
    %315 = vector.broadcast %cst_89 : f32 to vector<2x96xf32>
    %316 = arith.addf %315, %314 : vector<2x96xf32>
    %317 = arith.divf %315, %316 : vector<2x96xf32>
    %318 = vector.extract_strided_slice %311 {offsets = [0, 96], sizes = [2, 32], strides = [1, 1]} : vector<2x128xf32> to vector<2x32xf32>
    %319 = math.tanh %318 : vector<2x32xf32>
    %320 = vector.extract_strided_slice %317 {offsets = [0, 32], sizes = [2, 32], strides = [1, 1]} : vector<2x96xf32> to vector<2x32xf32>
    %321 = arith.mulf %320, %273 : vector<2x32xf32>
    %322 = vector.extract_strided_slice %317 {offsets = [0, 0], sizes = [2, 32], strides = [1, 1]} : vector<2x96xf32> to vector<2x32xf32>
    %323 = arith.mulf %322, %319 : vector<2x32xf32>
    %324 = arith.addf %321, %323 : vector<2x32xf32>
    %325 = vector.extract_strided_slice %317 {offsets = [0, 64], sizes = [2, 32], strides = [1, 1]} : vector<2x96xf32> to vector<2x32xf32>
    %326 = math.tanh %324 : vector<2x32xf32>
    %327 = arith.mulf %325, %326 : vector<2x32xf32>
    %328 = vector.shape_cast %286 : vector<2x1xi1> to vector<2x1xi1>
    %329 = vector.broadcast %328 : vector<2x1xi1> to vector<2x32xi1>
    %330 = arith.select %329, %310, %264 : vector<2x32xi1>, vector<2x32xf32>
    %331 = vector.shape_cast %286 : vector<2x1xi1> to vector<2x1xi1>
    %332 = vector.broadcast %331 : vector<2x1xi1> to vector<2x32xi1>
    %333 = arith.select %332, %307, %267 : vector<2x32xi1>, vector<2x32xf32>
    %334 = vector.shape_cast %289 : vector<2x1xi1> to vector<2x1xi1>
    %335 = vector.broadcast %334 : vector<2x1xi1> to vector<2x32xi1>
    %336 = arith.select %335, %327, %270 : vector<2x32xi1>, vector<2x32xf32>
    %337 = vector.shape_cast %289 : vector<2x1xi1> to vector<2x1xi1>
    %338 = vector.broadcast %337 : vector<2x1xi1> to vector<2x32xi1>
    %339 = arith.select %338, %324, %273 : vector<2x32xi1>, vector<2x32xf32>
    %cst_90 = arith.constant 0.000000e+00 : f32
    %340 = vector.shape_cast %286 : vector<2x1xi1> to vector<2x1xi1>
    %341 = vector.broadcast %340 : vector<2x1xi1> to vector<2x32xi1>
    %342 = vector.broadcast %cst_90 : f32 to vector<2x32xf32>
    %343 = arith.select %341, %310, %342 : vector<2x32xi1>, vector<2x32xf32>
    %cst_91 = arith.constant 0.000000e+00 : f32
    %344 = vector.shape_cast %289 : vector<2x1xi1> to vector<2x1xi1>
    %345 = vector.broadcast %344 : vector<2x1xi1> to vector<2x32xi1>
    %346 = vector.broadcast %cst_91 : f32 to vector<2x32xf32>
    %347 = arith.select %345, %327, %346 : vector<2x32xi1>, vector<2x32xf32>
    %c8_92 = arith.constant 8 : index
    %c0_93 = arith.constant 0 : index
    %348 = vector.load %arg21[%c8_92, %c0_93] : memref<16x64xf32, #tpu.memory_space<vmem>>, vector<2x32xf32>
    tpu.vector_store %arg21[%c8_92, %c0_93], %343 {strides = array<i32>} : memref<16x64xf32, #tpu.memory_space<vmem>>, vector<2x32xf32>,
    %c6_94 = arith.constant 6 : index
    %c32_95 = arith.constant 32 : index
    %349 = vector.load %arg21[%c6_94, %c32_95] : memref<16x64xf32, #tpu.memory_space<vmem>>, vector<2x32xf32>
    tpu.vector_store %arg21[%c6_94, %c32_95], %347 {strides = array<i32>} : memref<16x64xf32, #tpu.memory_space<vmem>>, vector<2x32xf32>,
    %350 = vector.extract_strided_slice %0 {offsets = [10, 0], sizes = [2, 1], strides = [1, 1]} : vector<16x1xf32> to vector<2x1xf32>
    %cst_96 = arith.constant 0.000000e+00 : f32
    %351 = vector.broadcast %cst_96 : f32 to vector<2x1xf32>
    %352 = arith.cmpf ogt, %350, %351 : vector<2x1xf32>
    %353 = vector.extract_strided_slice %0 {offsets = [4, 0], sizes = [2, 1], strides = [1, 1]} : vector<16x1xf32> to vector<2x1xf32>
    %cst_97 = arith.constant 0.000000e+00 : f32
    %354 = vector.broadcast %cst_97 : f32 to vector<2x1xf32>
    %355 = arith.cmpf ogt, %353, %354 : vector<2x1xf32>
    %c10_98 = arith.constant 10 : index
    %c0_99 = arith.constant 0 : index
    %356 = vector.load %arg19[%c10_98, %c0_99] : memref<16x128xf32, #tpu.memory_space<vmem>>, vector<2x128xf32>
    %c4_100 = arith.constant 4 : index
    %c0_101 = arith.constant 0 : index
    %357 = vector.load %arg20[%c4_100, %c0_101] : memref<16x128xf32, #tpu.memory_space<vmem>>, vector<2x128xf32>
    %cst_102 = arith.constant dense<0.000000e+00> : vector<2x128xf32>
    %358 = tpu.matmul %330, %14, %cst_102 {dimension_numbers = #tpu.dot_dimension_numbers<[1], [0], [0], [1], [0, 0, 1, 1], [], []>} : vector<2x32xf32>, vector<32x128xf32>, vector<2x128xf32> -> vector<2x128xf32>
    %cst_103 = arith.constant dense<0.000000e+00> : vector<2x128xf32>
    %359 = tpu.matmul %336, %15, %cst_103 {dimension_numbers = #tpu.dot_dimension_numbers<[1], [0], [0], [1], [0, 0, 1, 1], [], []>} : vector<2x32xf32>, vector<32x128xf32>, vector<2x128xf32> -> vector<2x128xf32>
    %360 = arith.addf %356, %358 : vector<2x128xf32>
    %361 = vector.extract_strided_slice %360 {offsets = [0, 0], sizes = [2, 96], strides = [1, 1]} : vector<2x128xf32> to vector<2x96xf32>
    %362 = arith.negf %361 : vector<2x96xf32>
    %363 = math.exp %362 : vector<2x96xf32>
    %cst_104 = arith.constant 1.000000e+00 : f32
    %364 = vector.broadcast %cst_104 : f32 to vector<2x96xf32>
    %365 = arith.addf %364, %363 : vector<2x96xf32>
    %366 = arith.divf %364, %365 : vector<2x96xf32>
    %367 = vector.extract_strided_slice %360 {offsets = [0, 96], sizes = [2, 32], strides = [1, 1]} : vector<2x128xf32> to vector<2x32xf32>
    %368 = math.tanh %367 : vector<2x32xf32>
    %369 = vector.extract_strided_slice %366 {offsets = [0, 32], sizes = [2, 32], strides = [1, 1]} : vector<2x96xf32> to vector<2x32xf32>
    %370 = arith.mulf %369, %333 : vector<2x32xf32>
    %371 = vector.extract_strided_slice %366 {offsets = [0, 0], sizes = [2, 32], strides = [1, 1]} : vector<2x96xf32> to vector<2x32xf32>
    %372 = arith.mulf %371, %368 : vector<2x32xf32>
    %373 = arith.addf %370, %372 : vector<2x32xf32>
    %374 = vector.extract_strided_slice %366 {offsets = [0, 64], sizes = [2, 32], strides = [1, 1]} : vector<2x96xf32> to vector<2x32xf32>
    %375 = math.tanh %373 : vector<2x32xf32>
    %376 = arith.mulf %374, %375 : vector<2x32xf32>
    %377 = arith.addf %357, %359 : vector<2x128xf32>
    %378 = vector.extract_strided_slice %377 {offsets = [0, 0], sizes = [2, 96], strides = [1, 1]} : vector<2x128xf32> to vector<2x96xf32>
    %379 = arith.negf %378 : vector<2x96xf32>
    %380 = math.exp %379 : vector<2x96xf32>
    %cst_105 = arith.constant 1.000000e+00 : f32
    %381 = vector.broadcast %cst_105 : f32 to vector<2x96xf32>
    %382 = arith.addf %381, %380 : vector<2x96xf32>
    %383 = arith.divf %381, %382 : vector<2x96xf32>
    %384 = vector.extract_strided_slice %377 {offsets = [0, 96], sizes = [2, 32], strides = [1, 1]} : vector<2x128xf32> to vector<2x32xf32>
    %385 = math.tanh %384 : vector<2x32xf32>
    %386 = vector.extract_strided_slice %383 {offsets = [0, 32], sizes = [2, 32], strides = [1, 1]} : vector<2x96xf32> to vector<2x32xf32>
    %387 = arith.mulf %386, %339 : vector<2x32xf32>
    %388 = vector.extract_strided_slice %383 {offsets = [0, 0], sizes = [2, 32], strides = [1, 1]} : vector<2x96xf32> to vector<2x32xf32>
    %389 = arith.mulf %388, %385 : vector<2x32xf32>
    %390 = arith.addf %387, %389 : vector<2x32xf32>
    %391 = vector.extract_strided_slice %383 {offsets = [0, 64], sizes = [2, 32], strides = [1, 1]} : vector<2x96xf32> to vector<2x32xf32>
    %392 = math.tanh %390 : vector<2x32xf32>
    %393 = arith.mulf %391, %392 : vector<2x32xf32>
    %394 = vector.shape_cast %352 : vector<2x1xi1> to vector<2x1xi1>
    %395 = vector.broadcast %394 : vector<2x1xi1> to vector<2x32xi1>
    %396 = arith.select %395, %376, %330 : vector<2x32xi1>, vector<2x32xf32>
    %397 = vector.shape_cast %352 : vector<2x1xi1> to vector<2x1xi1>
    %398 = vector.broadcast %397 : vector<2x1xi1> to vector<2x32xi1>
    %399 = arith.select %398, %373, %333 : vector<2x32xi1>, vector<2x32xf32>
    %400 = vector.shape_cast %355 : vector<2x1xi1> to vector<2x1xi1>
    %401 = vector.broadcast %400 : vector<2x1xi1> to vector<2x32xi1>
    %402 = arith.select %401, %393, %336 : vector<2x32xi1>, vector<2x32xf32>
    %403 = vector.shape_cast %355 : vector<2x1xi1> to vector<2x1xi1>
    %404 = vector.broadcast %403 : vector<2x1xi1> to vector<2x32xi1>
    %405 = arith.select %404, %390, %339 : vector<2x32xi1>, vector<2x32xf32>
    %cst_106 = arith.constant 0.000000e+00 : f32
    %406 = vector.shape_cast %352 : vector<2x1xi1> to vector<2x1xi1>
    %407 = vector.broadcast %406 : vector<2x1xi1> to vector<2x32xi1>
    %408 = vector.broadcast %cst_106 : f32 to vector<2x32xf32>
    %409 = arith.select %407, %376, %408 : vector<2x32xi1>, vector<2x32xf32>
    %cst_107 = arith.constant 0.000000e+00 : f32
    %410 = vector.shape_cast %355 : vector<2x1xi1> to vector<2x1xi1>
    %411 = vector.broadcast %410 : vector<2x1xi1> to vector<2x32xi1>
    %412 = vector.broadcast %cst_107 : f32 to vector<2x32xf32>
    %413 = arith.select %411, %393, %412 : vector<2x32xi1>, vector<2x32xf32>
    %c10_108 = arith.constant 10 : index
    %c0_109 = arith.constant 0 : index
    %414 = vector.load %arg21[%c10_108, %c0_109] : memref<16x64xf32, #tpu.memory_space<vmem>>, vector<2x32xf32>
    tpu.vector_store %arg21[%c10_108, %c0_109], %409 {strides = array<i32>} : memref<16x64xf32, #tpu.memory_space<vmem>>, vector<2x32xf32>,
    %c4_110 = arith.constant 4 : index
    %c32_111 = arith.constant 32 : index
    %415 = vector.load %arg21[%c4_110, %c32_111] : memref<16x64xf32, #tpu.memory_space<vmem>>, vector<2x32xf32>
    tpu.vector_store %arg21[%c4_110, %c32_111], %413 {strides = array<i32>} : memref<16x64xf32, #tpu.memory_space<vmem>>, vector<2x32xf32>,
    %416 = vector.extract_strided_slice %0 {offsets = [12, 0], sizes = [2, 1], strides = [1, 1]} : vector<16x1xf32> to vector<2x1xf32>
    %cst_112 = arith.constant 0.000000e+00 : f32
    %417 = vector.broadcast %cst_112 : f32 to vector<2x1xf32>
    %418 = arith.cmpf ogt, %416, %417 : vector<2x1xf32>
    %419 = vector.extract_strided_slice %0 {offsets = [2, 0], sizes = [2, 1], strides = [1, 1]} : vector<16x1xf32> to vector<2x1xf32>
    %cst_113 = arith.constant 0.000000e+00 : f32
    %420 = vector.broadcast %cst_113 : f32 to vector<2x1xf32>
    %421 = arith.cmpf ogt, %419, %420 : vector<2x1xf32>
    %c12_114 = arith.constant 12 : index
    %c0_115 = arith.constant 0 : index
    %422 = vector.load %arg19[%c12_114, %c0_115] : memref<16x128xf32, #tpu.memory_space<vmem>>, vector<2x128xf32>
    %c2_116 = arith.constant 2 : index
    %c0_117 = arith.constant 0 : index
    %423 = vector.load %arg20[%c2_116, %c0_117] : memref<16x128xf32, #tpu.memory_space<vmem>>, vector<2x128xf32>
    %cst_118 = arith.constant dense<0.000000e+00> : vector<2x128xf32>
    %424 = tpu.matmul %396, %14, %cst_118 {dimension_numbers = #tpu.dot_dimension_numbers<[1], [0], [0], [1], [0, 0, 1, 1], [], []>} : vector<2x32xf32>, vector<32x128xf32>, vector<2x128xf32> -> vector<2x128xf32>
    %cst_119 = arith.constant dense<0.000000e+00> : vector<2x128xf32>
    %425 = tpu.matmul %402, %15, %cst_119 {dimension_numbers = #tpu.dot_dimension_numbers<[1], [0], [0], [1], [0, 0, 1, 1], [], []>} : vector<2x32xf32>, vector<32x128xf32>, vector<2x128xf32> -> vector<2x128xf32>
    %426 = arith.addf %422, %424 : vector<2x128xf32>
    %427 = vector.extract_strided_slice %426 {offsets = [0, 0], sizes = [2, 96], strides = [1, 1]} : vector<2x128xf32> to vector<2x96xf32>
    %428 = arith.negf %427 : vector<2x96xf32>
    %429 = math.exp %428 : vector<2x96xf32>
    %cst_120 = arith.constant 1.000000e+00 : f32
    %430 = vector.broadcast %cst_120 : f32 to vector<2x96xf32>
    %431 = arith.addf %430, %429 : vector<2x96xf32>
    %432 = arith.divf %430, %431 : vector<2x96xf32>
    %433 = vector.extract_strided_slice %426 {offsets = [0, 96], sizes = [2, 32], strides = [1, 1]} : vector<2x128xf32> to vector<2x32xf32>
    %434 = math.tanh %433 : vector<2x32xf32>
    %435 = vector.extract_strided_slice %432 {offsets = [0, 32], sizes = [2, 32], strides = [1, 1]} : vector<2x96xf32> to vector<2x32xf32>
    %436 = arith.mulf %435, %399 : vector<2x32xf32>
    %437 = vector.extract_strided_slice %432 {offsets = [0, 0], sizes = [2, 32], strides = [1, 1]} : vector<2x96xf32> to vector<2x32xf32>
    %438 = arith.mulf %437, %434 : vector<2x32xf32>
    %439 = arith.addf %436, %438 : vector<2x32xf32>
    %440 = vector.extract_strided_slice %432 {offsets = [0, 64], sizes = [2, 32], strides = [1, 1]} : vector<2x96xf32> to vector<2x32xf32>
    %441 = math.tanh %439 : vector<2x32xf32>
    %442 = arith.mulf %440, %441 : vector<2x32xf32>
    %443 = arith.addf %423, %425 : vector<2x128xf32>
    %444 = vector.extract_strided_slice %443 {offsets = [0, 0], sizes = [2, 96], strides = [1, 1]} : vector<2x128xf32> to vector<2x96xf32>
    %445 = arith.negf %444 : vector<2x96xf32>
    %446 = math.exp %445 : vector<2x96xf32>
    %cst_121 = arith.constant 1.000000e+00 : f32
    %447 = vector.broadcast %cst_121 : f32 to vector<2x96xf32>
    %448 = arith.addf %447, %446 : vector<2x96xf32>
    %449 = arith.divf %447, %448 : vector<2x96xf32>
    %450 = vector.extract_strided_slice %443 {offsets = [0, 96], sizes = [2, 32], strides = [1, 1]} : vector<2x128xf32> to vector<2x32xf32>
    %451 = math.tanh %450 : vector<2x32xf32>
    %452 = vector.extract_strided_slice %449 {offsets = [0, 32], sizes = [2, 32], strides = [1, 1]} : vector<2x96xf32> to vector<2x32xf32>
    %453 = arith.mulf %452, %405 : vector<2x32xf32>
    %454 = vector.extract_strided_slice %449 {offsets = [0, 0], sizes = [2, 32], strides = [1, 1]} : vector<2x96xf32> to vector<2x32xf32>
    %455 = arith.mulf %454, %451 : vector<2x32xf32>
    %456 = arith.addf %453, %455 : vector<2x32xf32>
    %457 = vector.extract_strided_slice %449 {offsets = [0, 64], sizes = [2, 32], strides = [1, 1]} : vector<2x96xf32> to vector<2x32xf32>
    %458 = math.tanh %456 : vector<2x32xf32>
    %459 = arith.mulf %457, %458 : vector<2x32xf32>
    %460 = vector.shape_cast %418 : vector<2x1xi1> to vector<2x1xi1>
    %461 = vector.broadcast %460 : vector<2x1xi1> to vector<2x32xi1>
    %462 = arith.select %461, %442, %396 : vector<2x32xi1>, vector<2x32xf32>
    %463 = vector.shape_cast %418 : vector<2x1xi1> to vector<2x1xi1>
    %464 = vector.broadcast %463 : vector<2x1xi1> to vector<2x32xi1>
    %465 = arith.select %464, %439, %399 : vector<2x32xi1>, vector<2x32xf32>
    %466 = vector.shape_cast %421 : vector<2x1xi1> to vector<2x1xi1>
    %467 = vector.broadcast %466 : vector<2x1xi1> to vector<2x32xi1>
    %468 = arith.select %467, %459, %402 : vector<2x32xi1>, vector<2x32xf32>
    %469 = vector.shape_cast %421 : vector<2x1xi1> to vector<2x1xi1>
    %470 = vector.broadcast %469 : vector<2x1xi1> to vector<2x32xi1>
    %471 = arith.select %470, %456, %405 : vector<2x32xi1>, vector<2x32xf32>
    %cst_122 = arith.constant 0.000000e+00 : f32
    %472 = vector.shape_cast %418 : vector<2x1xi1> to vector<2x1xi1>
    %473 = vector.broadcast %472 : vector<2x1xi1> to vector<2x32xi1>
    %474 = vector.broadcast %cst_122 : f32 to vector<2x32xf32>
    %475 = arith.select %473, %442, %474 : vector<2x32xi1>, vector<2x32xf32>
    %cst_123 = arith.constant 0.000000e+00 : f32
    %476 = vector.shape_cast %421 : vector<2x1xi1> to vector<2x1xi1>
    %477 = vector.broadcast %476 : vector<2x1xi1> to vector<2x32xi1>
    %478 = vector.broadcast %cst_123 : f32 to vector<2x32xf32>
    %479 = arith.select %477, %459, %478 : vector<2x32xi1>, vector<2x32xf32>
    %c12_124 = arith.constant 12 : index
    %c0_125 = arith.constant 0 : index
    %480 = vector.load %arg21[%c12_124, %c0_125] : memref<16x64xf32, #tpu.memory_space<vmem>>, vector<2x32xf32>
    tpu.vector_store %arg21[%c12_124, %c0_125], %475 {strides = array<i32>} : memref<16x64xf32, #tpu.memory_space<vmem>>, vector<2x32xf32>,
    %c2_126 = arith.constant 2 : index
    %c32_127 = arith.constant 32 : index
    %481 = vector.load %arg21[%c2_126, %c32_127] : memref<16x64xf32, #tpu.memory_space<vmem>>, vector<2x32xf32>
    tpu.vector_store %arg21[%c2_126, %c32_127], %479 {strides = array<i32>} : memref<16x64xf32, #tpu.memory_space<vmem>>, vector<2x32xf32>,
    %482 = vector.extract_strided_slice %0 {offsets = [14, 0], sizes = [2, 1], strides = [1, 1]} : vector<16x1xf32> to vector<2x1xf32>
    %cst_128 = arith.constant 0.000000e+00 : f32
    %483 = vector.broadcast %cst_128 : f32 to vector<2x1xf32>
    %484 = arith.cmpf ogt, %482, %483 : vector<2x1xf32>
    %485 = vector.extract_strided_slice %0 {offsets = [0, 0], sizes = [2, 1], strides = [1, 1]} : vector<16x1xf32> to vector<2x1xf32>
    %cst_129 = arith.constant 0.000000e+00 : f32
    %486 = vector.broadcast %cst_129 : f32 to vector<2x1xf32>
    %487 = arith.cmpf ogt, %485, %486 : vector<2x1xf32>
    %c14_130 = arith.constant 14 : index
    %c0_131 = arith.constant 0 : index
    %488 = vector.load %arg19[%c14_130, %c0_131] : memref<16x128xf32, #tpu.memory_space<vmem>>, vector<2x128xf32>
    %c0_132 = arith.constant 0 : index
    %c0_133 = arith.constant 0 : index
    %489 = vector.load %arg20[%c0_132, %c0_133] : memref<16x128xf32, #tpu.memory_space<vmem>>, vector<2x128xf32>
    %cst_134 = arith.constant dense<0.000000e+00> : vector<2x128xf32>
    %490 = tpu.matmul %462, %14, %cst_134 {dimension_numbers = #tpu.dot_dimension_numbers<[1], [0], [0], [1], [0, 0, 1, 1], [], []>} : vector<2x32xf32>, vector<32x128xf32>, vector<2x128xf32> -> vector<2x128xf32>
    %cst_135 = arith.constant dense<0.000000e+00> : vector<2x128xf32>
    %491 = tpu.matmul %468, %15, %cst_135 {dimension_numbers = #tpu.dot_dimension_numbers<[1], [0], [0], [1], [0, 0, 1, 1], [], []>} : vector<2x32xf32>, vector<32x128xf32>, vector<2x128xf32> -> vector<2x128xf32>
    %492 = arith.addf %488, %490 : vector<2x128xf32>
    %493 = vector.extract_strided_slice %492 {offsets = [0, 0], sizes = [2, 96], strides = [1, 1]} : vector<2x128xf32> to vector<2x96xf32>
    %494 = arith.negf %493 : vector<2x96xf32>
    %495 = math.exp %494 : vector<2x96xf32>
    %cst_136 = arith.constant 1.000000e+00 : f32
    %496 = vector.broadcast %cst_136 : f32 to vector<2x96xf32>
    %497 = arith.addf %496, %495 : vector<2x96xf32>
    %498 = arith.divf %496, %497 : vector<2x96xf32>
    %499 = vector.extract_strided_slice %492 {offsets = [0, 96], sizes = [2, 32], strides = [1, 1]} : vector<2x128xf32> to vector<2x32xf32>
    %500 = math.tanh %499 : vector<2x32xf32>
    %501 = vector.extract_strided_slice %498 {offsets = [0, 32], sizes = [2, 32], strides = [1, 1]} : vector<2x96xf32> to vector<2x32xf32>
    %502 = arith.mulf %501, %465 : vector<2x32xf32>
    %503 = vector.extract_strided_slice %498 {offsets = [0, 0], sizes = [2, 32], strides = [1, 1]} : vector<2x96xf32> to vector<2x32xf32>
    %504 = arith.mulf %503, %500 : vector<2x32xf32>
    %505 = arith.addf %502, %504 : vector<2x32xf32>
    %506 = vector.extract_strided_slice %498 {offsets = [0, 64], sizes = [2, 32], strides = [1, 1]} : vector<2x96xf32> to vector<2x32xf32>
    %507 = math.tanh %505 : vector<2x32xf32>
    %508 = arith.mulf %506, %507 : vector<2x32xf32>
    %509 = arith.addf %489, %491 : vector<2x128xf32>
    %510 = vector.extract_strided_slice %509 {offsets = [0, 0], sizes = [2, 96], strides = [1, 1]} : vector<2x128xf32> to vector<2x96xf32>
    %511 = arith.negf %510 : vector<2x96xf32>
    %512 = math.exp %511 : vector<2x96xf32>
    %cst_137 = arith.constant 1.000000e+00 : f32
    %513 = vector.broadcast %cst_137 : f32 to vector<2x96xf32>
    %514 = arith.addf %513, %512 : vector<2x96xf32>
    %515 = arith.divf %513, %514 : vector<2x96xf32>
    %516 = vector.extract_strided_slice %509 {offsets = [0, 96], sizes = [2, 32], strides = [1, 1]} : vector<2x128xf32> to vector<2x32xf32>
    %517 = math.tanh %516 : vector<2x32xf32>
    %518 = vector.extract_strided_slice %515 {offsets = [0, 32], sizes = [2, 32], strides = [1, 1]} : vector<2x96xf32> to vector<2x32xf32>
    %519 = arith.mulf %518, %471 : vector<2x32xf32>
    %520 = vector.extract_strided_slice %515 {offsets = [0, 0], sizes = [2, 32], strides = [1, 1]} : vector<2x96xf32> to vector<2x32xf32>
    %521 = arith.mulf %520, %517 : vector<2x32xf32>
    %522 = arith.addf %519, %521 : vector<2x32xf32>
    %523 = vector.extract_strided_slice %515 {offsets = [0, 64], sizes = [2, 32], strides = [1, 1]} : vector<2x96xf32> to vector<2x32xf32>
    %524 = math.tanh %522 : vector<2x32xf32>
    %525 = arith.mulf %523, %524 : vector<2x32xf32>
    %cst_138 = arith.constant 0.000000e+00 : f32
    %526 = vector.shape_cast %484 : vector<2x1xi1> to vector<2x1xi1>
    %527 = vector.broadcast %526 : vector<2x1xi1> to vector<2x32xi1>
    %528 = vector.broadcast %cst_138 : f32 to vector<2x32xf32>
    %529 = arith.select %527, %508, %528 : vector<2x32xi1>, vector<2x32xf32>
    %cst_139 = arith.constant 0.000000e+00 : f32
    %530 = vector.shape_cast %487 : vector<2x1xi1> to vector<2x1xi1>
    %531 = vector.broadcast %530 : vector<2x1xi1> to vector<2x32xi1>
    %532 = vector.broadcast %cst_139 : f32 to vector<2x32xf32>
    %533 = arith.select %531, %525, %532 : vector<2x32xi1>, vector<2x32xf32>
    %c14_140 = arith.constant 14 : index
    %c0_141 = arith.constant 0 : index
    %534 = vector.load %arg21[%c14_140, %c0_141] : memref<16x64xf32, #tpu.memory_space<vmem>>, vector<2x32xf32>
    tpu.vector_store %arg21[%c14_140, %c0_141], %529 {strides = array<i32>} : memref<16x64xf32, #tpu.memory_space<vmem>>, vector<2x32xf32>,
    %c0_142 = arith.constant 0 : index
    %c32_143 = arith.constant 32 : index
    %535 = vector.load %arg21[%c0_142, %c32_143] : memref<16x64xf32, #tpu.memory_space<vmem>>, vector<2x32xf32>
    tpu.vector_store %arg21[%c0_142, %c32_143], %533 {strides = array<i32>} : memref<16x64xf32, #tpu.memory_space<vmem>>, vector<2x32xf32>,
    %c0_144 = arith.constant 0 : index
    %c0_145 = arith.constant 0 : index
    %536 = vector.load %arg21[%c0_144, %c0_145] : memref<16x64xf32, #tpu.memory_space<vmem>>, vector<16x64xf32>
    %c0_146 = arith.constant 0 : index
    %c0_147 = arith.constant 0 : index
    %537 = vector.load %arg8[%c0_146, %c0_147] : memref<64x128xf32, #tpu.memory_space<vmem>>, vector<64x128xf32>
    %cst_148 = arith.constant dense<0.000000e+00> : vector<16x128xf32>
    %538 = tpu.matmul %536, %537, %cst_148 {dimension_numbers = #tpu.dot_dimension_numbers<[1], [0], [0], [1], [0, 0, 1, 1], [], []>} : vector<16x64xf32>, vector<64x128xf32>, vector<16x128xf32> -> vector<16x128xf32>
    %c0_149 = arith.constant 0 : index
    %c0_150 = arith.constant 0 : index
    %539 = vector.load %arg9[%c0_149, %c0_150] : memref<1x128xf32, #tpu.memory_space<vmem>>, vector<1x128xf32>
    %540 = vector.broadcast %539 : vector<1x128xf32> to vector<16x128xf32>
    %541 = arith.addf %538, %540 : vector<16x128xf32>
    %c0_151 = arith.constant 0 : index
    %c0_152 = arith.constant 0 : index
    %542 = vector.load %arg19[%c0_151, %c0_152] : memref<16x128xf32, #tpu.memory_space<vmem>>, vector<16x128xf32>
    tpu.vector_store %arg19[%c0_151, %c0_152], %541 {strides = array<i32>} : memref<16x128xf32, #tpu.memory_space<vmem>>, vector<16x128xf32>,
    %c0_153 = arith.constant 0 : index
    %c0_154 = arith.constant 0 : index
    %543 = vector.load %arg11[%c0_153, %c0_154] : memref<64x128xf32, #tpu.memory_space<vmem>>, vector<64x128xf32>
    %cst_155 = arith.constant dense<0.000000e+00> : vector<16x128xf32>
    %544 = tpu.matmul %536, %543, %cst_155 {dimension_numbers = #tpu.dot_dimension_numbers<[1], [0], [0], [1], [0, 0, 1, 1], [], []>} : vector<16x64xf32>, vector<64x128xf32>, vector<16x128xf32> -> vector<16x128xf32>
    %c0_156 = arith.constant 0 : index
    %c0_157 = arith.constant 0 : index
    %545 = vector.load %arg12[%c0_156, %c0_157] : memref<1x128xf32, #tpu.memory_space<vmem>>, vector<1x128xf32>
    %546 = vector.broadcast %545 : vector<1x128xf32> to vector<16x128xf32>
    %547 = arith.addf %544, %546 : vector<16x128xf32>
    %c0_158 = arith.constant 0 : index
    %c0_159 = arith.constant 0 : index
    %548 = vector.load %arg20[%c0_158, %c0_159] : memref<16x128xf32, #tpu.memory_space<vmem>>, vector<16x128xf32>
    tpu.vector_store %arg20[%c0_158, %c0_159], %547 {strides = array<i32>} : memref<16x128xf32, #tpu.memory_space<vmem>>, vector<16x128xf32>,
    %c0_160 = arith.constant 0 : index
    %c0_161 = arith.constant 0 : index
    %549 = vector.load %arg10[%c0_160, %c0_161] : memref<32x128xf32, #tpu.memory_space<vmem>>, vector<32x128xf32>
    %c0_162 = arith.constant 0 : index
    %c0_163 = arith.constant 0 : index
    %550 = vector.load %arg13[%c0_162, %c0_163] : memref<32x128xf32, #tpu.memory_space<vmem>>, vector<32x128xf32>
    %cst_164 = arith.constant 0.000000e+00 : f32
    %551 = vector.broadcast %cst_164 : f32 to vector<2x32xf32>
    %cst_165 = arith.constant 0.000000e+00 : f32
    %552 = vector.broadcast %cst_165 : f32 to vector<2x32xf32>
    %cst_166 = arith.constant 0.000000e+00 : f32
    %553 = vector.broadcast %cst_166 : f32 to vector<2x32xf32>
    %cst_167 = arith.constant 0.000000e+00 : f32
    %554 = vector.broadcast %cst_167 : f32 to vector<2x32xf32>
    %cst_168 = arith.constant 0.000000e+00 : f32
    %555 = vector.broadcast %cst_168 : f32 to vector<2x32xf32>
    %cst_169 = arith.constant 0.000000e+00 : f32
    %556 = vector.broadcast %cst_169 : f32 to vector<2x32xf32>
    %557 = vector.extract_strided_slice %0 {offsets = [0, 0], sizes = [2, 1], strides = [1, 1]} : vector<16x1xf32> to vector<2x1xf32>
    %cst_170 = arith.constant 0.000000e+00 : f32
    %558 = vector.broadcast %cst_170 : f32 to vector<2x1xf32>
    %559 = arith.cmpf ogt, %557, %558 : vector<2x1xf32>
    %560 = vector.extract_strided_slice %0 {offsets = [14, 0], sizes = [2, 1], strides = [1, 1]} : vector<16x1xf32> to vector<2x1xf32>
    %cst_171 = arith.constant 0.000000e+00 : f32
    %561 = vector.broadcast %cst_171 : f32 to vector<2x1xf32>
    %562 = arith.cmpf ogt, %560, %561 : vector<2x1xf32>
    %c0_172 = arith.constant 0 : index
    %c0_173 = arith.constant 0 : index
    %563 = vector.load %arg19[%c0_172, %c0_173] : memref<16x128xf32, #tpu.memory_space<vmem>>, vector<2x128xf32>
    %c14_174 = arith.constant 14 : index
    %c0_175 = arith.constant 0 : index
    %564 = vector.load %arg20[%c14_174, %c0_175] : memref<16x128xf32, #tpu.memory_space<vmem>>, vector<2x128xf32>
    %cst_176 = arith.constant dense<0.000000e+00> : vector<2x128xf32>
    %565 = tpu.matmul %551, %549, %cst_176 {dimension_numbers = #tpu.dot_dimension_numbers<[1], [0], [0], [1], [0, 0, 1, 1], [], []>} : vector<2x32xf32>, vector<32x128xf32>, vector<2x128xf32> -> vector<2x128xf32>
    %cst_177 = arith.constant dense<0.000000e+00> : vector<2x128xf32>
    %566 = tpu.matmul %553, %550, %cst_177 {dimension_numbers = #tpu.dot_dimension_numbers<[1], [0], [0], [1], [0, 0, 1, 1], [], []>} : vector<2x32xf32>, vector<32x128xf32>, vector<2x128xf32> -> vector<2x128xf32>
    %567 = arith.addf %563, %565 : vector<2x128xf32>
    %568 = vector.extract_strided_slice %567 {offsets = [0, 0], sizes = [2, 96], strides = [1, 1]} : vector<2x128xf32> to vector<2x96xf32>
    %569 = arith.negf %568 : vector<2x96xf32>
    %570 = math.exp %569 : vector<2x96xf32>
    %cst_178 = arith.constant 1.000000e+00 : f32
    %571 = vector.broadcast %cst_178 : f32 to vector<2x96xf32>
    %572 = arith.addf %571, %570 : vector<2x96xf32>
    %573 = arith.divf %571, %572 : vector<2x96xf32>
    %574 = vector.extract_strided_slice %567 {offsets = [0, 96], sizes = [2, 32], strides = [1, 1]} : vector<2x128xf32> to vector<2x32xf32>
    %575 = math.tanh %574 : vector<2x32xf32>
    %576 = vector.extract_strided_slice %573 {offsets = [0, 32], sizes = [2, 32], strides = [1, 1]} : vector<2x96xf32> to vector<2x32xf32>
    %577 = arith.mulf %576, %552 : vector<2x32xf32>
    %578 = vector.extract_strided_slice %573 {offsets = [0, 0], sizes = [2, 32], strides = [1, 1]} : vector<2x96xf32> to vector<2x32xf32>
    %579 = arith.mulf %578, %575 : vector<2x32xf32>
    %580 = arith.addf %577, %579 : vector<2x32xf32>
    %581 = vector.extract_strided_slice %573 {offsets = [0, 64], sizes = [2, 32], strides = [1, 1]} : vector<2x96xf32> to vector<2x32xf32>
    %582 = math.tanh %580 : vector<2x32xf32>
    %583 = arith.mulf %581, %582 : vector<2x32xf32>
    %584 = arith.addf %564, %566 : vector<2x128xf32>
    %585 = vector.extract_strided_slice %584 {offsets = [0, 0], sizes = [2, 96], strides = [1, 1]} : vector<2x128xf32> to vector<2x96xf32>
    %586 = arith.negf %585 : vector<2x96xf32>
    %587 = math.exp %586 : vector<2x96xf32>
    %cst_179 = arith.constant 1.000000e+00 : f32
    %588 = vector.broadcast %cst_179 : f32 to vector<2x96xf32>
    %589 = arith.addf %588, %587 : vector<2x96xf32>
    %590 = arith.divf %588, %589 : vector<2x96xf32>
    %591 = vector.extract_strided_slice %584 {offsets = [0, 96], sizes = [2, 32], strides = [1, 1]} : vector<2x128xf32> to vector<2x32xf32>
    %592 = math.tanh %591 : vector<2x32xf32>
    %593 = vector.extract_strided_slice %590 {offsets = [0, 32], sizes = [2, 32], strides = [1, 1]} : vector<2x96xf32> to vector<2x32xf32>
    %594 = arith.mulf %593, %554 : vector<2x32xf32>
    %595 = vector.extract_strided_slice %590 {offsets = [0, 0], sizes = [2, 32], strides = [1, 1]} : vector<2x96xf32> to vector<2x32xf32>
    %596 = arith.mulf %595, %592 : vector<2x32xf32>
    %597 = arith.addf %594, %596 : vector<2x32xf32>
    %598 = vector.extract_strided_slice %590 {offsets = [0, 64], sizes = [2, 32], strides = [1, 1]} : vector<2x96xf32> to vector<2x32xf32>
    %599 = math.tanh %597 : vector<2x32xf32>
    %600 = arith.mulf %598, %599 : vector<2x32xf32>
    %601 = vector.shape_cast %559 : vector<2x1xi1> to vector<2x1xi1>
    %602 = vector.broadcast %601 : vector<2x1xi1> to vector<2x32xi1>
    %603 = arith.select %602, %583, %551 : vector<2x32xi1>, vector<2x32xf32>
    %604 = vector.shape_cast %559 : vector<2x1xi1> to vector<2x1xi1>
    %605 = vector.broadcast %604 : vector<2x1xi1> to vector<2x32xi1>
    %606 = arith.select %605, %580, %552 : vector<2x32xi1>, vector<2x32xf32>
    %607 = vector.shape_cast %562 : vector<2x1xi1> to vector<2x1xi1>
    %608 = vector.broadcast %607 : vector<2x1xi1> to vector<2x32xi1>
    %609 = arith.select %608, %600, %553 : vector<2x32xi1>, vector<2x32xf32>
    %610 = vector.shape_cast %562 : vector<2x1xi1> to vector<2x1xi1>
    %611 = vector.broadcast %610 : vector<2x1xi1> to vector<2x32xi1>
    %612 = arith.select %611, %597, %554 : vector<2x32xi1>, vector<2x32xf32>
    %cst_180 = arith.constant 0.000000e+00 : f32
    %613 = vector.shape_cast %559 : vector<2x1xi1> to vector<2x1xi1>
    %614 = vector.broadcast %613 : vector<2x1xi1> to vector<2x32xi1>
    %615 = vector.broadcast %cst_180 : f32 to vector<2x32xf32>
    %616 = arith.select %614, %583, %615 : vector<2x32xi1>, vector<2x32xf32>
    %cst_181 = arith.constant 0.000000e+00 : f32
    %617 = vector.shape_cast %562 : vector<2x1xi1> to vector<2x1xi1>
    %618 = vector.broadcast %617 : vector<2x1xi1> to vector<2x32xi1>
    %619 = vector.broadcast %cst_181 : f32 to vector<2x32xf32>
    %620 = arith.select %618, %600, %619 : vector<2x32xi1>, vector<2x32xf32>
    %621 = arith.addf %555, %616 : vector<2x32xf32>
    %622 = arith.addf %556, %620 : vector<2x32xf32>
    %623 = vector.extract_strided_slice %0 {offsets = [2, 0], sizes = [2, 1], strides = [1, 1]} : vector<16x1xf32> to vector<2x1xf32>
    %cst_182 = arith.constant 0.000000e+00 : f32
    %624 = vector.broadcast %cst_182 : f32 to vector<2x1xf32>
    %625 = arith.cmpf ogt, %623, %624 : vector<2x1xf32>
    %626 = vector.extract_strided_slice %0 {offsets = [12, 0], sizes = [2, 1], strides = [1, 1]} : vector<16x1xf32> to vector<2x1xf32>
    %cst_183 = arith.constant 0.000000e+00 : f32
    %627 = vector.broadcast %cst_183 : f32 to vector<2x1xf32>
    %628 = arith.cmpf ogt, %626, %627 : vector<2x1xf32>
    %c2_184 = arith.constant 2 : index
    %c0_185 = arith.constant 0 : index
    %629 = vector.load %arg19[%c2_184, %c0_185] : memref<16x128xf32, #tpu.memory_space<vmem>>, vector<2x128xf32>
    %c12_186 = arith.constant 12 : index
    %c0_187 = arith.constant 0 : index
    %630 = vector.load %arg20[%c12_186, %c0_187] : memref<16x128xf32, #tpu.memory_space<vmem>>, vector<2x128xf32>
    %cst_188 = arith.constant dense<0.000000e+00> : vector<2x128xf32>
    %631 = tpu.matmul %603, %549, %cst_188 {dimension_numbers = #tpu.dot_dimension_numbers<[1], [0], [0], [1], [0, 0, 1, 1], [], []>} : vector<2x32xf32>, vector<32x128xf32>, vector<2x128xf32> -> vector<2x128xf32>
    %cst_189 = arith.constant dense<0.000000e+00> : vector<2x128xf32>
    %632 = tpu.matmul %609, %550, %cst_189 {dimension_numbers = #tpu.dot_dimension_numbers<[1], [0], [0], [1], [0, 0, 1, 1], [], []>} : vector<2x32xf32>, vector<32x128xf32>, vector<2x128xf32> -> vector<2x128xf32>
    %633 = arith.addf %629, %631 : vector<2x128xf32>
    %634 = vector.extract_strided_slice %633 {offsets = [0, 0], sizes = [2, 96], strides = [1, 1]} : vector<2x128xf32> to vector<2x96xf32>
    %635 = arith.negf %634 : vector<2x96xf32>
    %636 = math.exp %635 : vector<2x96xf32>
    %cst_190 = arith.constant 1.000000e+00 : f32
    %637 = vector.broadcast %cst_190 : f32 to vector<2x96xf32>
    %638 = arith.addf %637, %636 : vector<2x96xf32>
    %639 = arith.divf %637, %638 : vector<2x96xf32>
    %640 = vector.extract_strided_slice %633 {offsets = [0, 96], sizes = [2, 32], strides = [1, 1]} : vector<2x128xf32> to vector<2x32xf32>
    %641 = math.tanh %640 : vector<2x32xf32>
    %642 = vector.extract_strided_slice %639 {offsets = [0, 32], sizes = [2, 32], strides = [1, 1]} : vector<2x96xf32> to vector<2x32xf32>
    %643 = arith.mulf %642, %606 : vector<2x32xf32>
    %644 = vector.extract_strided_slice %639 {offsets = [0, 0], sizes = [2, 32], strides = [1, 1]} : vector<2x96xf32> to vector<2x32xf32>
    %645 = arith.mulf %644, %641 : vector<2x32xf32>
    %646 = arith.addf %643, %645 : vector<2x32xf32>
    %647 = vector.extract_strided_slice %639 {offsets = [0, 64], sizes = [2, 32], strides = [1, 1]} : vector<2x96xf32> to vector<2x32xf32>
    %648 = math.tanh %646 : vector<2x32xf32>
    %649 = arith.mulf %647, %648 : vector<2x32xf32>
    %650 = arith.addf %630, %632 : vector<2x128xf32>
    %651 = vector.extract_strided_slice %650 {offsets = [0, 0], sizes = [2, 96], strides = [1, 1]} : vector<2x128xf32> to vector<2x96xf32>
    %652 = arith.negf %651 : vector<2x96xf32>
    %653 = math.exp %652 : vector<2x96xf32>
    %cst_191 = arith.constant 1.000000e+00 : f32
    %654 = vector.broadcast %cst_191 : f32 to vector<2x96xf32>
    %655 = arith.addf %654, %653 : vector<2x96xf32>
    %656 = arith.divf %654, %655 : vector<2x96xf32>
    %657 = vector.extract_strided_slice %650 {offsets = [0, 96], sizes = [2, 32], strides = [1, 1]} : vector<2x128xf32> to vector<2x32xf32>
    %658 = math.tanh %657 : vector<2x32xf32>
    %659 = vector.extract_strided_slice %656 {offsets = [0, 32], sizes = [2, 32], strides = [1, 1]} : vector<2x96xf32> to vector<2x32xf32>
    %660 = arith.mulf %659, %612 : vector<2x32xf32>
    %661 = vector.extract_strided_slice %656 {offsets = [0, 0], sizes = [2, 32], strides = [1, 1]} : vector<2x96xf32> to vector<2x32xf32>
    %662 = arith.mulf %661, %658 : vector<2x32xf32>
    %663 = arith.addf %660, %662 : vector<2x32xf32>
    %664 = vector.extract_strided_slice %656 {offsets = [0, 64], sizes = [2, 32], strides = [1, 1]} : vector<2x96xf32> to vector<2x32xf32>
    %665 = math.tanh %663 : vector<2x32xf32>
    %666 = arith.mulf %664, %665 : vector<2x32xf32>
    %667 = vector.shape_cast %625 : vector<2x1xi1> to vector<2x1xi1>
    %668 = vector.broadcast %667 : vector<2x1xi1> to vector<2x32xi1>
    %669 = arith.select %668, %649, %603 : vector<2x32xi1>, vector<2x32xf32>
    %670 = vector.shape_cast %625 : vector<2x1xi1> to vector<2x1xi1>
    %671 = vector.broadcast %670 : vector<2x1xi1> to vector<2x32xi1>
    %672 = arith.select %671, %646, %606 : vector<2x32xi1>, vector<2x32xf32>
    %673 = vector.shape_cast %628 : vector<2x1xi1> to vector<2x1xi1>
    %674 = vector.broadcast %673 : vector<2x1xi1> to vector<2x32xi1>
    %675 = arith.select %674, %666, %609 : vector<2x32xi1>, vector<2x32xf32>
    %676 = vector.shape_cast %628 : vector<2x1xi1> to vector<2x1xi1>
    %677 = vector.broadcast %676 : vector<2x1xi1> to vector<2x32xi1>
    %678 = arith.select %677, %663, %612 : vector<2x32xi1>, vector<2x32xf32>
    %cst_192 = arith.constant 0.000000e+00 : f32
    %679 = vector.shape_cast %625 : vector<2x1xi1> to vector<2x1xi1>
    %680 = vector.broadcast %679 : vector<2x1xi1> to vector<2x32xi1>
    %681 = vector.broadcast %cst_192 : f32 to vector<2x32xf32>
    %682 = arith.select %680, %649, %681 : vector<2x32xi1>, vector<2x32xf32>
    %cst_193 = arith.constant 0.000000e+00 : f32
    %683 = vector.shape_cast %628 : vector<2x1xi1> to vector<2x1xi1>
    %684 = vector.broadcast %683 : vector<2x1xi1> to vector<2x32xi1>
    %685 = vector.broadcast %cst_193 : f32 to vector<2x32xf32>
    %686 = arith.select %684, %666, %685 : vector<2x32xi1>, vector<2x32xf32>
    %687 = arith.addf %621, %682 : vector<2x32xf32>
    %688 = arith.addf %622, %686 : vector<2x32xf32>
    %689 = vector.extract_strided_slice %0 {offsets = [4, 0], sizes = [2, 1], strides = [1, 1]} : vector<16x1xf32> to vector<2x1xf32>
    %cst_194 = arith.constant 0.000000e+00 : f32
    %690 = vector.broadcast %cst_194 : f32 to vector<2x1xf32>
    %691 = arith.cmpf ogt, %689, %690 : vector<2x1xf32>
    %692 = vector.extract_strided_slice %0 {offsets = [10, 0], sizes = [2, 1], strides = [1, 1]} : vector<16x1xf32> to vector<2x1xf32>
    %cst_195 = arith.constant 0.000000e+00 : f32
    %693 = vector.broadcast %cst_195 : f32 to vector<2x1xf32>
    %694 = arith.cmpf ogt, %692, %693 : vector<2x1xf32>
    %c4_196 = arith.constant 4 : index
    %c0_197 = arith.constant 0 : index
    %695 = vector.load %arg19[%c4_196, %c0_197] : memref<16x128xf32, #tpu.memory_space<vmem>>, vector<2x128xf32>
    %c10_198 = arith.constant 10 : index
    %c0_199 = arith.constant 0 : index
    %696 = vector.load %arg20[%c10_198, %c0_199] : memref<16x128xf32, #tpu.memory_space<vmem>>, vector<2x128xf32>
    %cst_200 = arith.constant dense<0.000000e+00> : vector<2x128xf32>
    %697 = tpu.matmul %669, %549, %cst_200 {dimension_numbers = #tpu.dot_dimension_numbers<[1], [0], [0], [1], [0, 0, 1, 1], [], []>} : vector<2x32xf32>, vector<32x128xf32>, vector<2x128xf32> -> vector<2x128xf32>
    %cst_201 = arith.constant dense<0.000000e+00> : vector<2x128xf32>
    %698 = tpu.matmul %675, %550, %cst_201 {dimension_numbers = #tpu.dot_dimension_numbers<[1], [0], [0], [1], [0, 0, 1, 1], [], []>} : vector<2x32xf32>, vector<32x128xf32>, vector<2x128xf32> -> vector<2x128xf32>
    %699 = arith.addf %695, %697 : vector<2x128xf32>
    %700 = vector.extract_strided_slice %699 {offsets = [0, 0], sizes = [2, 96], strides = [1, 1]} : vector<2x128xf32> to vector<2x96xf32>
    %701 = arith.negf %700 : vector<2x96xf32>
    %702 = math.exp %701 : vector<2x96xf32>
    %cst_202 = arith.constant 1.000000e+00 : f32
    %703 = vector.broadcast %cst_202 : f32 to vector<2x96xf32>
    %704 = arith.addf %703, %702 : vector<2x96xf32>
    %705 = arith.divf %703, %704 : vector<2x96xf32>
    %706 = vector.extract_strided_slice %699 {offsets = [0, 96], sizes = [2, 32], strides = [1, 1]} : vector<2x128xf32> to vector<2x32xf32>
    %707 = math.tanh %706 : vector<2x32xf32>
    %708 = vector.extract_strided_slice %705 {offsets = [0, 32], sizes = [2, 32], strides = [1, 1]} : vector<2x96xf32> to vector<2x32xf32>
    %709 = arith.mulf %708, %672 : vector<2x32xf32>
    %710 = vector.extract_strided_slice %705 {offsets = [0, 0], sizes = [2, 32], strides = [1, 1]} : vector<2x96xf32> to vector<2x32xf32>
    %711 = arith.mulf %710, %707 : vector<2x32xf32>
    %712 = arith.addf %709, %711 : vector<2x32xf32>
    %713 = vector.extract_strided_slice %705 {offsets = [0, 64], sizes = [2, 32], strides = [1, 1]} : vector<2x96xf32> to vector<2x32xf32>
    %714 = math.tanh %712 : vector<2x32xf32>
    %715 = arith.mulf %713, %714 : vector<2x32xf32>
    %716 = arith.addf %696, %698 : vector<2x128xf32>
    %717 = vector.extract_strided_slice %716 {offsets = [0, 0], sizes = [2, 96], strides = [1, 1]} : vector<2x128xf32> to vector<2x96xf32>
    %718 = arith.negf %717 : vector<2x96xf32>
    %719 = math.exp %718 : vector<2x96xf32>
    %cst_203 = arith.constant 1.000000e+00 : f32
    %720 = vector.broadcast %cst_203 : f32 to vector<2x96xf32>
    %721 = arith.addf %720, %719 : vector<2x96xf32>
    %722 = arith.divf %720, %721 : vector<2x96xf32>
    %723 = vector.extract_strided_slice %716 {offsets = [0, 96], sizes = [2, 32], strides = [1, 1]} : vector<2x128xf32> to vector<2x32xf32>
    %724 = math.tanh %723 : vector<2x32xf32>
    %725 = vector.extract_strided_slice %722 {offsets = [0, 32], sizes = [2, 32], strides = [1, 1]} : vector<2x96xf32> to vector<2x32xf32>
    %726 = arith.mulf %725, %678 : vector<2x32xf32>
    %727 = vector.extract_strided_slice %722 {offsets = [0, 0], sizes = [2, 32], strides = [1, 1]} : vector<2x96xf32> to vector<2x32xf32>
    %728 = arith.mulf %727, %724 : vector<2x32xf32>
    %729 = arith.addf %726, %728 : vector<2x32xf32>
    %730 = vector.extract_strided_slice %722 {offsets = [0, 64], sizes = [2, 32], strides = [1, 1]} : vector<2x96xf32> to vector<2x32xf32>
    %731 = math.tanh %729 : vector<2x32xf32>
    %732 = arith.mulf %730, %731 : vector<2x32xf32>
    %733 = vector.shape_cast %691 : vector<2x1xi1> to vector<2x1xi1>
    %734 = vector.broadcast %733 : vector<2x1xi1> to vector<2x32xi1>
    %735 = arith.select %734, %715, %669 : vector<2x32xi1>, vector<2x32xf32>
    %736 = vector.shape_cast %691 : vector<2x1xi1> to vector<2x1xi1>
    %737 = vector.broadcast %736 : vector<2x1xi1> to vector<2x32xi1>
    %738 = arith.select %737, %712, %672 : vector<2x32xi1>, vector<2x32xf32>
    %739 = vector.shape_cast %694 : vector<2x1xi1> to vector<2x1xi1>
    %740 = vector.broadcast %739 : vector<2x1xi1> to vector<2x32xi1>
    %741 = arith.select %740, %732, %675 : vector<2x32xi1>, vector<2x32xf32>
    %742 = vector.shape_cast %694 : vector<2x1xi1> to vector<2x1xi1>
    %743 = vector.broadcast %742 : vector<2x1xi1> to vector<2x32xi1>
    %744 = arith.select %743, %729, %678 : vector<2x32xi1>, vector<2x32xf32>
    %cst_204 = arith.constant 0.000000e+00 : f32
    %745 = vector.shape_cast %691 : vector<2x1xi1> to vector<2x1xi1>
    %746 = vector.broadcast %745 : vector<2x1xi1> to vector<2x32xi1>
    %747 = vector.broadcast %cst_204 : f32 to vector<2x32xf32>
    %748 = arith.select %746, %715, %747 : vector<2x32xi1>, vector<2x32xf32>
    %cst_205 = arith.constant 0.000000e+00 : f32
    %749 = vector.shape_cast %694 : vector<2x1xi1> to vector<2x1xi1>
    %750 = vector.broadcast %749 : vector<2x1xi1> to vector<2x32xi1>
    %751 = vector.broadcast %cst_205 : f32 to vector<2x32xf32>
    %752 = arith.select %750, %732, %751 : vector<2x32xi1>, vector<2x32xf32>
    %753 = arith.addf %687, %748 : vector<2x32xf32>
    %754 = arith.addf %688, %752 : vector<2x32xf32>
    %755 = vector.extract_strided_slice %0 {offsets = [6, 0], sizes = [2, 1], strides = [1, 1]} : vector<16x1xf32> to vector<2x1xf32>
    %cst_206 = arith.constant 0.000000e+00 : f32
    %756 = vector.broadcast %cst_206 : f32 to vector<2x1xf32>
    %757 = arith.cmpf ogt, %755, %756 : vector<2x1xf32>
    %758 = vector.extract_strided_slice %0 {offsets = [8, 0], sizes = [2, 1], strides = [1, 1]} : vector<16x1xf32> to vector<2x1xf32>
    %cst_207 = arith.constant 0.000000e+00 : f32
    %759 = vector.broadcast %cst_207 : f32 to vector<2x1xf32>
    %760 = arith.cmpf ogt, %758, %759 : vector<2x1xf32>
    %c6_208 = arith.constant 6 : index
    %c0_209 = arith.constant 0 : index
    %761 = vector.load %arg19[%c6_208, %c0_209] : memref<16x128xf32, #tpu.memory_space<vmem>>, vector<2x128xf32>
    %c8_210 = arith.constant 8 : index
    %c0_211 = arith.constant 0 : index
    %762 = vector.load %arg20[%c8_210, %c0_211] : memref<16x128xf32, #tpu.memory_space<vmem>>, vector<2x128xf32>
    %cst_212 = arith.constant dense<0.000000e+00> : vector<2x128xf32>
    %763 = tpu.matmul %735, %549, %cst_212 {dimension_numbers = #tpu.dot_dimension_numbers<[1], [0], [0], [1], [0, 0, 1, 1], [], []>} : vector<2x32xf32>, vector<32x128xf32>, vector<2x128xf32> -> vector<2x128xf32>
    %cst_213 = arith.constant dense<0.000000e+00> : vector<2x128xf32>
    %764 = tpu.matmul %741, %550, %cst_213 {dimension_numbers = #tpu.dot_dimension_numbers<[1], [0], [0], [1], [0, 0, 1, 1], [], []>} : vector<2x32xf32>, vector<32x128xf32>, vector<2x128xf32> -> vector<2x128xf32>
    %765 = arith.addf %761, %763 : vector<2x128xf32>
    %766 = vector.extract_strided_slice %765 {offsets = [0, 0], sizes = [2, 96], strides = [1, 1]} : vector<2x128xf32> to vector<2x96xf32>
    %767 = arith.negf %766 : vector<2x96xf32>
    %768 = math.exp %767 : vector<2x96xf32>
    %cst_214 = arith.constant 1.000000e+00 : f32
    %769 = vector.broadcast %cst_214 : f32 to vector<2x96xf32>
    %770 = arith.addf %769, %768 : vector<2x96xf32>
    %771 = arith.divf %769, %770 : vector<2x96xf32>
    %772 = vector.extract_strided_slice %765 {offsets = [0, 96], sizes = [2, 32], strides = [1, 1]} : vector<2x128xf32> to vector<2x32xf32>
    %773 = math.tanh %772 : vector<2x32xf32>
    %774 = vector.extract_strided_slice %771 {offsets = [0, 32], sizes = [2, 32], strides = [1, 1]} : vector<2x96xf32> to vector<2x32xf32>
    %775 = arith.mulf %774, %738 : vector<2x32xf32>
    %776 = vector.extract_strided_slice %771 {offsets = [0, 0], sizes = [2, 32], strides = [1, 1]} : vector<2x96xf32> to vector<2x32xf32>
    %777 = arith.mulf %776, %773 : vector<2x32xf32>
    %778 = arith.addf %775, %777 : vector<2x32xf32>
    %779 = vector.extract_strided_slice %771 {offsets = [0, 64], sizes = [2, 32], strides = [1, 1]} : vector<2x96xf32> to vector<2x32xf32>
    %780 = math.tanh %778 : vector<2x32xf32>
    %781 = arith.mulf %779, %780 : vector<2x32xf32>
    %782 = arith.addf %762, %764 : vector<2x128xf32>
    %783 = vector.extract_strided_slice %782 {offsets = [0, 0], sizes = [2, 96], strides = [1, 1]} : vector<2x128xf32> to vector<2x96xf32>
    %784 = arith.negf %783 : vector<2x96xf32>
    %785 = math.exp %784 : vector<2x96xf32>
    %cst_215 = arith.constant 1.000000e+00 : f32
    %786 = vector.broadcast %cst_215 : f32 to vector<2x96xf32>
    %787 = arith.addf %786, %785 : vector<2x96xf32>
    %788 = arith.divf %786, %787 : vector<2x96xf32>
    %789 = vector.extract_strided_slice %782 {offsets = [0, 96], sizes = [2, 32], strides = [1, 1]} : vector<2x128xf32> to vector<2x32xf32>
    %790 = math.tanh %789 : vector<2x32xf32>
    %791 = vector.extract_strided_slice %788 {offsets = [0, 32], sizes = [2, 32], strides = [1, 1]} : vector<2x96xf32> to vector<2x32xf32>
    %792 = arith.mulf %791, %744 : vector<2x32xf32>
    %793 = vector.extract_strided_slice %788 {offsets = [0, 0], sizes = [2, 32], strides = [1, 1]} : vector<2x96xf32> to vector<2x32xf32>
    %794 = arith.mulf %793, %790 : vector<2x32xf32>
    %795 = arith.addf %792, %794 : vector<2x32xf32>
    %796 = vector.extract_strided_slice %788 {offsets = [0, 64], sizes = [2, 32], strides = [1, 1]} : vector<2x96xf32> to vector<2x32xf32>
    %797 = math.tanh %795 : vector<2x32xf32>
    %798 = arith.mulf %796, %797 : vector<2x32xf32>
    %799 = vector.shape_cast %757 : vector<2x1xi1> to vector<2x1xi1>
    %800 = vector.broadcast %799 : vector<2x1xi1> to vector<2x32xi1>
    %801 = arith.select %800, %781, %735 : vector<2x32xi1>, vector<2x32xf32>
    %802 = vector.shape_cast %757 : vector<2x1xi1> to vector<2x1xi1>
    %803 = vector.broadcast %802 : vector<2x1xi1> to vector<2x32xi1>
    %804 = arith.select %803, %778, %738 : vector<2x32xi1>, vector<2x32xf32>
    %805 = vector.shape_cast %760 : vector<2x1xi1> to vector<2x1xi1>
    %806 = vector.broadcast %805 : vector<2x1xi1> to vector<2x32xi1>
    %807 = arith.select %806, %798, %741 : vector<2x32xi1>, vector<2x32xf32>
    %808 = vector.shape_cast %760 : vector<2x1xi1> to vector<2x1xi1>
    %809 = vector.broadcast %808 : vector<2x1xi1> to vector<2x32xi1>
    %810 = arith.select %809, %795, %744 : vector<2x32xi1>, vector<2x32xf32>
    %cst_216 = arith.constant 0.000000e+00 : f32
    %811 = vector.shape_cast %757 : vector<2x1xi1> to vector<2x1xi1>
    %812 = vector.broadcast %811 : vector<2x1xi1> to vector<2x32xi1>
    %813 = vector.broadcast %cst_216 : f32 to vector<2x32xf32>
    %814 = arith.select %812, %781, %813 : vector<2x32xi1>, vector<2x32xf32>
    %cst_217 = arith.constant 0.000000e+00 : f32
    %815 = vector.shape_cast %760 : vector<2x1xi1> to vector<2x1xi1>
    %816 = vector.broadcast %815 : vector<2x1xi1> to vector<2x32xi1>
    %817 = vector.broadcast %cst_217 : f32 to vector<2x32xf32>
    %818 = arith.select %816, %798, %817 : vector<2x32xi1>, vector<2x32xf32>
    %819 = arith.addf %753, %814 : vector<2x32xf32>
    %820 = arith.addf %754, %818 : vector<2x32xf32>
    %821 = vector.extract_strided_slice %0 {offsets = [8, 0], sizes = [2, 1], strides = [1, 1]} : vector<16x1xf32> to vector<2x1xf32>
    %cst_218 = arith.constant 0.000000e+00 : f32
    %822 = vector.broadcast %cst_218 : f32 to vector<2x1xf32>
    %823 = arith.cmpf ogt, %821, %822 : vector<2x1xf32>
    %824 = vector.extract_strided_slice %0 {offsets = [6, 0], sizes = [2, 1], strides = [1, 1]} : vector<16x1xf32> to vector<2x1xf32>
    %cst_219 = arith.constant 0.000000e+00 : f32
    %825 = vector.broadcast %cst_219 : f32 to vector<2x1xf32>
    %826 = arith.cmpf ogt, %824, %825 : vector<2x1xf32>
    %c8_220 = arith.constant 8 : index
    %c0_221 = arith.constant 0 : index
    %827 = vector.load %arg19[%c8_220, %c0_221] : memref<16x128xf32, #tpu.memory_space<vmem>>, vector<2x128xf32>
    %c6_222 = arith.constant 6 : index
    %c0_223 = arith.constant 0 : index
    %828 = vector.load %arg20[%c6_222, %c0_223] : memref<16x128xf32, #tpu.memory_space<vmem>>, vector<2x128xf32>
    %cst_224 = arith.constant dense<0.000000e+00> : vector<2x128xf32>
    %829 = tpu.matmul %801, %549, %cst_224 {dimension_numbers = #tpu.dot_dimension_numbers<[1], [0], [0], [1], [0, 0, 1, 1], [], []>} : vector<2x32xf32>, vector<32x128xf32>, vector<2x128xf32> -> vector<2x128xf32>
    %cst_225 = arith.constant dense<0.000000e+00> : vector<2x128xf32>
    %830 = tpu.matmul %807, %550, %cst_225 {dimension_numbers = #tpu.dot_dimension_numbers<[1], [0], [0], [1], [0, 0, 1, 1], [], []>} : vector<2x32xf32>, vector<32x128xf32>, vector<2x128xf32> -> vector<2x128xf32>
    %831 = arith.addf %827, %829 : vector<2x128xf32>
    %832 = vector.extract_strided_slice %831 {offsets = [0, 0], sizes = [2, 96], strides = [1, 1]} : vector<2x128xf32> to vector<2x96xf32>
    %833 = arith.negf %832 : vector<2x96xf32>
    %834 = math.exp %833 : vector<2x96xf32>
    %cst_226 = arith.constant 1.000000e+00 : f32
    %835 = vector.broadcast %cst_226 : f32 to vector<2x96xf32>
    %836 = arith.addf %835, %834 : vector<2x96xf32>
    %837 = arith.divf %835, %836 : vector<2x96xf32>
    %838 = vector.extract_strided_slice %831 {offsets = [0, 96], sizes = [2, 32], strides = [1, 1]} : vector<2x128xf32> to vector<2x32xf32>
    %839 = math.tanh %838 : vector<2x32xf32>
    %840 = vector.extract_strided_slice %837 {offsets = [0, 32], sizes = [2, 32], strides = [1, 1]} : vector<2x96xf32> to vector<2x32xf32>
    %841 = arith.mulf %840, %804 : vector<2x32xf32>
    %842 = vector.extract_strided_slice %837 {offsets = [0, 0], sizes = [2, 32], strides = [1, 1]} : vector<2x96xf32> to vector<2x32xf32>
    %843 = arith.mulf %842, %839 : vector<2x32xf32>
    %844 = arith.addf %841, %843 : vector<2x32xf32>
    %845 = vector.extract_strided_slice %837 {offsets = [0, 64], sizes = [2, 32], strides = [1, 1]} : vector<2x96xf32> to vector<2x32xf32>
    %846 = math.tanh %844 : vector<2x32xf32>
    %847 = arith.mulf %845, %846 : vector<2x32xf32>
    %848 = arith.addf %828, %830 : vector<2x128xf32>
    %849 = vector.extract_strided_slice %848 {offsets = [0, 0], sizes = [2, 96], strides = [1, 1]} : vector<2x128xf32> to vector<2x96xf32>
    %850 = arith.negf %849 : vector<2x96xf32>
    %851 = math.exp %850 : vector<2x96xf32>
    %cst_227 = arith.constant 1.000000e+00 : f32
    %852 = vector.broadcast %cst_227 : f32 to vector<2x96xf32>
    %853 = arith.addf %852, %851 : vector<2x96xf32>
    %854 = arith.divf %852, %853 : vector<2x96xf32>
    %855 = vector.extract_strided_slice %848 {offsets = [0, 96], sizes = [2, 32], strides = [1, 1]} : vector<2x128xf32> to vector<2x32xf32>
    %856 = math.tanh %855 : vector<2x32xf32>
    %857 = vector.extract_strided_slice %854 {offsets = [0, 32], sizes = [2, 32], strides = [1, 1]} : vector<2x96xf32> to vector<2x32xf32>
    %858 = arith.mulf %857, %810 : vector<2x32xf32>
    %859 = vector.extract_strided_slice %854 {offsets = [0, 0], sizes = [2, 32], strides = [1, 1]} : vector<2x96xf32> to vector<2x32xf32>
    %860 = arith.mulf %859, %856 : vector<2x32xf32>
    %861 = arith.addf %858, %860 : vector<2x32xf32>
    %862 = vector.extract_strided_slice %854 {offsets = [0, 64], sizes = [2, 32], strides = [1, 1]} : vector<2x96xf32> to vector<2x32xf32>
    %863 = math.tanh %861 : vector<2x32xf32>
    %864 = arith.mulf %862, %863 : vector<2x32xf32>
    %865 = vector.shape_cast %823 : vector<2x1xi1> to vector<2x1xi1>
    %866 = vector.broadcast %865 : vector<2x1xi1> to vector<2x32xi1>
    %867 = arith.select %866, %847, %801 : vector<2x32xi1>, vector<2x32xf32>
    %868 = vector.shape_cast %823 : vector<2x1xi1> to vector<2x1xi1>
    %869 = vector.broadcast %868 : vector<2x1xi1> to vector<2x32xi1>
    %870 = arith.select %869, %844, %804 : vector<2x32xi1>, vector<2x32xf32>
    %871 = vector.shape_cast %826 : vector<2x1xi1> to vector<2x1xi1>
    %872 = vector.broadcast %871 : vector<2x1xi1> to vector<2x32xi1>
    %873 = arith.select %872, %864, %807 : vector<2x32xi1>, vector<2x32xf32>
    %874 = vector.shape_cast %826 : vector<2x1xi1> to vector<2x1xi1>
    %875 = vector.broadcast %874 : vector<2x1xi1> to vector<2x32xi1>
    %876 = arith.select %875, %861, %810 : vector<2x32xi1>, vector<2x32xf32>
    %cst_228 = arith.constant 0.000000e+00 : f32
    %877 = vector.shape_cast %823 : vector<2x1xi1> to vector<2x1xi1>
    %878 = vector.broadcast %877 : vector<2x1xi1> to vector<2x32xi1>
    %879 = vector.broadcast %cst_228 : f32 to vector<2x32xf32>
    %880 = arith.select %878, %847, %879 : vector<2x32xi1>, vector<2x32xf32>
    %cst_229 = arith.constant 0.000000e+00 : f32
    %881 = vector.shape_cast %826 : vector<2x1xi1> to vector<2x1xi1>
    %882 = vector.broadcast %881 : vector<2x1xi1> to vector<2x32xi1>
    %883 = vector.broadcast %cst_229 : f32 to vector<2x32xf32>
    %884 = arith.select %882, %864, %883 : vector<2x32xi1>, vector<2x32xf32>
    %885 = arith.addf %819, %880 : vector<2x32xf32>
    %886 = arith.addf %820, %884 : vector<2x32xf32>
    %887 = vector.extract_strided_slice %0 {offsets = [10, 0], sizes = [2, 1], strides = [1, 1]} : vector<16x1xf32> to vector<2x1xf32>
    %cst_230 = arith.constant 0.000000e+00 : f32
    %888 = vector.broadcast %cst_230 : f32 to vector<2x1xf32>
    %889 = arith.cmpf ogt, %887, %888 : vector<2x1xf32>
    %890 = vector.extract_strided_slice %0 {offsets = [4, 0], sizes = [2, 1], strides = [1, 1]} : vector<16x1xf32> to vector<2x1xf32>
    %cst_231 = arith.constant 0.000000e+00 : f32
    %891 = vector.broadcast %cst_231 : f32 to vector<2x1xf32>
    %892 = arith.cmpf ogt, %890, %891 : vector<2x1xf32>
    %c10_232 = arith.constant 10 : index
    %c0_233 = arith.constant 0 : index
    %893 = vector.load %arg19[%c10_232, %c0_233] : memref<16x128xf32, #tpu.memory_space<vmem>>, vector<2x128xf32>
    %c4_234 = arith.constant 4 : index
    %c0_235 = arith.constant 0 : index
    %894 = vector.load %arg20[%c4_234, %c0_235] : memref<16x128xf32, #tpu.memory_space<vmem>>, vector<2x128xf32>
    %cst_236 = arith.constant dense<0.000000e+00> : vector<2x128xf32>
    %895 = tpu.matmul %867, %549, %cst_236 {dimension_numbers = #tpu.dot_dimension_numbers<[1], [0], [0], [1], [0, 0, 1, 1], [], []>} : vector<2x32xf32>, vector<32x128xf32>, vector<2x128xf32> -> vector<2x128xf32>
    %cst_237 = arith.constant dense<0.000000e+00> : vector<2x128xf32>
    %896 = tpu.matmul %873, %550, %cst_237 {dimension_numbers = #tpu.dot_dimension_numbers<[1], [0], [0], [1], [0, 0, 1, 1], [], []>} : vector<2x32xf32>, vector<32x128xf32>, vector<2x128xf32> -> vector<2x128xf32>
    %897 = arith.addf %893, %895 : vector<2x128xf32>
    %898 = vector.extract_strided_slice %897 {offsets = [0, 0], sizes = [2, 96], strides = [1, 1]} : vector<2x128xf32> to vector<2x96xf32>
    %899 = arith.negf %898 : vector<2x96xf32>
    %900 = math.exp %899 : vector<2x96xf32>
    %cst_238 = arith.constant 1.000000e+00 : f32
    %901 = vector.broadcast %cst_238 : f32 to vector<2x96xf32>
    %902 = arith.addf %901, %900 : vector<2x96xf32>
    %903 = arith.divf %901, %902 : vector<2x96xf32>
    %904 = vector.extract_strided_slice %897 {offsets = [0, 96], sizes = [2, 32], strides = [1, 1]} : vector<2x128xf32> to vector<2x32xf32>
    %905 = math.tanh %904 : vector<2x32xf32>
    %906 = vector.extract_strided_slice %903 {offsets = [0, 32], sizes = [2, 32], strides = [1, 1]} : vector<2x96xf32> to vector<2x32xf32>
    %907 = arith.mulf %906, %870 : vector<2x32xf32>
    %908 = vector.extract_strided_slice %903 {offsets = [0, 0], sizes = [2, 32], strides = [1, 1]} : vector<2x96xf32> to vector<2x32xf32>
    %909 = arith.mulf %908, %905 : vector<2x32xf32>
    %910 = arith.addf %907, %909 : vector<2x32xf32>
    %911 = vector.extract_strided_slice %903 {offsets = [0, 64], sizes = [2, 32], strides = [1, 1]} : vector<2x96xf32> to vector<2x32xf32>
    %912 = math.tanh %910 : vector<2x32xf32>
    %913 = arith.mulf %911, %912 : vector<2x32xf32>
    %914 = arith.addf %894, %896 : vector<2x128xf32>
    %915 = vector.extract_strided_slice %914 {offsets = [0, 0], sizes = [2, 96], strides = [1, 1]} : vector<2x128xf32> to vector<2x96xf32>
    %916 = arith.negf %915 : vector<2x96xf32>
    %917 = math.exp %916 : vector<2x96xf32>
    %cst_239 = arith.constant 1.000000e+00 : f32
    %918 = vector.broadcast %cst_239 : f32 to vector<2x96xf32>
    %919 = arith.addf %918, %917 : vector<2x96xf32>
    %920 = arith.divf %918, %919 : vector<2x96xf32>
    %921 = vector.extract_strided_slice %914 {offsets = [0, 96], sizes = [2, 32], strides = [1, 1]} : vector<2x128xf32> to vector<2x32xf32>
    %922 = math.tanh %921 : vector<2x32xf32>
    %923 = vector.extract_strided_slice %920 {offsets = [0, 32], sizes = [2, 32], strides = [1, 1]} : vector<2x96xf32> to vector<2x32xf32>
    %924 = arith.mulf %923, %876 : vector<2x32xf32>
    %925 = vector.extract_strided_slice %920 {offsets = [0, 0], sizes = [2, 32], strides = [1, 1]} : vector<2x96xf32> to vector<2x32xf32>
    %926 = arith.mulf %925, %922 : vector<2x32xf32>
    %927 = arith.addf %924, %926 : vector<2x32xf32>
    %928 = vector.extract_strided_slice %920 {offsets = [0, 64], sizes = [2, 32], strides = [1, 1]} : vector<2x96xf32> to vector<2x32xf32>
    %929 = math.tanh %927 : vector<2x32xf32>
    %930 = arith.mulf %928, %929 : vector<2x32xf32>
    %931 = vector.shape_cast %889 : vector<2x1xi1> to vector<2x1xi1>
    %932 = vector.broadcast %931 : vector<2x1xi1> to vector<2x32xi1>
    %933 = arith.select %932, %913, %867 : vector<2x32xi1>, vector<2x32xf32>
    %934 = vector.shape_cast %889 : vector<2x1xi1> to vector<2x1xi1>
    %935 = vector.broadcast %934 : vector<2x1xi1> to vector<2x32xi1>
    %936 = arith.select %935, %910, %870 : vector<2x32xi1>, vector<2x32xf32>
    %937 = vector.shape_cast %892 : vector<2x1xi1> to vector<2x1xi1>
    %938 = vector.broadcast %937 : vector<2x1xi1> to vector<2x32xi1>
    %939 = arith.select %938, %930, %873 : vector<2x32xi1>, vector<2x32xf32>
    %940 = vector.shape_cast %892 : vector<2x1xi1> to vector<2x1xi1>
    %941 = vector.broadcast %940 : vector<2x1xi1> to vector<2x32xi1>
    %942 = arith.select %941, %927, %876 : vector<2x32xi1>, vector<2x32xf32>
    %cst_240 = arith.constant 0.000000e+00 : f32
    %943 = vector.shape_cast %889 : vector<2x1xi1> to vector<2x1xi1>
    %944 = vector.broadcast %943 : vector<2x1xi1> to vector<2x32xi1>
    %945 = vector.broadcast %cst_240 : f32 to vector<2x32xf32>
    %946 = arith.select %944, %913, %945 : vector<2x32xi1>, vector<2x32xf32>
    %cst_241 = arith.constant 0.000000e+00 : f32
    %947 = vector.shape_cast %892 : vector<2x1xi1> to vector<2x1xi1>
    %948 = vector.broadcast %947 : vector<2x1xi1> to vector<2x32xi1>
    %949 = vector.broadcast %cst_241 : f32 to vector<2x32xf32>
    %950 = arith.select %948, %930, %949 : vector<2x32xi1>, vector<2x32xf32>
    %951 = arith.addf %885, %946 : vector<2x32xf32>
    %952 = arith.addf %886, %950 : vector<2x32xf32>
    %953 = vector.extract_strided_slice %0 {offsets = [12, 0], sizes = [2, 1], strides = [1, 1]} : vector<16x1xf32> to vector<2x1xf32>
    %cst_242 = arith.constant 0.000000e+00 : f32
    %954 = vector.broadcast %cst_242 : f32 to vector<2x1xf32>
    %955 = arith.cmpf ogt, %953, %954 : vector<2x1xf32>
    %956 = vector.extract_strided_slice %0 {offsets = [2, 0], sizes = [2, 1], strides = [1, 1]} : vector<16x1xf32> to vector<2x1xf32>
    %cst_243 = arith.constant 0.000000e+00 : f32
    %957 = vector.broadcast %cst_243 : f32 to vector<2x1xf32>
    %958 = arith.cmpf ogt, %956, %957 : vector<2x1xf32>
    %c12_244 = arith.constant 12 : index
    %c0_245 = arith.constant 0 : index
    %959 = vector.load %arg19[%c12_244, %c0_245] : memref<16x128xf32, #tpu.memory_space<vmem>>, vector<2x128xf32>
    %c2_246 = arith.constant 2 : index
    %c0_247 = arith.constant 0 : index
    %960 = vector.load %arg20[%c2_246, %c0_247] : memref<16x128xf32, #tpu.memory_space<vmem>>, vector<2x128xf32>
    %cst_248 = arith.constant dense<0.000000e+00> : vector<2x128xf32>
    %961 = tpu.matmul %933, %549, %cst_248 {dimension_numbers = #tpu.dot_dimension_numbers<[1], [0], [0], [1], [0, 0, 1, 1], [], []>} : vector<2x32xf32>, vector<32x128xf32>, vector<2x128xf32> -> vector<2x128xf32>
    %cst_249 = arith.constant dense<0.000000e+00> : vector<2x128xf32>
    %962 = tpu.matmul %939, %550, %cst_249 {dimension_numbers = #tpu.dot_dimension_numbers<[1], [0], [0], [1], [0, 0, 1, 1], [], []>} : vector<2x32xf32>, vector<32x128xf32>, vector<2x128xf32> -> vector<2x128xf32>
    %963 = arith.addf %959, %961 : vector<2x128xf32>
    %964 = vector.extract_strided_slice %963 {offsets = [0, 0], sizes = [2, 96], strides = [1, 1]} : vector<2x128xf32> to vector<2x96xf32>
    %965 = arith.negf %964 : vector<2x96xf32>
    %966 = math.exp %965 : vector<2x96xf32>
    %cst_250 = arith.constant 1.000000e+00 : f32
    %967 = vector.broadcast %cst_250 : f32 to vector<2x96xf32>
    %968 = arith.addf %967, %966 : vector<2x96xf32>
    %969 = arith.divf %967, %968 : vector<2x96xf32>
    %970 = vector.extract_strided_slice %963 {offsets = [0, 96], sizes = [2, 32], strides = [1, 1]} : vector<2x128xf32> to vector<2x32xf32>
    %971 = math.tanh %970 : vector<2x32xf32>
    %972 = vector.extract_strided_slice %969 {offsets = [0, 32], sizes = [2, 32], strides = [1, 1]} : vector<2x96xf32> to vector<2x32xf32>
    %973 = arith.mulf %972, %936 : vector<2x32xf32>
    %974 = vector.extract_strided_slice %969 {offsets = [0, 0], sizes = [2, 32], strides = [1, 1]} : vector<2x96xf32> to vector<2x32xf32>
    %975 = arith.mulf %974, %971 : vector<2x32xf32>
    %976 = arith.addf %973, %975 : vector<2x32xf32>
    %977 = vector.extract_strided_slice %969 {offsets = [0, 64], sizes = [2, 32], strides = [1, 1]} : vector<2x96xf32> to vector<2x32xf32>
    %978 = math.tanh %976 : vector<2x32xf32>
    %979 = arith.mulf %977, %978 : vector<2x32xf32>
    %980 = arith.addf %960, %962 : vector<2x128xf32>
    %981 = vector.extract_strided_slice %980 {offsets = [0, 0], sizes = [2, 96], strides = [1, 1]} : vector<2x128xf32> to vector<2x96xf32>
    %982 = arith.negf %981 : vector<2x96xf32>
    %983 = math.exp %982 : vector<2x96xf32>
    %cst_251 = arith.constant 1.000000e+00 : f32
    %984 = vector.broadcast %cst_251 : f32 to vector<2x96xf32>
    %985 = arith.addf %984, %983 : vector<2x96xf32>
    %986 = arith.divf %984, %985 : vector<2x96xf32>
    %987 = vector.extract_strided_slice %980 {offsets = [0, 96], sizes = [2, 32], strides = [1, 1]} : vector<2x128xf32> to vector<2x32xf32>
    %988 = math.tanh %987 : vector<2x32xf32>
    %989 = vector.extract_strided_slice %986 {offsets = [0, 32], sizes = [2, 32], strides = [1, 1]} : vector<2x96xf32> to vector<2x32xf32>
    %990 = arith.mulf %989, %942 : vector<2x32xf32>
    %991 = vector.extract_strided_slice %986 {offsets = [0, 0], sizes = [2, 32], strides = [1, 1]} : vector<2x96xf32> to vector<2x32xf32>
    %992 = arith.mulf %991, %988 : vector<2x32xf32>
    %993 = arith.addf %990, %992 : vector<2x32xf32>
    %994 = vector.extract_strided_slice %986 {offsets = [0, 64], sizes = [2, 32], strides = [1, 1]} : vector<2x96xf32> to vector<2x32xf32>
    %995 = math.tanh %993 : vector<2x32xf32>
    %996 = arith.mulf %994, %995 : vector<2x32xf32>
    %997 = vector.shape_cast %955 : vector<2x1xi1> to vector<2x1xi1>
    %998 = vector.broadcast %997 : vector<2x1xi1> to vector<2x32xi1>
    %999 = arith.select %998, %979, %933 : vector<2x32xi1>, vector<2x32xf32>
    %1000 = vector.shape_cast %955 : vector<2x1xi1> to vector<2x1xi1>
    %1001 = vector.broadcast %1000 : vector<2x1xi1> to vector<2x32xi1>
    %1002 = arith.select %1001, %976, %936 : vector<2x32xi1>, vector<2x32xf32>
    %1003 = vector.shape_cast %958 : vector<2x1xi1> to vector<2x1xi1>
    %1004 = vector.broadcast %1003 : vector<2x1xi1> to vector<2x32xi1>
    %1005 = arith.select %1004, %996, %939 : vector<2x32xi1>, vector<2x32xf32>
    %1006 = vector.shape_cast %958 : vector<2x1xi1> to vector<2x1xi1>
    %1007 = vector.broadcast %1006 : vector<2x1xi1> to vector<2x32xi1>
    %1008 = arith.select %1007, %993, %942 : vector<2x32xi1>, vector<2x32xf32>
    %cst_252 = arith.constant 0.000000e+00 : f32
    %1009 = vector.shape_cast %955 : vector<2x1xi1> to vector<2x1xi1>
    %1010 = vector.broadcast %1009 : vector<2x1xi1> to vector<2x32xi1>
    %1011 = vector.broadcast %cst_252 : f32 to vector<2x32xf32>
    %1012 = arith.select %1010, %979, %1011 : vector<2x32xi1>, vector<2x32xf32>
    %cst_253 = arith.constant 0.000000e+00 : f32
    %1013 = vector.shape_cast %958 : vector<2x1xi1> to vector<2x1xi1>
    %1014 = vector.broadcast %1013 : vector<2x1xi1> to vector<2x32xi1>
    %1015 = vector.broadcast %cst_253 : f32 to vector<2x32xf32>
    %1016 = arith.select %1014, %996, %1015 : vector<2x32xi1>, vector<2x32xf32>
    %1017 = arith.addf %951, %1012 : vector<2x32xf32>
    %1018 = arith.addf %952, %1016 : vector<2x32xf32>
    %1019 = vector.extract_strided_slice %0 {offsets = [14, 0], sizes = [2, 1], strides = [1, 1]} : vector<16x1xf32> to vector<2x1xf32>
    %cst_254 = arith.constant 0.000000e+00 : f32
    %1020 = vector.broadcast %cst_254 : f32 to vector<2x1xf32>
    %1021 = arith.cmpf ogt, %1019, %1020 : vector<2x1xf32>
    %1022 = vector.extract_strided_slice %0 {offsets = [0, 0], sizes = [2, 1], strides = [1, 1]} : vector<16x1xf32> to vector<2x1xf32>
    %cst_255 = arith.constant 0.000000e+00 : f32
    %1023 = vector.broadcast %cst_255 : f32 to vector<2x1xf32>
    %1024 = arith.cmpf ogt, %1022, %1023 : vector<2x1xf32>
    %c14_256 = arith.constant 14 : index
    %c0_257 = arith.constant 0 : index
    %1025 = vector.load %arg19[%c14_256, %c0_257] : memref<16x128xf32, #tpu.memory_space<vmem>>, vector<2x128xf32>
    %c0_258 = arith.constant 0 : index
    %c0_259 = arith.constant 0 : index
    %1026 = vector.load %arg20[%c0_258, %c0_259] : memref<16x128xf32, #tpu.memory_space<vmem>>, vector<2x128xf32>
    %cst_260 = arith.constant dense<0.000000e+00> : vector<2x128xf32>
    %1027 = tpu.matmul %999, %549, %cst_260 {dimension_numbers = #tpu.dot_dimension_numbers<[1], [0], [0], [1], [0, 0, 1, 1], [], []>} : vector<2x32xf32>, vector<32x128xf32>, vector<2x128xf32> -> vector<2x128xf32>
    %cst_261 = arith.constant dense<0.000000e+00> : vector<2x128xf32>
    %1028 = tpu.matmul %1005, %550, %cst_261 {dimension_numbers = #tpu.dot_dimension_numbers<[1], [0], [0], [1], [0, 0, 1, 1], [], []>} : vector<2x32xf32>, vector<32x128xf32>, vector<2x128xf32> -> vector<2x128xf32>
    %1029 = arith.addf %1025, %1027 : vector<2x128xf32>
    %1030 = vector.extract_strided_slice %1029 {offsets = [0, 0], sizes = [2, 96], strides = [1, 1]} : vector<2x128xf32> to vector<2x96xf32>
    %1031 = arith.negf %1030 : vector<2x96xf32>
    %1032 = math.exp %1031 : vector<2x96xf32>
    %cst_262 = arith.constant 1.000000e+00 : f32
    %1033 = vector.broadcast %cst_262 : f32 to vector<2x96xf32>
    %1034 = arith.addf %1033, %1032 : vector<2x96xf32>
    %1035 = arith.divf %1033, %1034 : vector<2x96xf32>
    %1036 = vector.extract_strided_slice %1029 {offsets = [0, 96], sizes = [2, 32], strides = [1, 1]} : vector<2x128xf32> to vector<2x32xf32>
    %1037 = math.tanh %1036 : vector<2x32xf32>
    %1038 = vector.extract_strided_slice %1035 {offsets = [0, 32], sizes = [2, 32], strides = [1, 1]} : vector<2x96xf32> to vector<2x32xf32>
    %1039 = arith.mulf %1038, %1002 : vector<2x32xf32>
    %1040 = vector.extract_strided_slice %1035 {offsets = [0, 0], sizes = [2, 32], strides = [1, 1]} : vector<2x96xf32> to vector<2x32xf32>
    %1041 = arith.mulf %1040, %1037 : vector<2x32xf32>
    %1042 = arith.addf %1039, %1041 : vector<2x32xf32>
    %1043 = vector.extract_strided_slice %1035 {offsets = [0, 64], sizes = [2, 32], strides = [1, 1]} : vector<2x96xf32> to vector<2x32xf32>
    %1044 = math.tanh %1042 : vector<2x32xf32>
    %1045 = arith.mulf %1043, %1044 : vector<2x32xf32>
    %1046 = arith.addf %1026, %1028 : vector<2x128xf32>
    %1047 = vector.extract_strided_slice %1046 {offsets = [0, 0], sizes = [2, 96], strides = [1, 1]} : vector<2x128xf32> to vector<2x96xf32>
    %1048 = arith.negf %1047 : vector<2x96xf32>
    %1049 = math.exp %1048 : vector<2x96xf32>
    %cst_263 = arith.constant 1.000000e+00 : f32
    %1050 = vector.broadcast %cst_263 : f32 to vector<2x96xf32>
    %1051 = arith.addf %1050, %1049 : vector<2x96xf32>
    %1052 = arith.divf %1050, %1051 : vector<2x96xf32>
    %1053 = vector.extract_strided_slice %1046 {offsets = [0, 96], sizes = [2, 32], strides = [1, 1]} : vector<2x128xf32> to vector<2x32xf32>
    %1054 = math.tanh %1053 : vector<2x32xf32>
    %1055 = vector.extract_strided_slice %1052 {offsets = [0, 32], sizes = [2, 32], strides = [1, 1]} : vector<2x96xf32> to vector<2x32xf32>
    %1056 = arith.mulf %1055, %1008 : vector<2x32xf32>
    %1057 = vector.extract_strided_slice %1052 {offsets = [0, 0], sizes = [2, 32], strides = [1, 1]} : vector<2x96xf32> to vector<2x32xf32>
    %1058 = arith.mulf %1057, %1054 : vector<2x32xf32>
    %1059 = arith.addf %1056, %1058 : vector<2x32xf32>
    %1060 = vector.extract_strided_slice %1052 {offsets = [0, 64], sizes = [2, 32], strides = [1, 1]} : vector<2x96xf32> to vector<2x32xf32>
    %1061 = math.tanh %1059 : vector<2x32xf32>
    %1062 = arith.mulf %1060, %1061 : vector<2x32xf32>
    %cst_264 = arith.constant 0.000000e+00 : f32
    %1063 = vector.shape_cast %1021 : vector<2x1xi1> to vector<2x1xi1>
    %1064 = vector.broadcast %1063 : vector<2x1xi1> to vector<2x32xi1>
    %1065 = vector.broadcast %cst_264 : f32 to vector<2x32xf32>
    %1066 = arith.select %1064, %1045, %1065 : vector<2x32xi1>, vector<2x32xf32>
    %cst_265 = arith.constant 0.000000e+00 : f32
    %1067 = vector.shape_cast %1024 : vector<2x1xi1> to vector<2x1xi1>
    %1068 = vector.broadcast %1067 : vector<2x1xi1> to vector<2x32xi1>
    %1069 = vector.broadcast %cst_265 : f32 to vector<2x32xf32>
    %1070 = arith.select %1068, %1062, %1069 : vector<2x32xi1>, vector<2x32xf32>
    %1071 = arith.addf %1017, %1066 : vector<2x32xf32>
    %1072 = arith.addf %1018, %1070 : vector<2x32xf32>
    %1073 = tpu.concatenate %1071, %1072 in 1 : vector<2x32xf32>, vector<2x32xf32> -> vector<2x64xf32>
    %c0_266 = arith.constant 0 : index
    %c0_267 = arith.constant 0 : index
    %1074 = vector.load %arg14[%c0_266, %c0_267] : memref<64x32xf32, #tpu.memory_space<vmem>>, vector<64x32xf32>
    %cst_268 = arith.constant dense<0.000000e+00> : vector<2x32xf32>
    %1075 = tpu.matmul %1073, %1074, %cst_268 {dimension_numbers = #tpu.dot_dimension_numbers<[1], [0], [0], [1], [0, 0, 1, 1], [], []>} : vector<2x64xf32>, vector<64x32xf32>, vector<2x32xf32> -> vector<2x32xf32>
    %c0_269 = arith.constant 0 : index
    %c0_270 = arith.constant 0 : index
    %1076 = vector.load %arg15[%c0_269, %c0_270] : memref<1x32xf32, #tpu.memory_space<vmem>>, vector<1x32xf32>
    %1077 = vector.broadcast %1076 : vector<1x32xf32> to vector<2x32xf32>
    %1078 = arith.addf %1075, %1077 : vector<2x32xf32>
    %1079 = math.tanh %1078 : vector<2x32xf32>
    %c0_271 = arith.constant 0 : index
    %c0_272 = arith.constant 0 : index
    %1080 = vector.load %arg16[%c0_271, %c0_272] : memref<32x2xf32, #tpu.memory_space<vmem>>, vector<32x2xf32>
    %cst_273 = arith.constant dense<0.000000e+00> : vector<2x2xf32>
    %1081 = tpu.matmul %1079, %1080, %cst_273 {dimension_numbers = #tpu.dot_dimension_numbers<[1], [0], [0], [1], [0, 0, 1, 1], [], []>} : vector<2x32xf32>, vector<32x2xf32>, vector<2x2xf32> -> vector<2x2xf32>
    %c0_274 = arith.constant 0 : index
    %c0_275 = arith.constant 0 : index
    %1082 = vector.load %arg17[%c0_274, %c0_275] : memref<1x2xf32, #tpu.memory_space<vmem>>, vector<1x2xf32>
    %1083 = vector.broadcast %1082 : vector<1x2xf32> to vector<2x2xf32>
    %1084 = arith.addf %1081, %1083 : vector<2x2xf32>
    %c0_276 = arith.constant 0 : index
    %c0_277 = arith.constant 0 : index
    %1085 = vector.load %arg18[%c0_276, %c0_277] : memref<2x2xf32, #tpu.memory_space<vmem>>, vector<2x2xf32>
    tpu.vector_store %arg18[%c0_276, %c0_277], %1084 {strides = array<i32>} : memref<2x2xf32, #tpu.memory_space<vmem>>, vector<2x2xf32>,
    return
  }
}

</mosaic_0001>

<bundles_post_ra>
// kernel: bilstm_forward.1
= control target key start
LH: loop header
LB: loop body
LE: loop exit
PB: predicated region body
PF: predicated region fallthrough
CT: control target
= control target key end

     0   :  { %s7364_s0 = inlined_call_operand.vmem [shape: f32[16,256], index: 0, kind: input, shape index: {}]   ;;  %s7365_s1 = inlined_call_operand.vmem [shape: f32[16,1], index: 1, kind: input, shape index: {}]   ;;  %s7366_s2 = inlined_call_operand.vmem [shape: f32[256,128], index: 2, kind: input, shape index: {}]   ;;  %s7367_s3 = inlined_call_operand.vmem [shape: f32[1,128], index: 3, kind: input, shape index: {}]   ;;  %s7368_s4 = inlined_call_operand.vmem [shape: f32[32,128], index: 4, kind: input, shape index: {}]   ;;  %s7369_s5 = inlined_call_operand.vmem [shape: f32[256,128], index: 5, kind: input, shape index: {}]   ;;  %s7370_s6 = inlined_call_operand.vmem [shape: f32[1,128], index: 6, kind: input, shape index: {}]   ;;  %s7371_s7 = inlined_call_operand.vmem [shape: f32[32,128], index: 7, kind: input, shape index: {}]   ;;  %s7372_s8 = inlined_call_operand.vmem [shape: f32[64,128], index: 8, kind: input, shape index: {}]   ;;  %s7373_s9 = inlined_call_operand.vmem [shape: f32[1,128], index: 9, kind: input, shape index: {}]   ;;  %s7374_s10 = inlined_call_operand.vmem [shape: f32[32,128], index: 10, kind: input, shape index: {}]   ;;  %s7375_s11 = inlined_call_operand.vmem [shape: f32[64,128], index: 11, kind: input, shape index: {}]   ;;  %s7376_s12 = inlined_call_operand.vmem [shape: f32[1,128], index: 12, kind: input, shape index: {}]   ;;  %s7377_s13 = inlined_call_operand.vmem [shape: f32[32,128], index: 13, kind: input, shape index: {}]   ;;  %s7378_s14 = inlined_call_operand.vmem [shape: f32[64,32], index: 14, kind: input, shape index: {}]   ;;  %s7379_s15 = inlined_call_operand.vmem [shape: f32[1,32], index: 15, kind: input, shape index: {}]   ;;  %s7380_s16 = inlined_call_operand.vmem [shape: f32[32,2], index: 16, kind: input, shape index: {}]   ;;  %s7381_s17 = inlined_call_operand.vmem [shape: f32[1,2], index: 17, kind: input, shape index: {}]   ;;  %s7382_s18 = inlined_call_operand.hbm [shape: f32[2,2], index: 18, kind: output, shape index: {}]  }
   0x1   :  { %7386 = sst [smem:[#allocation8_spill]] %s7364_s0 }
   0x2   :  { %7387 = sst [smem:[#allocation9_spill]] %s7365_s1 }
   0x3   :  { %7388 = sst [smem:[#allocation10_spill]] %s7366_s2 }
   0x4   :  { %v198_v0 = vld [vmem:[%s7369_s5 + $0x80] sm:$0xff]  ;;  %v199_v1 = vld [vmem:[%s7369_s5 + $0x88] sm:$0xff]  ;;  %v200_v5 = vld [vmem:[%s7369_s5 + $0x90] sm:$0xff]  ;;  %s7389_s30 = sld [smem:[#allocation10_spill]]  ;;  %s7390_s26 = sld [smem:[#allocation8_spill]] }
   0x5   :  { %v182_v2 = vld [vmem:[%s7369_s5] sm:$0xff]  ;;  %v5380_v3 = vpack.c.bf16 %v199_v1, %v198_v0  ;;  %v183_v4 = vld [vmem:[%s7369_s5 + $0x8] sm:$0xff]  ;;  %v201_v6 = vld [vmem:[%s7369_s5 + $0x98] sm:$0xff] }
   0x6   :  { %v5382_v7 = vpack.c.bf16 %v183_v4, %v182_v2  ;;  %v5384_v8 = vpack.c.bf16 %v201_v6, %v200_v5  ;;  %v184_v9 = vld [vmem:[%s7369_s5 + $0x10] sm:$0xff]  ;;  %v185_v10 = vld [vmem:[%s7369_s5 + $0x18] sm:$0xff]  ;;  %v202_v18 = vld [vmem:[%s7369_s5 + $0xa0] sm:$0xff] }
   0x7   :  { %5381 = vmatprep.subr.bf16.mxu1 %v5380_v3  ;;  %v5386_v15 = vpack.c.bf16 %v185_v10, %v184_v9  ;;  %v203_v19 = vld [vmem:[%s7369_s5 + $0xa8] sm:$0xff]  ;;  %v186_v20 = vld [vmem:[%s7369_s5 + $0x20] sm:$0xff]  ;;  %v204_v28 = vld [vmem:[%s7369_s5 + $0xb0] sm:$0xff] }
   0x8   :  { %5383 = vmatpush3.bf16.msra.mxu1 %v5382_v7  ;;  %v5388_v21 = vpack.c.bf16 %v203_v19, %v202_v18  ;;  %v187_v22 = vld [vmem:[%s7369_s5 + $0x28] sm:$0xff]  ;;  %v205_v30 = vld [vmem:[%s7369_s5 + $0xb8] sm:$0xff]  ;;  %v188_v36 = vld [vmem:[%s7369_s5 + $0x30] sm:$0xff] }
   0x9   :  { %5385 = vmatprep.subr.bf16.mxu1 %v5384_v8  ;;  %v5390_v31 = vpack.c.bf16 %v187_v22, %v186_v20  ;;  %v5392_v35 = vpack.c.bf16 %v205_v30, %v204_v28  ;;  %v189_v37 = vld [vmem:[%s7369_s5 + $0x38] sm:$0xff]  ;;  %v206_v40 = vld [vmem:[%s7369_s5 + $0xc0] sm:$0xff]  ;;  %v207_v41 = vld [vmem:[%s7369_s5 + $0xc8] sm:$0xff] }
   0xa   :  { %v82_v11 = vld [vmem:[%s7389_s30 + $0x80] sm:$0xff]  ;;  %v83_v12 = vld [vmem:[%s7389_s30 + $0x88] sm:$0xff]  ;;  %v84_v23 = vld [vmem:[%s7389_s30 + $0x90] sm:$0xff]  ;;  %v5394_v45 = vpack.c.bf16 %v189_v37, %v188_v36  ;;  %v5396_v50 = vpack.c.bf16 %v207_v41, %v206_v40 }
   0xb   :  { %v66_v13 = vld [vmem:[%s7389_s30] sm:$0xff]  ;;  %v67_v14 = vld [vmem:[%s7389_s30 + $0x8] sm:$0xff]  ;;  %v5348_v16 = vpack.c.bf16 %v83_v12, %v82_v11  ;;  %v85_v24 = vld [vmem:[%s7389_s30 + $0x98] sm:$0xff] }
   0xc   :  { %v5350_v17 = vpack.c.bf16 %v67_v14, %v66_v13  ;;  %v5352_v25 = vpack.c.bf16 %v85_v24, %v84_v23  ;;  %v68_v26 = vld [vmem:[%s7389_s30 + $0x10] sm:$0xff]  ;;  %v69_v27 = vld [vmem:[%s7389_s30 + $0x18] sm:$0xff]  ;;  %5387 = vmatpush3.bf16.msra.mxu1 %v5386_v15  ;;  %v86_v32 = vld [vmem:[%s7389_s30 + $0xa0] sm:$0xff] }
   0xd   :  { %5349 = vmatprep.subr.bf16.mxu0 %v5348_v16  ;;  %v5354_v29 = vpack.c.bf16 %v69_v27, %v68_v26  ;;  %v87_v33 = vld [vmem:[%s7389_s30 + $0xa8] sm:$0xff]  ;;  %v70_v34 = vld [vmem:[%s7389_s30 + $0x20] sm:$0xff]  ;;  %5389 = vmatprep.subr.bf16.mxu1 %v5388_v21  ;;  %v88_v42 = vld [vmem:[%s7389_s30 + $0xb0] sm:$0xff] }
   0xe   :  { %5351 = vmatpush3.bf16.msra.mxu0 %v5350_v17  ;;  %v5356_v38 = vpack.c.bf16 %v87_v33, %v86_v32  ;;  %v71_v39 = vld [vmem:[%s7389_s30 + $0x28] sm:$0xff]  ;;  %v89_v44 = vld [vmem:[%s7389_s30 + $0xb8] sm:$0xff]  ;;  %v190_v46 = vld [vmem:[%s7369_s5 + $0x40] sm:$0xff] }
   0xf   :  { %5353 = vmatprep.subr.bf16.mxu0 %v5352_v25  ;;  %v5358_v43 = vpack.c.bf16 %v71_v39, %v70_v34  ;;  %v5360_v47 = vpack.c.bf16 %v89_v44, %v88_v42  ;;  %v72_v48 = vld [vmem:[%s7389_s30 + $0x30] sm:$0xff]  ;;  %v73_v49 = vld [vmem:[%s7389_s30 + $0x38] sm:$0xff]  ;;  %v191_v51 = vld [vmem:[%s7369_s5 + $0x48] sm:$0xff] }
  0x10   :  { %5391 = vmatpush3.bf16.msra.mxu1 %v5390_v31  ;;  %v90_v52 = vld [vmem:[%s7389_s30 + $0xc0] sm:$0xff]  ;;  %v91_v53 = vld [vmem:[%s7389_s30 + $0xc8] sm:$0xff]  ;;  %v208_v54 = vld [vmem:[%s7369_s5 + $0xd0] sm:$0xff]  ;;  %v5362_v56 = vpack.c.bf16 %v73_v49, %v72_v48  ;;  %v5398_v57 = vpack.c.bf16 %v191_v51, %v190_v46 }
  0x11   :  { %5393 = vmatprep.subr.bf16.mxu1 %v5392_v35  ;;  %v209_v55 = vld [vmem:[%s7369_s5 + $0xd8] sm:$0xff]  ;;  %v192_v58 = vld [vmem:[%s7369_s5 + $0x50] sm:$0xff]  ;;  %v5364_v59 = vpack.c.bf16 %v91_v53, %v90_v52  ;;  %v74_v60 = vld [vmem:[%s7389_s30 + $0x40] sm:$0xff] }
  0x12   :  { %5355 = vmatpush3.bf16.msra.mxu0 %v5354_v29  ;;  %v75_v61 = vld [vmem:[%s7389_s30 + $0x48] sm:$0xff]  ;;  %v5400_v62 = vpack.c.bf16 %v209_v55, %v208_v54  ;;  %v193_v63 = vld [vmem:[%s7369_s5 + $0x58] sm:$0xff]  ;;  %v92_v0 = vld [vmem:[%s7389_s30 + $0xd0] sm:$0xff] }
  0x13   :  { %5357 = vmatprep.subr.bf16.mxu0 %v5356_v38  ;;  %v93_v1 = vld [vmem:[%s7389_s30 + $0xd8] sm:$0xff]  ;;  %v210_v2 = vld [vmem:[%s7369_s5 + $0xe0] sm:$0xff]  ;;  %v211_v3 = vld [vmem:[%s7369_s5 + $0xe8] sm:$0xff]  ;;  %v5366_v4 = vpack.c.bf16 %v75_v61, %v74_v60  ;;  %v5402_v6 = vpack.c.bf16 %v193_v63, %v192_v58 }
  0x14   :  { %5395 = vmatpush3.bf16.msra.mxu1 %v5394_v45  ;;  %v63_v5 = vld [vmem:[%s7390_s26 + $0x8] sm:$0xff]  ;;  %v194_v7 = vld [vmem:[%s7369_s5 + $0x60] sm:$0xff]  ;;  %v5368_v8 = vpack.c.bf16 %v93_v1, %v92_v0  ;;  %v76_v9 = vld [vmem:[%s7389_s30 + $0x50] sm:$0xff]  ;;  %v5404_v11 = vpack.c.bf16 %v211_v3, %v210_v2 }
  0x15   :  { %5397 = vmatprep.subr.bf16.mxu1 %v5396_v50  ;;  %v77_v10 = vld [vmem:[%s7389_s30 + $0x58] sm:$0xff]  ;;  %v195_v12 = vld [vmem:[%s7369_s5 + $0x68] sm:$0xff]  ;;  %v94_v13 = vld [vmem:[%s7389_s30 + $0xe0] sm:$0xff]  ;;  %285 = vmatprep.mubr.f32.mxu1 %v63_v5 }
  0x16   :  { %5359 = vmatpush3.bf16.msra.mxu0 %v5358_v43  ;;  %v95_v14 = vld [vmem:[%s7389_s30 + $0xe8] sm:$0xff]  ;;  %v212_v15 = vld [vmem:[%s7369_s5 + $0xf0] sm:$0xff]  ;;  %v213_v16 = vld [vmem:[%s7369_s5 + $0xf8] sm:$0xff]  ;;  %169 = vmatprep.mubr.f32.mxu0 %v63_v5  ;;  %v5370_v17 = vpack.c.bf16 %v77_v10, %v76_v9  ;;  %v5406_v19 = vpack.c.bf16 %v195_v12, %v194_v7 }
  0x17   :  { %5361 = vmatprep.subr.bf16.mxu0 %v5360_v47  ;;  %v196_v18 = vld [vmem:[%s7369_s5 + $0x70] sm:$0xff]  ;;  %v197_v20 = vld [vmem:[%s7369_s5 + $0x78] sm:$0xff]  ;;  %v5372_v21 = vpack.c.bf16 %v95_v14, %v94_v13  ;;  %v78_v22 = vld [vmem:[%s7389_s30 + $0x60] sm:$0xff]  ;;  %v5408_v24 = vpack.c.bf16 %v213_v16, %v212_v15 }
  0x18   :  { %5399 = vmatpush3.bf16.msra.mxu1 %v5398_v57  ;;  %v79_v23 = vld [vmem:[%s7389_s30 + $0x68] sm:$0xff]  ;;  %v96_v25 = vld [vmem:[%s7389_s30 + $0xf0] sm:$0xff]  ;;  %v97_v26 = vld [vmem:[%s7389_s30 + $0xf8] sm:$0xff] }
  0x19   :  { %5401 = vmatprep.subr.bf16.mxu1 %v5400_v62 }
  0x1a   :  { %5363 = vmatpush3.bf16.msra.mxu0 %v5362_v56 }
  0x1b   :  { %5365 = vmatprep.subr.bf16.mxu0 %v5364_v59 }
  0x1c   :  { %5403 = vmatpush3.bf16.msra.mxu1 %v5402_v6 }
  0x1d   :  { %5405 = vmatprep.subr.bf16.mxu1 %v5404_v11 }
  0x1e   :  { %5367 = vmatpush3.bf16.msra.mxu0 %v5366_v4 }
  0x1f   :  { %5369 = vmatprep.subr.bf16.mxu0 %v5368_v8 }
  0x20   :  { %23 = vsyncpa [#allocation6], 0  ;;  %v5374_v27 = vpack.c.bf16 %v79_v23, %v78_v22  ;;  %5407 = vmatpush3.bf16.msra.mxu1 %v5406_v19  ;;  %v5410_v28 = vpack.c.bf16 %v197_v20, %v196_v18  ;;  %v5376_v29 = vpack.c.bf16 %v97_v26, %v96_v25  ;;  %v80_v30 = vld [vmem:[%s7389_s30 + $0x70] sm:$0xff]  ;;  %v81_v31 = vld [vmem:[%s7389_s30 + $0x78] sm:$0xff]  ;;  %v5945_v40 = vmov 0.0|0.0   ;;  %s7391_s25 = sld [smem:[#allocation9_spill]] }
  0x21   :  { %5409 = vmatprep.subr.bf16.mxu1 %v5408_v24  ;;  %v302_v32 = vld [vmem:[%s7371_s7] sm:$0xff]  ;;  %v303_v33 = vld [vmem:[%s7371_s7 + $0x8] sm:$0xff]  ;;  %v5378_v34 = vpack.c.bf16 %v81_v31, %v80_v30  ;;  %v65_v39 = vld [vmem:[%s7390_s26 + $0x18] sm:$0xff]  ;;  %vm5946_vm0 = vmmov 0   ;;  %v5947_v49 = vmov 0.0   ;;  %v5948_v50 = vmov 0  }
  0x22   :  { %5371 = vmatpush3.bf16.msra.mxu0 %v5370_v17  ;;  %v62_v35 = vld [vmem:[%s7390_s26] sm:$0xff]  ;;  %v6252_v36 = vpack.c.bf16 %v303_v33, %v302_v32  ;;  %v299_v38 = vld [vmem:[%s7368_s4 + $0x8] sm:$0xff]  ;;  %v304_v41 = vld [vmem:[%s7371_s7 + $0x10] sm:$0xff]  ;;  %5662 = vset.pattern.permute.xlu0 %v5948_v50  ;;  %s5949_s27 = smov 32   ;;  %s5950_s29 = smov 64   ;;  %vm532_vm5 = vcmask 254976  }
  0x23   :  { %5373 = vmatprep.subr.bf16.mxu0 %v5372_v21  ;;  %v298_v37 = vld [vmem:[%s7368_s4] sm:$0xff]  ;;  %v305_v42 = vld [vmem:[%s7371_s7 + $0x18] sm:$0xff]  ;;  %v64_v44 = vld [vmem:[%s7390_s26 + $0x10] sm:$0xff]  ;;  %s5951_s0 = smov 96   ;;  %vm310_vm6 = vcmask 261120   ;;  %vm781_vm7 = vcmask 257026  }
  0x24   :  { %5411 = vmatpush3.bf16.msra.mxu1 %v5410_v28  ;;  %v6270_v43 = vpack.c.bf16 %v299_v38, %v298_v37  ;;  %v6276_v45 = vpack.c.bf16 %v305_v42, %v304_v41  ;;  %v300_v46 = vld [vmem:[%s7368_s4 + $0x10] sm:$0xff]  ;;  %v301_v47 = vld [vmem:[%s7368_s4 + $0x18] sm:$0xff]  ;;  %v4587_v52 = vld [vmem:[%s7370_s6] ss:$0 sm:$0xff]  ;;  %vm1033_vm8 = vcmask 259076   ;;  %vm1274_vm9 = vcmask 261126  }
  0x25   :  { %5418 = vmatprep.subr.bf16.mxu1 %v5945_v40  ;;  %v6287_v48 = vpack.c.bf16 %v301_v47, %v300_v46  ;;  %v4586_v58 = vld [vmem:[%s7367_s3] ss:$0 sm:$0xff]  ;;  %vm538_vm10 = vcmask 523526   ;;  %vm787_vm11 = vcmask 521476   ;;  %vm1039_vm12 = vcmask 519426  }
  0x26   :  { %5375 = vmatpush3.bf16.msra.mxu0 %v5374_v27  ;;  %v60_v14 = vld [vmem:[%s7391_s25] sm:$0xff]  ;;  %v61_v23 = vld [vmem:[%s7391_s25 + $0x8] sm:$0xff]  ;;  %vm1280_vm13 = vcmask 517376   ;;  %vm2267_vm14 = vcmask 523264   ;;  %vm4570_vm15 = vcmask 9216  }
  0x27   :  { %5377 = vmatprep.subr.bf16.mxu0 %v5376_v29  ;;  %286 = vmatmul.mubr.f32.vlgmr.msra.gmra.mrb[0].mxu1 %v62_v35  ;;  %vm306_vm1 = vcmp.gt.f32.partialorder %v60_v14, 0.0  ;;  %vm307_vm2 = vcmp.gt.f32.partialorder %v61_v23, 0.0 }
  0x28   :  { %290 = vmatprep.mubr.f32.mxu1 %v65_v39  ;;  %5420 = vmatpush3.bf16.msra.mxu1 %v6252_v36  ;;  %v504_v16 = vsel %vm306_vm1, 1, %v5948_v50  ;;  %v511_v24 = vsel %vm307_vm2, 1, %v5948_v50 }
  0x29   :  { %5421 = vmatprep.subr.bf16.mxu1 %v5945_v40 }
  0x2a   :  { %5379 = vmatpush3.bf16.msra.mxu0 %v5378_v34 }
  0x2b   :  { %5412 = vmatprep.subr.bf16.mxu0 %v5945_v40  ;;  %291 = vmatmul.mubr.f32.gmra.mrb[2].mxu1 %v64_v44 }
  0x2c   :  { %5423 = vmatpush3.bf16.msra.mxu1 %v6276_v45  ;;  %4947 = vmatprep.mubr.msk.f32.mxu1 %vm5946_vm0, %v5947_v49 }
  0x2d   :  { %170 = vmatmul.mubr.f32.vlgmr.msra.gmra.mrb[0].mxu0 %v62_v35  ;;  %5430 = vmatprep.subr.bf16.mxu1 %v5945_v40 }
  0x2e   :  { %5414 = vmatpush3.bf16.msra.mxu0 %v6270_v43  ;;  %174 = vmatprep.mubr.f32.mxu0 %v65_v39 }
  0x2f   :  { %5415 = vmatprep.subr.bf16.mxu0 %v5945_v40  ;;  %4948 = vmatmul.mubr.f32.vlgmr.msra.gmra.mrb[4].mxu1 %v5947_v49 }
  0x30   :  { %5432 = vmatpush3.bf16.msra.mxu1 %v6252_v36  ;;  %4969 = vmatprep.mubr.msk.f32.mxu1 %vm5946_vm0, %v5947_v49 }
  0x31   :  { %175 = vmatmul.mubr.f32.gmra.mrb[2].mxu0 %v64_v44  ;;  %5433 = vmatprep.subr.bf16.mxu1 %v5945_v40 }
  0x32   :  { %5417 = vmatpush3.bf16.msra.mxu0 %v6287_v48  ;;  %4936 = vmatprep.mubr.msk.f32.mxu0 %vm5946_vm0, %v5947_v49 }
  0x33   :  { %5424 = vmatprep.subr.bf16.mxu0 %v5945_v40 }
  0x34   :  { %5435 = vmatpush3.bf16.msra.mxu1 %v6276_v45 }
  0x35   :  { %4937 = vmatmul.mubr.f32.vlgmr.msra.gmra.mrb[4].mxu0 %v5947_v49  ;;  %5442 = vmatprep.subr.bf16.mxu1 %v5945_v40 }
  0x36   :  { %5426 = vmatpush3.bf16.msra.mxu0 %v6270_v43  ;;  %4958 = vmatprep.mubr.msk.f32.mxu0 %vm5946_vm0, %v5947_v49 }
  0x37   :  { %5427 = vmatprep.subr.bf16.mxu0 %v5945_v40 }
  0x3a   :  { %5429 = vmatpush3.bf16.msra.mxu0 %v6287_v48 }
  0x3b   :  { %5436 = vmatprep.subr.bf16.mxu0 %v5945_v40 }
  0xfa   :  { %v4728_v51 = vpop.f32.mrb[0].mxu1 }
  0xfb   :  { %v4729_v53 = vpop.f32.mrb[1].mxu1 }
  0xfc   :  { %v4730_v54 = vadd.f32 %v4729_v53, %v4728_v51 }
  0xfe   :  { %v288_v56 = vadd.f32 %v4730_v54, %v4587_v52  ;;  %v4731_v57 = vpop.f32.mrb[2].mxu1 }
  0xff   :  { %v4732_v60 = vpop.f32.mrb[3].mxu1 }
 0x100   :  { %v4690_v55 = vpop.f32.mrb[0].mxu0  ;;  %296 = vst [vmem:[#allocation3] sm:$0xff] %v288_v56  ;;  %v4733_v62 = vadd.f32 %v4732_v60, %v4731_v57 }
 0x101   :  { %v4691_v59 = vpop.f32.mrb[1].mxu0 }
 0x102   :  { %v4692_v61 = vadd.f32 %v4691_v59, %v4690_v55  ;;  %v293_v1 = vadd.f32 %v4733_v62, %v4587_v52  ;;  %v450_v2 = vpop.f32.mrb[4].mxu1 }
 0x103   :  { %v4949_v5 = vpop.f32.mrb[5].mxu1 }
 0x104   :  { %v172_v63 = vadd.f32 %v4692_v61, %v4586_v58  ;;  %v4693_v0 = vpop.f32.mrb[2].mxu0  ;;  %297 = vst [vmem:[#allocation3 + $0x8] sm:$0xff] %v293_v1 }
 0x105   :  { %v4694_v3 = vpop.f32.mrb[3].mxu0 }
 0x106   :  { %180 = vst [vmem:[#allocation2] sm:$0xff] %v172_v63  ;;  %v4695_v4 = vadd.f32 %v4694_v3, %v4693_v0 }
 0x108   :  { %v177_v6 = vadd.f32 %v4695_v4, %v4586_v58  ;;  %v380_v7 = vpop.f32.mrb[4].mxu0 }
 0x109   :  { %v4938_v8 = vpop.f32.mrb[5].mxu0 }
 0x10a   :  { %181 = vst [vmem:[#allocation2 + $0x8] sm:$0xff] %v177_v6 }
 0x10b   :  { %v309_v10 = vld [vmem:[#allocation3 + $0xe] sm:$0x3]  ;;  %v541_v60 = vld [vmem:[#allocation3 + $0xc] sm:$0x3] }
 0x10c   :  { %v479_v11 = vadd.f32 %v450_v2, %v309_v10 }
 0x10d   :  { %v308_v9 = vld [vmem:[#allocation2] sm:$0x3]  ;;  %v540_v58 = vld [vmem:[#allocation2 + $0x2] sm:$0x3] }
 0x10e   :  { %v454_v12 = vadd.f32 %v380_v7, %v308_v9  ;;  %5663 = vtanh.f32 %v479_v11  ;;  %v4589_v17 = vmul.f32 -1.442695, %v479_v11 }
 0x110   :  { %5665 = vtanh.f32 %v454_v12  ;;  %v4588_v18 = vmul.f32 -1.442695, %v454_v12 }
 0x111   :  { %5667 = vpow2.f32 %v4589_v17 }
 0x112   :  { %5669 = vpow2.f32 %v4588_v18 }
 0x118   :  { %v5664_v13 = vpop.eup %5663 }
 0x119   :  { %489 = vrot.lane.b32.xlu0 %v5664_v13, %s5949_s27 }
 0x11a   :  { %v5666_v15 = vpop.eup %5665 }
 0x11b   :  { %v5668_v19 = vpop.eup %5667 }
 0x11c   :  { %v483_v20 = vadd.f32 1.0, %v5668_v19  ;;  %v5670_v21 = vpop.eup %5669 }
 0x11d   :  { %464 = vrot.lane.b32.xlu0 %v5666_v15, %s5949_s27  ;;  %v458_v22 = vadd.f32 1.0, %v5670_v21 }
 0x11e   :  { %5671 = vrcp.f32 %v483_v20 }
 0x11f   :  { %5673 = vrcp.f32 %v458_v22 }
 0x121   :  { %506 = vperm.xlu0 %5662, %v504_v16  }
 0x125   :  { %513 = vperm.xlu0 %5662, %v511_v24  }
 0x128   :  { %v5672_v25 = vpop.eup %5671 }
 0x129   :  { %v5674_v28 = vpop.eup %5673  ;;  %v487_v31 = vmul.f32 0.0, %v5672_v25 }
 0x12a   :  { %v462_v34 = vmul.f32 0.0, %v5674_v28 }
 0x18b   :  { %v490_v26 = vpop.permute.xlu0 %489 }
 0x18c   :  { %v492_v27 = vmul.f32 %v5672_v25, %v490_v26 }
 0x18e   :  { %494 = vrot.lane.b32.xlu1 %v492_v27, %s5949_s27 }
 0x18f   :  { %v465_v29 = vpop.permute.xlu0 %464 }
 0x190   :  { %v467_v30 = vmul.f32 %v5674_v28, %v465_v29 }
 0x192   :  { %469 = vrot.lane.b32.xlu1 %v467_v30, %s5949_s27 }
 0x1a0   :  { %v6333_v44 = vpop.permute.xlu0 %506 }
 0x1a1   :  { %vm508_vm3 = vcmp.eq.s32.totalorder %v6333_v44, 1 }
 0x1a4   :  { %v6344_v53 = vpop.permute.xlu0 %513 }
 0x1a5   :  { %vm515_vm4 = vcmp.eq.s32.totalorder %v6344_v53, 1 }
 0x200   :  { %v495_v32 = vpop.permute.xlu1 %494 }
 0x201   :  { %v497_v33 = vadd.f32 %v495_v32, %v487_v31 }
 0x203   :  { %5675 = vtanh.f32 %v497_v33  ;;  %v523_v51 = vrot.slane %v497_v33, 2 }
 0x204   :  { %v470_v35 = vpop.permute.xlu1 %469 }
 0x205   :  { %v6328_v37 = vadd.f32 %v470_v35, %v462_v34 }
 0x207   :  { %5677 = vtanh.f32 %v6328_v37  ;;  %v510_v20 = vsel %vm508_vm3, %v6328_v37, 0.0 }
 0x20d   :  { %v5676_v38 = vpop.eup %5675 }
 0x20e   :  { %500 = vrot.lane.b32.xlu1 %v5676_v38, %s5949_s27 }
 0x211   :  { %v5678_v39 = vpop.eup %5677 }
 0x212   :  { %475 = vrot.lane.b32.xlu1 %v5678_v39, %s5949_s27  ;;  %v758_v39 = vrot.slane %v510_v20, 6 }
 0x280   :  { %v501_v41 = vpop.permute.xlu1 %500 }
 0x281   :  { %v503_v42 = vmul.f32 %v5672_v25, %v501_v41 }
 0x283   :  { %v517_v46 = vrot.slane %v503_v42, 2 }
 0x284   :  { %v476_v47 = vpop.permute.xlu1 %475 }
 0x285   :  { %v478_v50 = vmul.f32 %v5674_v28, %v476_v47  ;;  %518 = vrot.lane.b32.xlu1 %v517_v46, %s5950_s29 }
 0x287   :  { %v6339_v52 = vsel %vm508_vm3, %v478_v50, 0.0 }
 0x288   :  { %529 = vrot.lane.b32.xlu0 %v6339_v52, %s5950_s29  ;;  %v747_v29 = vrot.slane %v6339_v52, 6 }
 0x289   :  { %524 = vrot.lane.b32.xlu1 %v523_v51, %s5951_s0 }
 0x2f7   :  { %v519_v54 = vpop.permute.xlu1 %518 }
 0x2f8   :  { %v6349_v55 = vsel %vm515_vm4, %v519_v54, 0.0 }
 0x2f9   :  { %v614_v56 = vrot.slane %v6349_v55, 6  ;;  %v768_v51 = vrot.slane %v6349_v55, 2 }
 0x2fa   :  { %v530_v57 = vpop.permute.xlu0 %529 }
 0x2fb   :  { %533 = vst.msk [vmem:[#allocation4] sm:$0x3] %vm532_vm5, %v530_v57  ;;  %4959 = vmatmul.mubr.msk.f32.vlgmr.msra.gmra.mrb[6].mxu0 %vm310_vm6, %v530_v57  ;;  %4970 = vmatmul.mubr.msk.f32.vlgmr.msra.gmra.mrb[6].mxu1 %vm310_vm6, %v614_v56  ;;  %v525_v2 = vpop.permute.xlu1 %524  ;;  %v789_v57 = vld [vmem:[#allocation2 + $0x4] sm:$0x3] }
 0x2fc   :  { %5438 = vmatpush3.bf16.msra.mxu0 %v6270_v43  ;;  %5444 = vmatpush3.bf16.msra.mxu1 %v6252_v36  ;;  %v6369_v4 = vsel %vm515_vm4, %v525_v2, 0.0 }
 0x2fd   :  { %5439 = vmatprep.subr.bf16.mxu0 %v5945_v40  ;;  %4980 = vmatprep.mubr.msk.f32.mxu0 %vm5946_vm0, %v5947_v49  ;;  %v721_v6 = vrot.slane %v6369_v4, 6 }
 0x2fe   :  { %5445 = vmatprep.subr.bf16.mxu1 %v5945_v40  ;;  %4991 = vmatprep.mubr.msk.f32.mxu1 %vm5946_vm0, %v5947_v49 }
 0x300   :  { %5441 = vmatpush3.bf16.msra.mxu0 %v6287_v48  ;;  %5447 = vmatpush3.bf16.msra.mxu1 %v6276_v45 }
 0x301   :  { %5448 = vmatprep.subr.bf16.mxu0 %v5945_v40  ;;  %5454 = vmatprep.subr.bf16.mxu1 %v5945_v40 }
 0x3ce   :  { %v610_v59 = vpop.f32.mrb[6].mxu0  ;;  %v683_v61 = vpop.f32.mrb[6].mxu1 }
 0x3cf   :  { %v687_v62 = vadd.f32 %v610_v59, %v540_v58  ;;  %v712_v63 = vadd.f32 %v683_v61, %v541_v60  ;;  %v4960_v0 = vpop.f32.mrb[7].mxu0  ;;  %v4971_v1 = vpop.f32.mrb[7].mxu1  ;;  %v790_v61 = vld [vmem:[#allocation3 + $0xa] sm:$0x3] }
 0x3d1   :  { %5679 = vtanh.f32 %v687_v62  ;;  %v4592_v7 = vmul.f32 -1.442695, %v687_v62  ;;  %v4593_v8 = vmul.f32 -1.442695, %v712_v63 }
 0x3d2   :  { %5681 = vtanh.f32 %v712_v63 }
 0x3d3   :  { %5683 = vpow2.f32 %v4592_v7  ;;  %v776_v7 = vrot.slane %v6369_v4, 2 }
 0x3d4   :  { %5685 = vpow2.f32 %v4593_v8 }
 0x3db   :  { %v5680_v3 = vpop.eup %5679 }
 0x3dc   :  { %v5682_v5 = vpop.eup %5681  ;;  %697 = vrot.lane.b32.xlu0 %v5680_v3, %s5949_s27 }
 0x3dd   :  { %727 = vrot.lane.b32.xlu1 %v5682_v5, %s5949_s27  ;;  %v5684_v9 = vpop.eup %5683 }
 0x3de   :  { %v5686_v10 = vpop.eup %5685  ;;  %v691_v11 = vadd.f32 1.0, %v5684_v9 }
 0x3df   :  { %v716_v12 = vadd.f32 1.0, %v5686_v10 }
 0x3e0   :  { %722 = vrot.lane.b32.xlu0 %v721_v6, %s5949_s27  ;;  %5687 = vrcp.f32 %v691_v11 }
 0x3e1   :  { %5689 = vrcp.f32 %v716_v12 }
 0x3ea   :  { %v5688_v13 = vpop.eup %5687 }
 0x3eb   :  { %v5690_v15 = vpop.eup %5689  ;;  %v695_v21 = vmul.f32 %v5688_v13, %v510_v20 }
 0x44e   :  { %v698_v14 = vpop.permute.xlu0 %697 }
 0x44f   :  { %v728_v16 = vpop.permute.xlu1 %727  ;;  %v700_v17 = vmul.f32 %v5688_v13, %v698_v14 }
 0x450   :  { %v730_v18 = vmul.f32 %v5690_v15, %v728_v16 }
 0x451   :  { %702 = vrot.lane.b32.xlu1 %v700_v17, %s5949_s27 }
 0x452   :  { %732 = vrot.lane.b32.xlu0 %v730_v18, %s5949_s27  ;;  %v723_v19 = vpop.permute.xlu0 %722 }
 0x453   :  { %v725_v22 = vmul.f32 %v5690_v15, %v723_v19 }
 0x4c3   :  { %v703_v23 = vpop.permute.xlu1 %702 }
 0x4c4   :  { %v733_v24 = vpop.permute.xlu0 %732  ;;  %v705_v25 = vadd.f32 %v703_v23, %v695_v21 }
 0x4c5   :  { %v735_v26 = vadd.f32 %v733_v24, %v725_v22 }
 0x4c6   :  { %5691 = vtanh.f32 %v705_v25  ;;  %v753_v30 = vrot.slane %v705_v25, 6 }
 0x4c7   :  { %5693 = vtanh.f32 %v735_v26  ;;  %v772_v31 = vrot.slane %v735_v26, 4 }
 0x4d0   :  { %v5692_v27 = vpop.eup %5691 }
 0x4d1   :  { %v5694_v28 = vpop.eup %5693  ;;  %708 = vrot.lane.b32.xlu1 %v5692_v27, %s5949_s27 }
 0x4d2   :  { %738 = vrot.lane.b32.xlu0 %v5694_v28, %s5949_s27 }
 0x4d6   :  { %748 = vrot.lane.b32.xlu0 %v747_v29, %s5950_s29 }
 0x4da   :  { %754 = vrot.lane.b32.xlu0 %v753_v30, %s5951_s0 }
 0x4de   :  { %773 = vrot.lane.b32.xlu0 %v772_v31, %s5951_s0 }
 0x543   :  { %v709_v32 = vpop.permute.xlu1 %708 }
 0x544   :  { %v739_v33 = vpop.permute.xlu0 %738  ;;  %v711_v34 = vmul.f32 %v5688_v13, %v709_v32 }
 0x545   :  { %v741_v35 = vmul.f32 %v5690_v15, %v739_v33 }
 0x546   :  { %v743_v37 = vrot.slane %v711_v34, 6 }
 0x547   :  { %v764_v38 = vrot.slane %v741_v35, 4 }
 0x548   :  { %744 = vrot.lane.b32.xlu1 %v743_v37, %s5950_s29  ;;  %v749_v41 = vpop.permute.xlu0 %748 }
 0x54c   :  { %765 = vrot.lane.b32.xlu1 %v764_v38, %s5950_s29  ;;  %v755_v1 = vpop.permute.xlu0 %754 }
 0x550   :  { %759 = vrot.lane.b32.xlu1 %v758_v39, %s5951_s0  ;;  %v774_v6 = vpop.permute.xlu0 %773 }
 0x551   :  { %v6429_v10 = vsel %vm515_vm4, %v774_v6, %v776_v7 }
 0x552   :  { %v978_v11 = vrot.slane %v6429_v10, 4 }
 0x5ba   :  { %v745_v42 = vpop.permute.xlu1 %744 }
 0x5bb   :  { %v6391_v46 = vsel %vm508_vm3, %v745_v42, %v749_v41  ;;  %v779_v47 = vsel %vm508_vm3, %v745_v42, 0.0 }
 0x5bc   :  { %v792_v50 = vrot.slane %v6391_v46, 2  ;;  %782 = vst.msk [vmem:[#allocation4] sm:$0xc] %vm781_vm7, %v779_v47  ;;  %v1004_v47 = vrot.slane %v6391_v46, 6 }
 0x5be   :  { %4981 = vmatmul.mubr.msk.f32.vlgmr.msra.gmra.mrb[8].mxu0 %vm310_vm6, %v792_v50  ;;  %v6399_v52 = vpop.permute.xlu1 %765 }
 0x5bf   :  { %v6404_v54 = vsel %vm515_vm4, %v6399_v52, %v768_v51  ;;  %5450 = vmatpush3.bf16.msra.mxu0 %v6270_v43  ;;  %5002 = vmatprep.mubr.msk.f32.mxu0 %vm5946_vm0, %v5947_v49 }
 0x5c0   :  { %v866_v56 = vrot.slane %v6404_v54, 4  ;;  %5451 = vmatprep.subr.bf16.mxu0 %v5945_v40 }
 0x5c2   :  { %4992 = vmatmul.mubr.msk.f32.vlgmr.msra.gmra.mrb[8].mxu1 %vm310_vm6, %v866_v56  ;;  %v760_v2 = vpop.permute.xlu1 %759 }
 0x5c3   :  { %5453 = vmatpush3.bf16.msra.mxu0 %v6287_v48  ;;  %5456 = vmatpush3.bf16.msra.mxu1 %v6252_v36  ;;  %v6422_v5 = vsel %vm508_vm3, %v755_v1, %v760_v2 }
 0x5c4   :  { %5457 = vmatprep.subr.bf16.mxu1 %v5945_v40  ;;  %5013 = vmatprep.mubr.msk.f32.mxu1 %vm5946_vm0, %v5947_v49  ;;  %v948_v8 = vrot.slane %v6422_v5, 2  ;;  %v1012_v7 = vrot.slane %v6422_v5, 6 }
 0x5c5   :  { %5460 = vmatprep.subr.bf16.mxu0 %v5945_v40 }
 0x5c7   :  { %5459 = vmatpush3.bf16.msra.mxu1 %v6276_v45 }
 0x5c8   :  { %5466 = vmatprep.subr.bf16.mxu1 %v5945_v40 }
 0x691   :  { %v861_v58 = vpop.f32.mrb[8].mxu0 }
 0x692   :  { %v939_v59 = vadd.f32 %v861_v58, %v789_v57  ;;  %v4982_v60 = vpop.f32.mrb[9].mxu0  ;;  %v1020_v58 = vrot.slane %v6404_v54, 2  ;;  %v1041_v54 = vld [vmem:[#allocation2 + $0x6] sm:$0x3] }
 0x694   :  { %5695 = vtanh.f32 %v939_v59  ;;  %v4596_v12 = vmul.f32 -1.442695, %v939_v59 }
 0x695   :  { %v935_v62 = vpop.f32.mrb[8].mxu1 }
 0x696   :  { %v969_v63 = vadd.f32 %v935_v62, %v790_v61  ;;  %v4993_v0 = vpop.f32.mrb[9].mxu1 }
 0x697   :  { %v1042_v0 = vld [vmem:[#allocation3 + $0x8] sm:$0x3] }
 0x698   :  { %5697 = vtanh.f32 %v969_v63  ;;  %v4597_v13 = vmul.f32 -1.442695, %v969_v63 }
 0x699   :  { %5699 = vpow2.f32 %v4596_v12  ;;  %v1028_v12 = vrot.slane %v6429_v10, 2 }
 0x69a   :  { %5701 = vpow2.f32 %v4597_v13 }
 0x69e   :  { %v5696_v3 = vpop.eup %5695 }
 0x69f   :  { %954 = vrot.lane.b32.xlu1 %v5696_v3, %s5949_s27 }
 0x6a2   :  { %v5698_v9 = vpop.eup %5697 }
 0x6a3   :  { %984 = vrot.lane.b32.xlu0 %v5698_v9, %s5949_s27  ;;  %949 = vrot.lane.b32.xlu1 %v948_v8, %s5949_s27  ;;  %v5700_v4 = vpop.eup %5699 }
 0x6a4   :  { %v943_v14 = vadd.f32 1.0, %v5700_v4  ;;  %v5702_v15 = vpop.eup %5701 }
 0x6a5   :  { %v973_v16 = vadd.f32 1.0, %v5702_v15 }
 0x6a6   :  { %5703 = vrcp.f32 %v943_v14 }
 0x6a7   :  { %979 = vrot.lane.b32.xlu0 %v978_v11, %s5949_s27  ;;  %5705 = vrcp.f32 %v973_v16 }
 0x6b0   :  { %v5704_v17 = vpop.eup %5703 }
 0x6b1   :  { %v5706_v20 = vpop.eup %5705 }
 0x711   :  { %v955_v18 = vpop.permute.xlu1 %954 }
 0x712   :  { %v957_v19 = vmul.f32 %v5704_v17, %v955_v18 }
 0x714   :  { %959 = vrot.lane.b32.xlu1 %v957_v19, %s5949_s27 }
 0x715   :  { %v985_v21 = vpop.permute.xlu0 %984  ;;  %v950_v23 = vpop.permute.xlu1 %949 }
 0x716   :  { %v987_v22 = vmul.f32 %v5706_v20, %v985_v21  ;;  %v952_v24 = vmul.f32 %v5704_v17, %v950_v23 }
 0x718   :  { %989 = vrot.lane.b32.xlu0 %v987_v22, %s5949_s27 }
 0x719   :  { %v980_v25 = vpop.permute.xlu0 %979 }
 0x71a   :  { %v982_v28 = vmul.f32 %v5706_v20, %v980_v25 }
 0x786   :  { %v960_v26 = vpop.permute.xlu1 %959 }
 0x787   :  { %v962_v27 = vadd.f32 %v960_v26, %v952_v24 }
 0x789   :  { %5707 = vtanh.f32 %v962_v27  ;;  %v1008_v39 = vrot.slane %v962_v27, 4 }
 0x78a   :  { %v990_v29 = vpop.permute.xlu0 %989 }
 0x78b   :  { %v992_v30 = vadd.f32 %v990_v29, %v982_v28 }
 0x78d   :  { %5709 = vtanh.f32 %v992_v30  ;;  %v1024_v42 = vrot.slane %v992_v30, 6 }
 0x793   :  { %v5708_v31 = vpop.eup %5707 }
 0x794   :  { %965 = vrot.lane.b32.xlu1 %v5708_v31, %s5949_s27 }
 0x797   :  { %v5710_v32 = vpop.eup %5709 }
 0x798   :  { %995 = vrot.lane.b32.xlu0 %v5710_v32, %s5949_s27 }
 0x806   :  { %v966_v33 = vpop.permute.xlu1 %965 }
 0x807   :  { %v968_v34 = vmul.f32 %v5704_v17, %v966_v33 }
 0x809   :  { %v1000_v35 = vrot.slane %v968_v34, 4 }
 0x80a   :  { %v996_v37 = vpop.permute.xlu0 %995 }
 0x80b   :  { %v998_v38 = vmul.f32 %v5706_v20, %v996_v37  ;;  %1001 = vrot.lane.b32.xlu1 %v1000_v35, %s5950_s29 }
 0x80d   :  { %v1016_v41 = vrot.slane %v998_v38, 6 }
 0x80f   :  { %1017 = vrot.lane.b32.xlu0 %v1016_v41, %s5950_s29  ;;  %1009 = vrot.lane.b32.xlu1 %v1008_v39, %s5951_s0 }
 0x813   :  { %1025 = vrot.lane.b32.xlu0 %v1024_v42, %s5951_s0 }
 0x87d   :  { %v1002_v50 = vpop.permute.xlu1 %1001 }
 0x87e   :  { %v6446_v51 = vsel %vm508_vm3, %v1002_v50, %v1004_v47  ;;  %v1031_v56 = vsel %vm508_vm3, %v1002_v50, 0.0 }
 0x87f   :  { %v1044_v57 = vrot.slane %v6446_v51, 4  ;;  %1034 = vst.msk [vmem:[#allocation4] sm:$0x30] %vm1033_vm8, %v1031_v56 }
 0x881   :  { %v6453_v59 = vpop.permute.xlu0 %1017  ;;  %5003 = vmatmul.mubr.msk.f32.vlgmr.msra.gmra.mrb[10].mxu0 %vm310_vm6, %v1044_v57  ;;  %v1010_v6 = vpop.permute.xlu1 %1009  ;;  %v1256_v57 = vrot.slane %v6446_v51, 6  ;;  %v1282_v51 = vld [vmem:[#allocation2 + $0x8] sm:$0x3] }
 0x882   :  { %v6459_v46 = vsel %vm515_vm4, %v6453_v59, %v1020_v58  ;;  %5462 = vmatpush3.bf16.msra.mxu0 %v6270_v43  ;;  %5024 = vmatprep.mubr.msk.f32.mxu0 %vm5946_vm0, %v5947_v49  ;;  %v6480_v9 = vsel %vm508_vm3, %v1010_v6, %v1012_v7 }
 0x883   :  { %v1118_v60 = vrot.slane %v6459_v46, 2  ;;  %5463 = vmatprep.subr.bf16.mxu0 %v5945_v40  ;;  %v1200_v13 = vrot.slane %v6480_v9, 4 }
 0x885   :  { %5014 = vmatmul.mubr.msk.f32.vlgmr.msra.gmra.mrb[10].mxu1 %vm310_vm6, %v1118_v60  ;;  %v1026_v11 = vpop.permute.xlu0 %1025 }
 0x886   :  { %5468 = vmatpush3.bf16.msra.mxu1 %v6252_v36  ;;  %5465 = vmatpush3.bf16.msra.mxu0 %v6287_v48  ;;  %v1030_v14 = vsel %vm515_vm4, %v1026_v11, %v1028_v12 }
 0x887   :  { %5469 = vmatprep.subr.bf16.mxu1 %v5945_v40  ;;  %5035 = vmatprep.mubr.msk.f32.mxu1 %vm5946_vm0, %v5947_v49  ;;  %v1230_v5 = vrot.slane %v1030_v14, 2 }
 0x888   :  { %5472 = vmatprep.subr.bf16.mxu0 %v5945_v40 }
 0x88a   :  { %5471 = vmatpush3.bf16.msra.mxu1 %v6276_v45 }
 0x88b   :  { %5478 = vmatprep.subr.bf16.mxu1 %v5945_v40 }
 0x954   :  { %v1113_v61 = vpop.f32.mrb[10].mxu0 }
 0x955   :  { %v1191_v62 = vadd.f32 %v1113_v61, %v1041_v54  ;;  %v5004_v63 = vpop.f32.mrb[11].mxu0 }
 0x956   :  { %v1283_v63 = vld [vmem:[#allocation3 + $0x6] sm:$0x3] }
 0x957   :  { %5711 = vtanh.f32 %v1191_v62  ;;  %v4600_v15 = vmul.f32 -1.442695, %v1191_v62 }
 0x958   :  { %v1187_v1 = vpop.f32.mrb[10].mxu1 }
 0x959   :  { %v1221_v2 = vadd.f32 %v1187_v1, %v1042_v0  ;;  %v5015_v3 = vpop.f32.mrb[11].mxu1 }
 0x95b   :  { %5713 = vtanh.f32 %v1221_v2  ;;  %v4601_v16 = vmul.f32 -1.442695, %v1221_v2 }
 0x95c   :  { %5715 = vpow2.f32 %v4600_v15 }
 0x95d   :  { %5717 = vpow2.f32 %v4601_v16 }
 0x961   :  { %v5712_v8 = vpop.eup %5711 }
 0x962   :  { %1206 = vrot.lane.b32.xlu1 %v5712_v8, %s5949_s27  ;;  %v1264_v8 = vrot.slane %v6480_v9, 6 }
 0x965   :  { %v5714_v4 = vpop.eup %5713 }
 0x966   :  { %1236 = vrot.lane.b32.xlu0 %v5714_v4, %s5949_s27  ;;  %1201 = vrot.lane.b32.xlu1 %v1200_v13, %s5949_s27  ;;  %v5716_v17 = vpop.eup %5715 }
 0x967   :  { %v1195_v18 = vadd.f32 1.0, %v5716_v17  ;;  %v5718_v10 = vpop.eup %5717 }
 0x968   :  { %v1225_v19 = vadd.f32 1.0, %v5718_v10 }
 0x969   :  { %5719 = vrcp.f32 %v1195_v18 }
 0x96a   :  { %1231 = vrot.lane.b32.xlu0 %v1230_v5, %s5949_s27  ;;  %5721 = vrcp.f32 %v1225_v19 }
 0x973   :  { %v5720_v20 = vpop.eup %5719 }
 0x974   :  { %v5722_v23 = vpop.eup %5721 }
 0x9d4   :  { %v1207_v21 = vpop.permute.xlu1 %1206 }
 0x9d5   :  { %v1209_v22 = vmul.f32 %v5720_v20, %v1207_v21 }
 0x9d7   :  { %1211 = vrot.lane.b32.xlu1 %v1209_v22, %s5949_s27 }
 0x9d8   :  { %v1237_v24 = vpop.permute.xlu0 %1236  ;;  %v1202_v26 = vpop.permute.xlu1 %1201 }
 0x9d9   :  { %v1239_v25 = vmul.f32 %v5722_v23, %v1237_v24  ;;  %v1204_v27 = vmul.f32 %v5720_v20, %v1202_v26 }
 0x9db   :  { %1241 = vrot.lane.b32.xlu0 %v1239_v25, %s5949_s27 }
 0x9dc   :  { %v6492_v28 = vpop.permute.xlu0 %1231 }
 0x9dd   :  { %v1234_v31 = vmul.f32 %v5722_v23, %v6492_v28 }
 0xa49   :  { %v1212_v29 = vpop.permute.xlu1 %1211 }
 0xa4a   :  { %v1214_v30 = vadd.f32 %v1212_v29, %v1204_v27 }
 0xa4c   :  { %5723 = vtanh.f32 %v1214_v30  ;;  %v1260_v50 = vrot.slane %v1214_v30, 2 }
 0xa4d   :  { %v1242_v32 = vpop.permute.xlu0 %1241 }
 0xa4e   :  { %v6495_v33 = vadd.f32 %v1242_v32, %v1234_v31 }
 0xa50   :  { %5725 = vtanh.f32 %v6495_v33 }
 0xa56   :  { %v5724_v34 = vpop.eup %5723 }
 0xa57   :  { %1217 = vrot.lane.b32.xlu1 %v5724_v34, %s5949_s27 }
 0xa5a   :  { %v5726_v35 = vpop.eup %5725 }
 0xa5b   :  { %1247 = vrot.lane.b32.xlu0 %v5726_v35, %s5949_s27  ;;  %1267 = vrot.lane.b32.xlu1 %v1118_v60, %s5950_s29 }
 0xac9   :  { %v1218_v37 = vpop.permute.xlu1 %1217 }
 0xaca   :  { %v1220_v38 = vmul.f32 %v5720_v20, %v1218_v37 }
 0xacc   :  { %v1252_v39 = vrot.slane %v1220_v38, 2 }
 0xacd   :  { %v1248_v41 = vpop.permute.xlu0 %1247  ;;  %v1268_v47 = vpop.permute.xlu1 %1267 }
 0xace   :  { %v6503_v42 = vmul.f32 %v5722_v23, %v1248_v41  ;;  %1253 = vrot.lane.b32.xlu0 %v1252_v39, %s5950_s29  ;;  %v1271_v23 = vsel %vm515_vm4, %v6495_v33, %v6492_v28 }
 0xad0   :  { %v6509_v56 = vsel %vm515_vm4, %v6503_v42, %v1268_v47 }
 0xad1   :  { %1359 = vrot.lane.b32.xlu1 %v6509_v56, %s5950_s29  ;;  %v1498_v28 = vrot.slane %v6509_v56, 2  ;;  %v1509_v56 = vrot.slane %v1271_v23, 2 }
 0xad2   :  { %1261 = vrot.lane.b32.xlu0 %v1260_v50, %s5951_s0 }
 0xb40   :  { %v1254_v58 = vpop.permute.xlu0 %1253 }
 0xb41   :  { %v6517_v46 = vsel %vm508_vm3, %v1254_v58, %v1256_v57  ;;  %v1272_v60 = vsel %vm508_vm3, %v1254_v58, 0.0 }
 0xb42   :  { %v1285_v54 = vrot.slane %v6517_v46, 6  ;;  %1275 = vst.msk [vmem:[#allocation4] sm:$0xc0] %vm1274_vm9, %v1272_v60 }
 0xb43   :  { %v1360_v61 = vpop.permute.xlu1 %1359 }
 0xb44   :  { %5025 = vmatmul.mubr.msk.f32.vlgmr.msra.gmra.mrb[12].mxu0 %vm310_vm6, %v1285_v54  ;;  %5036 = vmatmul.mubr.msk.f32.vlgmr.msra.gmra.mrb[12].mxu1 %vm310_vm6, %v1360_v61  ;;  %v1262_v7 = vpop.permute.xlu0 %1261  ;;  %v1527_v61 = vld [vmem:[#allocation3 + $0x4] sm:$0x3] }
 0xb45   :  { %5480 = vmatpush3.bf16.msra.mxu1 %v6252_v36  ;;  %5474 = vmatpush3.bf16.msra.mxu0 %v6270_v43  ;;  %v1266_v12 = vsel %vm508_vm3, %v1262_v7, %v1264_v8 }
 0xb46   :  { %5481 = vmatprep.subr.bf16.mxu1 %v5945_v40  ;;  %5475 = vmatprep.subr.bf16.mxu0 %v5945_v40  ;;  %v1442_v4 = vrot.slane %v1266_v12, 6 }
 0xb47   :  { %5057 = vmatprep.mubr.msk.f32.mxu1 %vm5946_vm0, %v5947_v49  ;;  %5046 = vmatprep.mubr.msk.f32.mxu0 %vm5946_vm0, %v5947_v49 }
 0xb49   :  { %5483 = vmatpush3.bf16.msra.mxu1 %v6276_v45  ;;  %5477 = vmatpush3.bf16.msra.mxu0 %v6287_v48 }
 0xb4a   :  { %5484 = vmatprep.subr.bf16.mxu0 %v5945_v40  ;;  %5490 = vmatprep.subr.bf16.mxu1 %v5945_v40 }
 0xc17   :  { %v1354_v62 = vpop.f32.mrb[12].mxu0  ;;  %v1429_v0 = vpop.f32.mrb[12].mxu1 }
 0xc18   :  { %v1433_v1 = vadd.f32 %v1354_v62, %v1282_v51  ;;  %v1463_v2 = vadd.f32 %v1429_v0, %v1283_v63  ;;  %v5026_v3 = vpop.f32.mrb[13].mxu0  ;;  %v5037_v6 = vpop.f32.mrb[13].mxu1  ;;  %v1526_v63 = vld [vmem:[#allocation2 + $0xa] sm:$0x3] }
 0xc1a   :  { %5727 = vtanh.f32 %v1433_v1  ;;  %v4605_v14 = vmul.f32 -1.442695, %v1463_v2  ;;  %v4604_v5 = vmul.f32 -1.442695, %v1433_v1 }
 0xc1b   :  { %5729 = vtanh.f32 %v1463_v2 }
 0xc1c   :  { %5731 = vpow2.f32 %v4605_v14 }
 0xc1d   :  { %5733 = vpow2.f32 %v4604_v5 }
 0xc24   :  { %v5728_v11 = vpop.eup %5727 }
 0xc25   :  { %v5730_v13 = vpop.eup %5729  ;;  %1448 = vrot.lane.b32.xlu0 %v5728_v11, %s5949_s27 }
 0xc26   :  { %1473 = vrot.lane.b32.xlu1 %v5730_v13, %s5949_s27  ;;  %v5732_v15 = vpop.eup %5731 }
 0xc27   :  { %v1467_v16 = vadd.f32 1.0, %v5732_v15  ;;  %v5734_v17 = vpop.eup %5733 }
 0xc28   :  { %v1437_v9 = vadd.f32 1.0, %v5734_v17 }
 0xc29   :  { %1443 = vrot.lane.b32.xlu0 %v1442_v4, %s5949_s27  ;;  %5735 = vrcp.f32 %v1467_v16 }
 0xc2a   :  { %5737 = vrcp.f32 %v1437_v9 }
 0xc33   :  { %v5736_v18 = vpop.eup %5735 }
 0xc34   :  { %v5738_v21 = vpop.eup %5737  ;;  %v1471_v24 = vmul.f32 %v5736_v18, %v1271_v23 }
 0xc97   :  { %v1449_v20 = vpop.permute.xlu0 %1448 }
 0xc98   :  { %v1474_v10 = vpop.permute.xlu1 %1473  ;;  %v1451_v22 = vmul.f32 %v5738_v21, %v1449_v20 }
 0xc99   :  { %v1476_v19 = vmul.f32 %v5736_v18, %v1474_v10 }
 0xc9b   :  { %1478 = vrot.lane.b32.xlu1 %v1476_v19, %s5949_s27  ;;  %v6551_v25 = vpop.permute.xlu0 %1443 }
 0xc9c   :  { %v1446_v29 = vmul.f32 %v5738_v21, %v6551_v25 }
 0xc9f   :  { %1453 = vrot.lane.b32.xlu1 %v1451_v22, %s5949_s27 }
 0xd0d   :  { %v1479_v26 = vpop.permute.xlu1 %1478 }
 0xd0e   :  { %v1481_v27 = vadd.f32 %v1479_v26, %v1471_v24 }
 0xd10   :  { %5739 = vtanh.f32 %v1481_v27  ;;  %v1504_v33 = vrot.slane %v1481_v27, 2 }
 0xd11   :  { %v1454_v30 = vpop.permute.xlu1 %1453 }
 0xd12   :  { %v6554_v31 = vadd.f32 %v1454_v30, %v1446_v29 }
 0xd14   :  { %5741 = vtanh.f32 %v6554_v31  ;;  %v1492_v24 = vsel %vm515_vm4, %v6554_v31, %v6551_v25 }
 0xd1a   :  { %v5740_v32 = vpop.eup %5739 }
 0xd1b   :  { %1484 = vrot.lane.b32.xlu0 %v5740_v32, %s5949_s27 }
 0xd1e   :  { %v5742_v34 = vpop.eup %5741 }
 0xd1f   :  { %1488 = vrot.lane.b32.xlu0 %v1285_v54, %s5950_s29  ;;  %1459 = vrot.lane.b32.xlu1 %v5742_v34, %s5949_s27 }
 0xd23   :  { %1499 = vrot.lane.b32.xlu0 %v1498_v28, %s5950_s29 }
 0xd27   :  { %1505 = vrot.lane.b32.xlu0 %v1504_v33, %s5951_s0 }
 0xd8d   :  { %v1485_v35 = vpop.permute.xlu0 %1484 }
 0xd8e   :  { %v1487_v37 = vmul.f32 %v5736_v18, %v1485_v35 }
 0xd90   :  { %v1494_v38 = vrot.slane %v1487_v37, 2 }
 0xd91   :  { %v1460_v39 = vpop.permute.xlu1 %1459  ;;  %v1489_v47 = vpop.permute.xlu0 %1488 }
 0xd92   :  { %v6565_v41 = vmul.f32 %v5738_v21, %v1460_v39  ;;  %1495 = vrot.lane.b32.xlu1 %v1494_v38, %s5950_s29 }
 0xd94   :  { %v6571_v50 = vsel %vm515_vm4, %v6565_v41, %v1489_v47 }
 0xd95   :  { %v1500_v57 = vpop.permute.xlu0 %1499  ;;  %v1737_v33 = vrot.slane %v6571_v50, 6 }
 0xd96   :  { %1529 = vrot.lane.b32.xlu1 %v6571_v50, %s5950_s29 }
 0xd99   :  { %v1506_v8 = vpop.permute.xlu0 %1505 }
 0xd9a   :  { %1510 = vrot.lane.b32.xlu1 %v1509_v56, %s5951_s0 }
 0xe04   :  { %v6576_v58 = vpop.permute.xlu1 %1495 }
 0xe05   :  { %v6581_v46 = vsel %vm508_vm3, %v6576_v58, %v1500_v57  ;;  %v1748_v57 = vrot.slane %v1492_v24, 6 }
 0xe06   :  { %v1604_v60 = vrot.slane %v6581_v46, 6 }
 0xe08   :  { %5058 = vmatmul.mubr.msk.f32.vlgmr.msra.gmra.mrb[14].mxu1 %vm310_vm6, %v1604_v60  ;;  %v1530_v54 = vpop.permute.xlu1 %1529 }
 0xe09   :  { %5047 = vmatmul.mubr.msk.f32.vlgmr.msra.gmra.mrb[14].mxu0 %vm310_vm6, %v1530_v54  ;;  %5492 = vmatpush3.bf16.msra.mxu1 %v6252_v36 }
 0xe0a   :  { %5486 = vmatpush3.bf16.msra.mxu0 %v6270_v43  ;;  %5068 = vmatprep.mubr.msk.f32.mxu0 %vm5946_vm0, %v5947_v49 }
 0xe0b   :  { %5487 = vmatprep.subr.bf16.mxu0 %v5945_v40  ;;  %5493 = vmatprep.subr.bf16.mxu1 %v5945_v40 }
 0xe0c   :  { %5079 = vmatprep.mubr.msk.f32.mxu1 %vm5946_vm0, %v5947_v49  ;;  %v1511_v6 = vpop.permute.xlu1 %1510 }
 0xe0d   :  { %5495 = vmatpush3.bf16.msra.mxu1 %v6276_v45  ;;  %v6600_v12 = vsel %vm508_vm3, %v1506_v8, %v1511_v6 }
 0xe0e   :  { %5489 = vmatpush3.bf16.msra.mxu0 %v6287_v48  ;;  %5502 = vmatprep.subr.bf16.mxu1 %v5945_v40  ;;  %v1711_v13 = vrot.slane %v6600_v12, 6 }
 0xe0f   :  { %5496 = vmatprep.subr.bf16.mxu0 %v5945_v40 }
 0xedb   :  { %v1673_v51 = vpop.f32.mrb[14].mxu1 }
 0xedc   :  { %v1702_v62 = vadd.f32 %v1673_v51, %v1527_v61  ;;  %v1599_v0 = vpop.f32.mrb[14].mxu0  ;;  %v5059_v1 = vpop.f32.mrb[15].mxu1  ;;  %v1758_v51 = vrot.slane %v6581_v46, 2 }
 0xedd   :  { %v1677_v2 = vadd.f32 %v1599_v0, %v1526_v63  ;;  %v5048_v3 = vpop.f32.mrb[15].mxu0 }
 0xede   :  { %5743 = vtanh.f32 %v1702_v62  ;;  %v4609_v4 = vmul.f32 -1.442695, %v1702_v62  ;;  %v1778_v3 = vld [vmem:[#allocation3 + $0x2] sm:$0x3] }
 0xedf   :  { %5745 = vtanh.f32 %v1677_v2  ;;  %v4608_v14 = vmul.f32 -1.442695, %v1677_v2 }
 0xee0   :  { %5747 = vpow2.f32 %v4609_v4 }
 0xee1   :  { %5749 = vpow2.f32 %v4608_v14 }
 0xee8   :  { %v5744_v7 = vpop.eup %5743 }
 0xee9   :  { %v5746_v11 = vpop.eup %5745  ;;  %1717 = vrot.lane.b32.xlu1 %v5744_v7, %s5949_s27 }
 0xeea   :  { %1687 = vrot.lane.b32.xlu0 %v5746_v11, %s5949_s27  ;;  %v5748_v5 = vpop.eup %5747 }
 0xeeb   :  { %v5750_v15 = vpop.eup %5749  ;;  %v1706_v16 = vadd.f32 1.0, %v5748_v5 }
 0xeec   :  { %v1681_v17 = vadd.f32 1.0, %v5750_v15 }
 0xeed   :  { %5751 = vrcp.f32 %v1706_v16 }
 0xeee   :  { %1712 = vrot.lane.b32.xlu0 %v1711_v13, %s5949_s27  ;;  %5753 = vrcp.f32 %v1681_v17 }
 0xef7   :  { %v5752_v9 = vpop.eup %5751 }
 0xef8   :  { %v5754_v10 = vpop.eup %5753 }
 0xef9   :  { %v1685_v27 = vmul.f32 %v5754_v10, %v1492_v24 }
 0xf5b   :  { %v1718_v18 = vpop.permute.xlu1 %1717 }
 0xf5c   :  { %v1720_v19 = vmul.f32 %v5752_v9, %v1718_v18  ;;  %v1688_v20 = vpop.permute.xlu0 %1687 }
 0xf5d   :  { %v1690_v21 = vmul.f32 %v5754_v10, %v1688_v20 }
 0xf5e   :  { %1722 = vrot.lane.b32.xlu0 %v1720_v19, %s5949_s27 }
 0xf5f   :  { %1692 = vrot.lane.b32.xlu1 %v1690_v21, %s5949_s27 }
 0xf60   :  { %v1713_v22 = vpop.permute.xlu0 %1712 }
 0xf61   :  { %v1715_v23 = vmul.f32 %v5752_v9, %v1713_v22 }
 0xfd0   :  { %v1723_v26 = vpop.permute.xlu0 %1722 }
 0xfd1   :  { %v1725_v29 = vadd.f32 %v1723_v26, %v1715_v23  ;;  %v1693_v30 = vpop.permute.xlu1 %1692 }
 0xfd2   :  { %v1695_v32 = vadd.f32 %v1693_v30, %v1685_v27 }
 0xfd3   :  { %5755 = vtanh.f32 %v1725_v29  ;;  %v1762_v25 = vrot.slane %v1725_v29, 4 }
 0xfd4   :  { %5757 = vtanh.f32 %v1695_v32  ;;  %v1743_v35 = vrot.slane %v1695_v32, 6 }
 0xfdd   :  { %v5756_v34 = vpop.eup %5755 }
 0xfde   :  { %v5758_v28 = vpop.eup %5757  ;;  %1728 = vrot.lane.b32.xlu0 %v5756_v34, %s5949_s27 }
 0xfdf   :  { %1698 = vrot.lane.b32.xlu1 %v5758_v28, %s5949_s27 }
 0xfe2   :  { %1738 = vrot.lane.b32.xlu0 %v1737_v33, %s5950_s29 }
 0xfe6   :  { %1744 = vrot.lane.b32.xlu0 %v1743_v35, %s5951_s0 }
 0xfea   :  { %1763 = vrot.lane.b32.xlu0 %v1762_v25, %s5951_s0 }
0x1050   :  { %v1729_v31 = vpop.permute.xlu0 %1728 }
0x1051   :  { %v1699_v37 = vpop.permute.xlu1 %1698  ;;  %v1731_v39 = vmul.f32 %v5752_v9, %v1729_v31 }
0x1052   :  { %v1701_v38 = vmul.f32 %v5754_v10, %v1699_v37 }
0x1053   :  { %v1754_v56 = vrot.slane %v1731_v39, 4 }
0x1054   :  { %v1733_v47 = vrot.slane %v1701_v38, 6  ;;  %v1739_v50 = vpop.permute.xlu0 %1738 }
0x1056   :  { %1734 = vrot.lane.b32.xlu1 %v1733_v47, %s5950_s29 }
0x105a   :  { %1755 = vrot.lane.b32.xlu1 %v1754_v56, %s5950_s29 }
0x105e   :  { %1749 = vrot.lane.b32.xlu1 %v1748_v57, %s5951_s0 }
0x10c8   :  { %v6621_v60 = vpop.permute.xlu1 %1734 }
0x10c9   :  { %v6626_v54 = vsel %vm515_vm4, %v6621_v60, %v1739_v50 }
0x10ca   :  { %v1780_v61 = vrot.slane %v6626_v54, 2 }
0x10cc   :  { %5069 = vmatmul.mubr.msk.f32.vlgmr.msra.gmra.mrb[16].mxu0 %vm310_vm6, %v1780_v61  ;;  %v6631_v62 = vpop.permute.xlu1 %1755 }
0x10cd   :  { %v6636_v63 = vsel %vm508_vm3, %v6631_v62, %v1758_v51  ;;  %5498 = vmatpush3.bf16.msra.mxu0 %v6270_v43  ;;  %5090 = vmatprep.mubr.msk.f32.mxu0 %vm5946_vm0, %v5947_v49  ;;  %v1777_v43 = vld [vmem:[#allocation2 + $0xc] sm:$0x3]  ;;  %v1992_v51 = vrot.slane %v6626_v54, 6  ;;  %v2027_v54 = vld [vmem:[#allocation2 + $0xe] sm:$0x3] }
0x10ce   :  { %v1854_v0 = vrot.slane %v6636_v63, 4  ;;  %5499 = vmatprep.subr.bf16.mxu0 %v5945_v40 }
0x10d0   :  { %5080 = vmatmul.mubr.msk.f32.vlgmr.msra.gmra.mrb[16].mxu1 %vm310_vm6, %v1854_v0  ;;  %v1750_v11 = vpop.permute.xlu1 %1749 }
0x10d1   :  { %5501 = vmatpush3.bf16.msra.mxu0 %v6287_v48  ;;  %5504 = vmatpush3.bf16.msra.mxu1 %v6252_v36  ;;  %v1745_v48 = vpop.permute.xlu0 %1744 }
0x10d2   :  { %5505 = vmatprep.subr.bf16.mxu1 %v5945_v40  ;;  %5101 = vmatprep.mubr.msk.f32.mxu1 %vm5946_vm0, %v5947_v49  ;;  %v6652_v13 = vsel %vm515_vm4, %v1745_v48, %v1750_v11  ;;  %v2028_v11 = vld [vmem:[#allocation3] sm:$0x3] }
0x10d3   :  { %v1936_v14 = vrot.slane %v6652_v13, 2 }
0x10d5   :  { %5507 = vmatpush3.bf16.msra.mxu1 %v6276_v45  ;;  %v1764_v4 = vpop.permute.xlu0 %1763  ;;  %v1766_v45 = vrot.slane %v6600_v12, 2 }
0x10d7   :  { %v6659_v15 = vsel %vm508_vm3, %v1764_v4, %v1766_v45 }
0x10d8   :  { %v1966_v16 = vrot.slane %v6659_v15, 4 }
0x119f   :  { %v1849_v46 = vpop.f32.mrb[16].mxu0 }
0x11a0   :  { %v1927_v1 = vadd.f32 %v1849_v46, %v1777_v43  ;;  %v5070_v2 = vpop.f32.mrb[17].mxu0 }
0x11a2   :  { %5759 = vtanh.f32 %v1927_v1  ;;  %v4612_v17 = vmul.f32 -1.442695, %v1927_v1  ;;  %v2008_v1 = vrot.slane %v6636_v63, 2 }
0x11a3   :  { %v1923_v6 = vpop.f32.mrb[16].mxu1 }
0x11a4   :  { %v1957_v7 = vadd.f32 %v1923_v6, %v1778_v3  ;;  %v5081_v8 = vpop.f32.mrb[17].mxu1 }
0x11a6   :  { %5761 = vtanh.f32 %v1957_v7  ;;  %v4613_v9 = vmul.f32 -1.442695, %v1957_v7 }
0x11a7   :  { %5763 = vpow2.f32 %v4612_v17 }
0x11a8   :  { %5765 = vpow2.f32 %v4613_v9  ;;  %v2016_v9 = vrot.slane %v6659_v15, 2 }
0x11ac   :  { %v5760_v36 = vpop.eup %5759 }
0x11ad   :  { %1942 = vrot.lane.b32.xlu1 %v5760_v36, %s5949_s27 }
0x11b0   :  { %v5762_v5 = vpop.eup %5761 }
0x11b1   :  { %1972 = vrot.lane.b32.xlu0 %v5762_v5, %s5949_s27  ;;  %1937 = vrot.lane.b32.xlu1 %v1936_v14, %s5949_s27  ;;  %v5764_v12 = vpop.eup %5763  ;;  %v2000_v14 = vrot.slane %v6652_v13, 6 }
0x11b2   :  { %v1931_v18 = vadd.f32 1.0, %v5764_v12  ;;  %v5766_v10 = vpop.eup %5765 }
0x11b3   :  { %v1961_v19 = vadd.f32 1.0, %v5766_v10 }
0x11b4   :  { %5767 = vrcp.f32 %v1931_v18 }
0x11b5   :  { %1967 = vrot.lane.b32.xlu0 %v1966_v16, %s5949_s27  ;;  %5769 = vrcp.f32 %v1961_v19 }
0x11be   :  { %v5768_v20 = vpop.eup %5767 }
0x11bf   :  { %v5770_v23 = vpop.eup %5769 }
0x121f   :  { %v1943_v21 = vpop.permute.xlu1 %1942 }
0x1220   :  { %v1945_v22 = vmul.f32 %v5768_v20, %v1943_v21 }
0x1222   :  { %1947 = vrot.lane.b32.xlu1 %v1945_v22, %s5949_s27 }
0x1223   :  { %v1973_v24 = vpop.permute.xlu0 %1972  ;;  %v1938_v27 = vpop.permute.xlu1 %1937 }
0x1224   :  { %v1975_v26 = vmul.f32 %v5770_v23, %v1973_v24  ;;  %v1940_v29 = vmul.f32 %v5768_v20, %v1938_v27 }
0x1226   :  { %1977 = vrot.lane.b32.xlu0 %v1975_v26, %s5949_s27 }
0x1227   :  { %v1968_v30 = vpop.permute.xlu0 %1967 }
0x1228   :  { %v1970_v28 = vmul.f32 %v5770_v23, %v1968_v30 }
0x1294   :  { %v1948_v32 = vpop.permute.xlu1 %1947 }
0x1295   :  { %v1950_v34 = vadd.f32 %v1948_v32, %v1940_v29 }
0x1297   :  { %5771 = vtanh.f32 %v1950_v34  ;;  %v1996_v57 = vrot.slane %v1950_v34, 4 }
0x1298   :  { %v1978_v33 = vpop.permute.xlu0 %1977 }
0x1299   :  { %v1980_v35 = vadd.f32 %v1978_v33, %v1970_v28 }
0x129b   :  { %5773 = vtanh.f32 %v1980_v35  ;;  %v2012_v61 = vrot.slane %v1980_v35, 6 }
0x12a1   :  { %v5772_v25 = vpop.eup %5771 }
0x12a2   :  { %1953 = vrot.lane.b32.xlu1 %v5772_v25, %s5949_s27 }
0x12a5   :  { %v5774_v31 = vpop.eup %5773 }
0x12a6   :  { %1983 = vrot.lane.b32.xlu0 %v5774_v31, %s5949_s27 }
0x1314   :  { %v1954_v37 = vpop.permute.xlu1 %1953 }
0x1315   :  { %v1956_v38 = vmul.f32 %v5768_v20, %v1954_v37 }
0x1317   :  { %v1988_v39 = vrot.slane %v1956_v38, 4 }
0x1318   :  { %v1984_v47 = vpop.permute.xlu0 %1983 }
0x1319   :  { %v1986_v56 = vmul.f32 %v5770_v23, %v1984_v47  ;;  %1989 = vrot.lane.b32.xlu1 %v1988_v39, %s5950_s29 }
0x131b   :  { %v2004_v50 = vrot.slane %v1986_v56, 6  ;;  %v2252_v56 = vld [vmem:[%s7372_s8] sm:$0xff] }
0x131d   :  { %2005 = vrot.lane.b32.xlu0 %v2004_v50, %s5950_s29  ;;  %1997 = vrot.lane.b32.xlu1 %v1996_v57, %s5951_s0  ;;  %v2253_v57 = vld [vmem:[%s7372_s8 + $0x8] sm:$0xff]  ;;  %v2351_v50 = vld [vmem:[%s7375_s11] sm:$0xff] }
0x1321   :  { %2013 = vrot.lane.b32.xlu0 %v2012_v61, %s5951_s0  ;;  %v5508_v61 = vpack.c.bf16 %v2253_v57, %v2252_v56  ;;  %v2450_v56 = vld [vmem:[%s7377_s13 + $0x18] sm:$0xff] }
0x1323   :  { %5509 = vmatprep.subr.bf16.mxu0 %v5508_v61 }
0x138b   :  { %v6674_v0 = vpop.permute.xlu1 %1989 }
0x138c   :  { %v1994_v43 = vsel %vm515_vm4, %v6674_v0, %v1992_v51  ;;  %v2352_v51 = vld [vmem:[%s7375_s11 + $0x8] sm:$0xff] }
0x138d   :  { %v2030_v46 = vrot.slane %v1994_v43, 4  ;;  %v5524_v43 = vpack.c.bf16 %v2352_v51, %v2351_v50  ;;  %v4618_v51 = vld [vmem:[%s7373_s9] ss:$0 sm:$0xff] }
0x138f   :  { %v6680_v2 = vpop.permute.xlu0 %2005  ;;  %5091 = vmatmul.mubr.msk.f32.vlgmr.msra.gmra.mrb[18].mxu0 %vm310_vm6, %v2030_v46  ;;  %v1998_v45 = vpop.permute.xlu1 %1997  ;;  %v780_v46 = vsel %vm515_vm4, %v6399_v52, 0.0  ;;  %5525 = vmatprep.subr.bf16.mxu1 %v5524_v43  ;;  %v1770_v52 = vsel %vm508_vm3, %v6631_v62, 0.0  ;;  %v2353_v62 = vld [vmem:[%s7375_s11 + $0x10] sm:$0xff] }
0x1390   :  { %v2010_v3 = vsel %vm508_vm3, %v6680_v2, %v2008_v1  ;;  %v2002_v16 = vsel %vm515_vm4, %v1998_v45, %v2000_v14  ;;  %v1032_v1 = vsel %vm515_vm4, %v6453_v59, 0.0  ;;  %5511 = vmatpush3.bf16.msra.mxu0 %v5508_v61  ;;  %v2020_v59 = vsel %vm508_vm3, %v6680_v2, 0.0  ;;  %v2354_v2 = vld [vmem:[%s7375_s11 + $0x18] sm:$0xff]  ;;  %v2357_v14 = vld [vmem:[%s7375_s11 + $0x30] sm:$0xff] }
0x1391   :  { %v2104_v6 = vrot.slane %v2010_v3, 2  ;;  %v2186_v12 = vrot.slane %v2002_v16, 4  ;;  %v1515_v3 = vsel %vm508_vm3, %v6576_v58, 0.0  ;;  %v2255_v58 = vld [vmem:[%s7372_s8 + $0x18] sm:$0xff] }
0x1392   :  { %v2259_v45 = vld [vmem:[%s7372_s8 + $0x38] sm:$0xff] }
0x1393   :  { %5102 = vmatmul.mubr.msk.f32.vlgmr.msra.gmra.mrb[18].mxu1 %vm310_vm6, %v2104_v6  ;;  %v2014_v17 = vpop.permute.xlu0 %2013  ;;  %v2358_v16 = vld [vmem:[%s7375_s11 + $0x38] sm:$0xff] }
0x1394   :  { %v2018_v10 = vsel %vm508_vm3, %v2014_v17, %v2016_v9  ;;  %5527 = vmatpush3.bf16.msra.mxu1 %v5524_v43  ;;  %v5536_v17 = vpack.c.bf16 %v2358_v16, %v2357_v14  ;;  %v4621_v43 = vld [vmem:[%s7376_s12] ss:$0 sm:$0xff] }
0x1395   :  { %v2216_v19 = vrot.slane %v2018_v10, 2 }
0x1462   :  { %v2099_v7 = vpop.f32.mrb[18].mxu0 }
0x1463   :  { %v2177_v8 = vadd.f32 %v2099_v7, %v2027_v54  ;;  %v5092_v48 = vpop.f32.mrb[19].mxu0  ;;  %v5528_v54 = vpack.c.bf16 %v2354_v2, %v2353_v62  ;;  %v2256_v7 = vld [vmem:[%s7372_s8 + $0x20] sm:$0xff] }
0x1464   :  { %v2355_v48 = vld [vmem:[%s7375_s11 + $0x20] sm:$0xff] }
0x1465   :  { %5775 = vtanh.f32 %v2177_v8  ;;  %v4616_v13 = vmul.f32 -1.442695, %v2177_v8  ;;  %5529 = vmatprep.subr.bf16.mxu1 %v5528_v54  ;;  %v2257_v8 = vld [vmem:[%s7372_s8 + $0x28] sm:$0xff] }
0x1466   :  { %v2173_v36 = vpop.f32.mrb[18].mxu1  ;;  %5531 = vmatpush3.bf16.msra.mxu1 %v5528_v54 }
0x1467   :  { %v2207_v4 = vadd.f32 %v2173_v36, %v2028_v11  ;;  %v5103_v63 = vpop.f32.mrb[19].mxu1  ;;  %v5516_v11 = vpack.c.bf16 %v2257_v8, %v2256_v7  ;;  %v2356_v36 = vld [vmem:[%s7375_s11 + $0x28] sm:$0xff] }
0x1468   :  { %v2258_v63 = vld [vmem:[%s7372_s8 + $0x30] sm:$0xff] }
0x1469   :  { %5777 = vtanh.f32 %v2207_v4  ;;  %v4617_v20 = vmul.f32 -1.442695, %v2207_v4  ;;  %v5532_v4 = vpack.c.bf16 %v2356_v36, %v2355_v48 }
0x146a   :  { %5779 = vpow2.f32 %v4616_v13 }
0x146b   :  { %5781 = vpow2.f32 %v4617_v20  ;;  %5533 = vmatprep.subr.bf16.mxu1 %v5532_v4 }
0x146c   :  { %5535 = vmatpush3.bf16.msra.mxu1 %v5532_v4 }
0x146d   :  { %5537 = vmatprep.subr.bf16.mxu1 %v5536_v17 }
0x146f   :  { %v5776_v5 = vpop.eup %5775 }
0x1470   :  { %2192 = vrot.lane.b32.xlu1 %v5776_v5, %s5949_s27  ;;  %v5520_v5 = vpack.c.bf16 %v2259_v45, %v2258_v63  ;;  %5539 = vmatpush3.bf16.msra.mxu1 %v5536_v17 }
0x1471   :  { %5546 = vmatprep.subr.bf16.mxu1 %v5945_v40 }
0x1473   :  { %v5778_v18 = vpop.eup %5777 }
0x1474   :  { %2222 = vrot.lane.b32.xlu0 %v5778_v18, %s5949_s27  ;;  %2187 = vrot.lane.b32.xlu1 %v2186_v12, %s5949_s27  ;;  %v5780_v21 = vpop.eup %5779 }
0x1475   :  { %v2181_v22 = vadd.f32 1.0, %v5780_v21  ;;  %v5782_v23 = vpop.eup %5781 }
0x1476   :  { %v2211_v15 = vadd.f32 1.0, %v5782_v23  ;;  %v1514_v23 = vsel %vm515_vm4, %v6565_v41, 0.0 }
0x1477   :  { %5783 = vrcp.f32 %v2181_v22 }
0x1478   :  { %2217 = vrot.lane.b32.xlu0 %v2216_v19, %s5949_s27  ;;  %5785 = vrcp.f32 %v2211_v15  ;;  %v1769_v15 = vsel %vm515_vm4, %v6621_v60, 0.0 }
0x1481   :  { %v6697_v24 = vpop.eup %5783 }
0x1482   :  { %v6701_v29 = vpop.eup %5785 }
0x14e2   :  { %v2193_v26 = vpop.permute.xlu1 %2192 }
0x14e3   :  { %v2195_v27 = vmul.f32 %v6697_v24, %v2193_v26 }
0x14e5   :  { %2197 = vrot.lane.b32.xlu1 %v2195_v27, %s5949_s27 }
0x14e6   :  { %v2223_v30 = vpop.permute.xlu0 %2222  ;;  %v2188_v34 = vpop.permute.xlu1 %2187 }
0x14e7   :  { %v2225_v32 = vmul.f32 %v6701_v29, %v2223_v30  ;;  %v2190_v28 = vmul.f32 %v6697_v24, %v2188_v34  ;;  %v2443_v34 = vld [vmem:[%s7374_s10] sm:$0xff] }
0x14e9   :  { %2227 = vrot.lane.b32.xlu0 %v2225_v32, %s5949_s27 }
0x14ea   :  { %v2218_v33 = vpop.permute.xlu0 %2217 }
0x14eb   :  { %v2220_v31 = vmul.f32 %v6701_v29, %v2218_v33  ;;  %v2447_v33 = vld [vmem:[%s7377_s13] sm:$0xff] }
0x1557   :  { %v2198_v35 = vpop.permute.xlu1 %2197 }
0x1558   :  { %v2200_v25 = vadd.f32 %v2198_v35, %v2190_v28  ;;  %v2444_v28 = vld [vmem:[%s7374_s10 + $0x8] sm:$0xff] }
0x1559   :  { %v2448_v35 = vld [vmem:[%s7377_s13 + $0x8] sm:$0xff] }
0x155a   :  { %5787 = vtanh.f32 %v2200_v25  ;;  %v6825_v25 = vpack.c.bf16 %v2444_v28, %v2443_v34 }
0x155b   :  { %v2228_v37 = vpop.permute.xlu0 %2227 }
0x155c   :  { %v2230_v38 = vadd.f32 %v2228_v37, %v2220_v31  ;;  %v6827_v31 = vpack.c.bf16 %v2448_v35, %v2447_v33  ;;  %v2445_v37 = vld [vmem:[%s7374_s10 + $0x10] sm:$0xff] }
0x155e   :  { %5789 = vtanh.f32 %v2230_v38  ;;  %v2446_v38 = vld [vmem:[%s7374_s10 + $0x18] sm:$0xff] }
0x155f   :  { %v6847_v50 = vpack.c.bf16 %v2446_v38, %v2445_v37 }
0x1564   :  { %v5788_v39 = vpop.eup %5787 }
0x1565   :  { %2203 = vrot.lane.b32.xlu1 %v5788_v39, %s5949_s27 }
0x1568   :  { %v5790_v47 = vpop.eup %5789 }
0x1569   :  { %2233 = vrot.lane.b32.xlu0 %v5790_v47, %s5949_s27  ;;  %535 = vrot.lane.b32.xlu1 %v6349_v55, %s5949_s27  ;;  %v1273_v55 = vsel %vm515_vm4, %v6503_v42, 0.0  ;;  %v2254_v42 = vld [vmem:[%s7372_s8 + $0x10] sm:$0xff] }
0x156a   :  { %v5512_v6 = vpack.c.bf16 %v2255_v58, %v2254_v42  ;;  %v2449_v47 = vld [vmem:[%s7377_s13 + $0x10] sm:$0xff] }
0x156b   :  { %v6849_v61 = vpack.c.bf16 %v2450_v56, %v2449_v47 }
0x156c   :  { %5513 = vmatprep.subr.bf16.mxu0 %v5512_v6 }
0x156d   :  { %784 = vrot.lane.b32.xlu0 %v780_v46, %s5949_s27  ;;  %1036 = vrot.lane.b32.xlu1 %v1032_v1, %s5949_s27 }
0x156e   :  { %5515 = vmatpush3.bf16.msra.mxu0 %v5512_v6 }
0x156f   :  { %5517 = vmatprep.subr.bf16.mxu0 %v5516_v11 }
0x1571   :  { %1277 = vrot.lane.b32.xlu0 %v1273_v55, %s5951_s0  ;;  %1522 = vrot.lane.b32.xlu1 %v1515_v3, %s5949_s27 }
0x1572   :  { %5519 = vmatpush3.bf16.msra.mxu0 %v5516_v11 }
0x1573   :  { %5521 = vmatprep.subr.bf16.mxu0 %v5520_v5 }
0x1575   :  { %1773 = vrot.lane.b32.xlu0 %v1770_v52, %s5949_s27  ;;  %2023 = vrot.lane.b32.xlu1 %v2020_v59, %s5949_s27 }
0x1576   :  { %5523 = vmatpush3.bf16.msra.mxu0 %v5520_v5 }
0x1577   :  { %5540 = vmatprep.subr.bf16.mxu0 %v5945_v40 }
0x15d7   :  { %v2204_v9 = vpop.permute.xlu1 %2203 }
0x15d8   :  { %v2206_v12 = vmul.f32 %v6697_v24, %v2204_v9  ;;  %v2019_v24 = vsel %vm515_vm4, %v6674_v0, 0.0 }
0x15da   :  { %v2238_v18 = vrot.slane %v2206_v12, 2 }
0x15db   :  { %v2234_v10 = vpop.permute.xlu0 %2233  ;;  %v536_v19 = vpop.permute.xlu1 %535 }
0x15dc   :  { %v2236_v13 = vmul.f32 %v6701_v29, %v2234_v10  ;;  %539 = vst.msk [vmem:[#allocation4 + $0x8] sm:$0xc0] %vm538_vm10, %v536_v19  ;;  %2239 = vrot.lane.b32.xlu0 %v2238_v18, %s5950_s29 }
0x15de   :  { %v2243_v20 = vsel %vm508_vm3, %v2236_v13, 0.0 }
0x15df   :  { %v785_v21 = vpop.permute.xlu0 %784  ;;  %2246 = vrot.lane.b32.xlu1 %v2243_v20, %s5951_s0  ;;  %v1037_v22 = vpop.permute.xlu1 %1036 }
0x15e0   :  { %788 = vst.msk [vmem:[#allocation4 + $0x8] sm:$0x30] %vm787_vm11, %v785_v21  ;;  %1517 = vrot.lane.b32.xlu0 %v1514_v23, %s5950_s29 }
0x15e1   :  { %1040 = vst.msk [vmem:[#allocation4 + $0x8] sm:$0xc] %vm1039_vm12, %v1037_v22 }
0x15e2   :  { %2021 = vst.msk [vmem:[#allocation4 + $0x8] sm:$0x30] %vm1033_vm8, %v2019_v24 }
0x15e3   :  { %1771 = vst.msk [vmem:[#allocation4 + $0x8] sm:$0xc] %vm781_vm7, %v1769_v15  ;;  %v1278_v41 = vpop.permute.xlu0 %1277  ;;  %v1523_v26 = vpop.permute.xlu1 %1522 }
0x15e4   :  { %1281 = vst.msk [vmem:[#allocation4 + $0x8] sm:$0x3] %vm1280_vm13, %v1278_v41 }
0x15e5   :  { %1525 = vst.msk [vmem:[#allocation4] sm:$0xc0] %vm538_vm10, %v1523_v26 }
0x15e7   :  { %v1774_v60 = vpop.permute.xlu0 %1773  ;;  %v2024_v27 = vpop.permute.xlu1 %2023 }
0x15e8   :  { %1776 = vst.msk [vmem:[#allocation4] sm:$0x30] %vm787_vm11, %v1774_v60 }
0x15e9   :  { %2026 = vst.msk [vmem:[#allocation4] sm:$0xc] %vm1039_vm12, %v2024_v27 }
0x164e   :  { %v2240_v0 = vpop.permute.xlu0 %2239 }
0x164f   :  { %v2242_v29 = vsel %vm515_vm4, %v2240_v0, 0.0 }
0x1650   :  { %2244 = vst.msk [vmem:[#allocation4 + $0x8] sm:$0xc0] %vm1274_vm9, %v2242_v29 }
0x1651   :  { %v2247_v30 = vpop.permute.xlu1 %2246 }
0x1652   :  { %2249 = vst.msk [vmem:[#allocation4] sm:$0x3] %vm1280_vm13, %v2247_v30  ;;  %v1518_v32 = vpop.permute.xlu0 %1517 }
0x1653   :  { %1520 = vst.msk [vmem:[#allocation4 + $0x8] sm:$0x3] %vm532_vm5, %v1518_v32 }
0x1659   :  { %v2250_v39 = vld [vmem:[#allocation4] sm:$0xff] }
0x165a   :  { %5120 = vmatprep.mubr.msk.f32.mxu0 %vm2267_vm14, %v2250_v39  ;;  %5139 = vmatprep.mubr.msk.f32.mxu1 %vm2267_vm14, %v2250_v39  ;;  %v2251_v57 = vld [vmem:[#allocation4 + $0x8] sm:$0xff] }
0x165b   :  { %5121 = vmatmul.mubr.msk.f32.vlgmr.msra.gmra.mrb[20].mxu0 %vm2267_vm14, %v2251_v57  ;;  %5140 = vmatmul.mubr.msk.f32.vlgmr.msra.gmra.mrb[20].mxu1 %vm2267_vm14, %v2251_v57 }
0x165c   :  { %5542 = vmatpush3.bf16.msra.mxu0 %v6825_v25  ;;  %5548 = vmatpush3.bf16.msra.mxu1 %v6827_v31 }
0x165d   :  { %5543 = vmatprep.subr.bf16.mxu0 %v5945_v40  ;;  %5549 = vmatprep.subr.bf16.mxu1 %v5945_v40 }
0x165e   :  { %5150 = vmatprep.mubr.msk.f32.mxu0 %vm5946_vm0, %v5947_v49  ;;  %5161 = vmatprep.mubr.msk.f32.mxu1 %vm5946_vm0, %v5947_v49 }
0x1660   :  { %5545 = vmatpush3.bf16.msra.mxu0 %v6847_v50  ;;  %5551 = vmatpush3.bf16.msra.mxu1 %v6849_v61 }
0x1661   :  { %5552 = vmatprep.subr.bf16.mxu0 %v5945_v40  ;;  %5558 = vmatprep.subr.bf16.mxu1 %v5945_v40 }
0x1663   :  { %5151 = vmatmul.mubr.f32.vlgmr.msra.gmra.mrb[22].mxu0 %v5947_v49  ;;  %5162 = vmatmul.mubr.f32.vlgmr.msra.gmra.mrb[22].mxu1 %v5947_v49 }
0x1664   :  { %5554 = vmatpush3.bf16.msra.mxu0 %v6825_v25  ;;  %5560 = vmatpush3.bf16.msra.mxu1 %v6827_v31 }
0x1665   :  { %5555 = vmatprep.subr.bf16.mxu0 %v5945_v40  ;;  %5561 = vmatprep.subr.bf16.mxu1 %v5945_v40 }
0x1666   :  { %5172 = vmatprep.mubr.msk.f32.mxu0 %vm5946_vm0, %v5947_v49  ;;  %5183 = vmatprep.mubr.msk.f32.mxu1 %vm5946_vm0, %v5947_v49 }
0x1668   :  { %5557 = vmatpush3.bf16.msra.mxu0 %v6847_v50  ;;  %5563 = vmatpush3.bf16.msra.mxu1 %v6849_v61 }
0x1669   :  { %5564 = vmatprep.subr.bf16.mxu0 %v5945_v40  ;;  %5570 = vmatprep.subr.bf16.mxu1 %v5945_v40 }
0x172e   :  { %v5122_v46 = vpop.f32.mrb[20].mxu0  ;;  %v5141_v1 = vpop.f32.mrb[20].mxu1 }
0x172f   :  { %v2346_v55 = vadd.f32 %v5122_v46, %v4618_v51  ;;  %v2438_v3 = vadd.f32 %v5141_v1, %v4621_v43  ;;  %v2340_v52 = vpop.f32.mrb[21].mxu0  ;;  %v2432_v59 = vpop.f32.mrb[21].mxu1 }
0x1730   :  { %v2341_v42 = vadd.f32 %v4618_v51, %v2340_v52  ;;  %v2433_v58 = vadd.f32 %v4621_v43, %v2432_v59 }
0x1731   :  { %2350 = vst [vmem:[#allocation2 + $0x8] sm:$0xff] %v2346_v55  ;;  %2442 = vst [vmem:[#allocation3 + $0x8] sm:$0xff] %v2438_v3 }
0x1732   :  { %2349 = vst [vmem:[#allocation2] sm:$0xff] %v2341_v42  ;;  %2441 = vst [vmem:[#allocation3] sm:$0xff] %v2433_v58 }
0x1736   :  { %v2519_v62 = vpop.f32.mrb[22].mxu0  ;;  %v2589_v6 = vpop.f32.mrb[22].mxu1 }
0x1737   :  { %v5152_v2 = vpop.f32.mrb[23].mxu0  ;;  %v5163_v54 = vpop.f32.mrb[23].mxu1 }
0x1738   :  { %v2452_v7 = vld [vmem:[#allocation3 + $0xe] sm:$0x3]  ;;  %v2660_v57 = vld [vmem:[#allocation3 + $0xc] sm:$0x3] }
0x1739   :  { %v2451_v8 = vld [vmem:[#allocation2] sm:$0x3]  ;;  %v2618_v48 = vadd.f32 %v2589_v6, %v2452_v7  ;;  %v2659_v38 = vld [vmem:[#allocation2 + $0x2] sm:$0x3] }
0x173a   :  { %v2593_v11 = vadd.f32 %v2519_v62, %v2451_v8 }
0x173b   :  { %5791 = vtanh.f32 %v2618_v48  ;;  %v4625_v63 = vmul.f32 -1.442695, %v2618_v48 }
0x173c   :  { %5793 = vtanh.f32 %v2593_v11  ;;  %v4624_v45 = vmul.f32 -1.442695, %v2593_v11 }
0x173d   :  { %5795 = vpow2.f32 %v4625_v63 }
0x173e   :  { %5797 = vpow2.f32 %v4624_v45 }
0x1745   :  { %v5792_v36 = vpop.eup %5791 }
0x1746   :  { %v5794_v4 = vpop.eup %5793  ;;  %2628 = vrot.lane.b32.xlu0 %v5792_v36, %s5949_s27 }
0x1747   :  { %2603 = vrot.lane.b32.xlu1 %v5794_v4, %s5949_s27  ;;  %v5796_v14 = vpop.eup %5795 }
0x1748   :  { %v5798_v5 = vpop.eup %5797  ;;  %v2622_v16 = vadd.f32 1.0, %v5796_v14 }
0x1749   :  { %v2597_v17 = vadd.f32 1.0, %v5798_v5 }
0x174a   :  { %5799 = vrcp.f32 %v2622_v16 }
0x174b   :  { %5801 = vrcp.f32 %v2597_v17 }
0x1754   :  { %v5800_v9 = vpop.eup %5799 }
0x1755   :  { %v5802_v18 = vpop.eup %5801  ;;  %v2626_v20 = vmul.f32 0.0, %v5800_v9 }
0x1756   :  { %v2601_v22 = vmul.f32 0.0, %v5802_v18 }
0x17b8   :  { %v2629_v12 = vpop.permute.xlu0 %2628 }
0x17b9   :  { %v2631_v10 = vmul.f32 %v5800_v9, %v2629_v12  ;;  %v2604_v19 = vpop.permute.xlu1 %2603 }
0x17ba   :  { %v2606_v13 = vmul.f32 %v5802_v18, %v2604_v19 }
0x17bb   :  { %2633 = vrot.lane.b32.xlu0 %v2631_v10, %s5949_s27 }
0x17bc   :  { %2608 = vrot.lane.b32.xlu1 %v2606_v13, %s5949_s27 }
0x182d   :  { %v2634_v21 = vpop.permute.xlu0 %2633 }
0x182e   :  { %v2636_v23 = vadd.f32 %v2634_v21, %v2626_v20  ;;  %v2609_v15 = vpop.permute.xlu1 %2608 }
0x182f   :  { %v6885_v24 = vadd.f32 %v2609_v15, %v2601_v22 }
0x1830   :  { %5803 = vtanh.f32 %v2636_v23  ;;  %v2652_v34 = vrot.slane %v2636_v23, 2 }
0x1831   :  { %5805 = vtanh.f32 %v6885_v24  ;;  %v2644_v63 = vsel %vm508_vm3, %v6885_v24, 0.0 }
0x183a   :  { %v5804_v41 = vpop.eup %5803 }
0x183b   :  { %v5806_v26 = vpop.eup %5805  ;;  %2639 = vrot.lane.b32.xlu0 %v5804_v41, %s5949_s27  ;;  %v2881_v41 = vrot.slane %v2644_v63, 6 }
0x183c   :  { %2614 = vrot.lane.b32.xlu1 %v5806_v26, %s5949_s27 }
0x18ad   :  { %v2640_v60 = vpop.permute.xlu0 %2639 }
0x18ae   :  { %v2642_v27 = vmul.f32 %v5800_v9, %v2640_v60  ;;  %v2615_v0 = vpop.permute.xlu1 %2614 }
0x18af   :  { %v2617_v29 = vmul.f32 %v5802_v18, %v2615_v0 }
0x18b0   :  { %v2646_v30 = vrot.slane %v2642_v27, 2 }
0x18b1   :  { %v6892_v32 = vsel %vm508_vm3, %v2617_v29, 0.0 }
0x18b2   :  { %2647 = vrot.lane.b32.xlu0 %v2646_v30, %s5950_s29  ;;  %2662 = vrot.lane.b32.xlu1 %v6892_v32, %s5950_s29  ;;  %v2870_v19 = vrot.slane %v6892_v32, 6 }
0x18b6   :  { %2653 = vrot.lane.b32.xlu0 %v2652_v34, %s5951_s0 }
0x1924   :  { %v2648_v28 = vpop.permute.xlu0 %2647  ;;  %v2663_v33 = vpop.permute.xlu1 %2662 }
0x1925   :  { %v6900_v35 = vsel %vm515_vm4, %v2648_v28, 0.0  ;;  %5173 = vmatmul.mubr.msk.f32.vlgmr.msra.gmra.mrb[24].mxu0 %vm310_vm6, %v2663_v33 }
0x1926   :  { %v2737_v37 = vrot.slane %v6900_v35, 6  ;;  %5566 = vmatpush3.bf16.msra.mxu0 %v6825_v25  ;;  %5194 = vmatprep.mubr.msk.f32.mxu0 %vm5946_vm0, %v5947_v49  ;;  %v2891_v30 = vrot.slane %v6900_v35, 2 }
0x1927   :  { %5567 = vmatprep.subr.bf16.mxu0 %v5945_v40 }
0x1928   :  { %5184 = vmatmul.mubr.msk.f32.vlgmr.msra.gmra.mrb[24].mxu1 %vm310_vm6, %v2737_v37  ;;  %v2654_v55 = vpop.permute.xlu0 %2653  ;;  %v2914_v37 = vld [vmem:[#allocation2 + $0x4] sm:$0x3] }
0x1929   :  { %5572 = vmatpush3.bf16.msra.mxu1 %v6827_v31  ;;  %5205 = vmatprep.mubr.msk.f32.mxu1 %vm5946_vm0, %v5947_v49  ;;  %v6920_v52 = vsel %vm515_vm4, %v2654_v55, 0.0 }
0x192a   :  { %5569 = vmatpush3.bf16.msra.mxu0 %v6847_v50  ;;  %5573 = vmatprep.subr.bf16.mxu1 %v5945_v40  ;;  %v2844_v59 = vrot.slane %v6920_v52, 6 }
0x192b   :  { %5576 = vmatprep.subr.bf16.mxu0 %v5945_v40 }
0x192d   :  { %5575 = vmatpush3.bf16.msra.mxu1 %v6849_v61 }
0x192e   :  { %5582 = vmatprep.subr.bf16.mxu1 %v5945_v40 }
0x19f8   :  { %v2732_v39 = vpop.f32.mrb[24].mxu0 }
0x19f9   :  { %v2810_v47 = vadd.f32 %v2732_v39, %v2659_v38  ;;  %v5174_v56 = vpop.f32.mrb[25].mxu0 }
0x19fa   :  { %v2915_v56 = vld [vmem:[#allocation3 + $0xa] sm:$0x3] }
0x19fb   :  { %5807 = vtanh.f32 %v2810_v47  ;;  %v2806_v51 = vpop.f32.mrb[24].mxu1  ;;  %v4628_v42 = vmul.f32 -1.442695, %v2810_v47 }
0x19fc   :  { %v2835_v43 = vadd.f32 %v2806_v51, %v2660_v57  ;;  %v5185_v46 = vpop.f32.mrb[25].mxu1 }
0x19fe   :  { %5809 = vtanh.f32 %v2835_v43  ;;  %v4629_v58 = vmul.f32 -1.442695, %v2835_v43 }
0x19ff   :  { %5811 = vpow2.f32 %v4628_v42  ;;  %v2899_v42 = vrot.slane %v6920_v52, 2 }
0x1a00   :  { %5813 = vpow2.f32 %v4629_v58 }
0x1a05   :  { %v5808_v1 = vpop.eup %5807 }
0x1a06   :  { %2820 = vrot.lane.b32.xlu1 %v5808_v1, %s5949_s27 }
0x1a08   :  { %v5810_v3 = vpop.eup %5809 }
0x1a09   :  { %v5812_v62 = vpop.eup %5811 }
0x1a0a   :  { %2850 = vrot.lane.b32.xlu1 %v5810_v3, %s5949_s27  ;;  %v2814_v6 = vadd.f32 1.0, %v5812_v62  ;;  %v5814_v2 = vpop.eup %5813 }
0x1a0b   :  { %v2839_v54 = vadd.f32 1.0, %v5814_v2 }
0x1a0c   :  { %5815 = vrcp.f32 %v2814_v6 }
0x1a0d   :  { %5817 = vrcp.f32 %v2839_v54 }
0x1a0e   :  { %2845 = vrot.lane.b32.xlu1 %v2844_v59, %s5949_s27 }
0x1a16   :  { %v5816_v7 = vpop.eup %5815 }
0x1a17   :  { %v5818_v11 = vpop.eup %5817  ;;  %v2818_v45 = vmul.f32 %v5816_v7, %v2644_v63 }
0x1a78   :  { %v2821_v8 = vpop.permute.xlu1 %2820 }
0x1a79   :  { %v2823_v48 = vmul.f32 %v5816_v7, %v2821_v8 }
0x1a7b   :  { %2825 = vrot.lane.b32.xlu0 %v2823_v48, %s5949_s27 }
0x1a7c   :  { %v2851_v36 = vpop.permute.xlu1 %2850 }
0x1a7d   :  { %v2853_v4 = vmul.f32 %v5818_v11, %v2851_v36 }
0x1a7f   :  { %2855 = vrot.lane.b32.xlu0 %v2853_v4, %s5949_s27 }
0x1a80   :  { %v2846_v14 = vpop.permute.xlu1 %2845 }
0x1a81   :  { %v2848_v17 = vmul.f32 %v5818_v11, %v2846_v14 }
0x1aed   :  { %v2826_v5 = vpop.permute.xlu0 %2825 }
0x1aee   :  { %v2828_v16 = vadd.f32 %v2826_v5, %v2818_v45 }
0x1af0   :  { %5819 = vtanh.f32 %v2828_v16  ;;  %v2876_v13 = vrot.slane %v2828_v16, 6 }
0x1af1   :  { %v2856_v9 = vpop.permute.xlu0 %2855 }
0x1af2   :  { %v2858_v12 = vadd.f32 %v2856_v9, %v2848_v17 }
0x1af4   :  { %5821 = vtanh.f32 %v2858_v12  ;;  %v2895_v26 = vrot.slane %v2858_v12, 4 }
0x1afa   :  { %v5820_v18 = vpop.eup %5819 }
0x1afb   :  { %2831 = vrot.lane.b32.xlu1 %v5820_v18, %s5949_s27 }
0x1afe   :  { %v5822_v10 = vpop.eup %5821 }
0x1aff   :  { %2861 = vrot.lane.b32.xlu0 %v5822_v10, %s5949_s27 }
0x1b03   :  { %2871 = vrot.lane.b32.xlu0 %v2870_v19, %s5950_s29 }
0x1b07   :  { %2877 = vrot.lane.b32.xlu0 %v2876_v13, %s5951_s0 }
0x1b6d   :  { %v2832_v20 = vpop.permute.xlu1 %2831 }
0x1b6e   :  { %v2834_v21 = vmul.f32 %v5816_v7, %v2832_v20 }
0x1b70   :  { %v2866_v22 = vrot.slane %v2834_v21, 6 }
0x1b71   :  { %v2862_v23 = vpop.permute.xlu0 %2861 }
0x1b72   :  { %v2864_v15 = vmul.f32 %v5818_v11, %v2862_v23  ;;  %2867 = vrot.lane.b32.xlu1 %v2866_v22, %s5950_s29 }
0x1b74   :  { %v2887_v24 = vrot.slane %v2864_v15, 4 }
0x1b75   :  { %v2872_v60 = vpop.permute.xlu0 %2871 }
0x1b76   :  { %2888 = vrot.lane.b32.xlu1 %v2887_v24, %s5950_s29 }
0x1b79   :  { %v2878_v1 = vpop.permute.xlu0 %2877 }
0x1b7a   :  { %2882 = vrot.lane.b32.xlu1 %v2881_v41, %s5951_s0 }
0x1b7e   :  { %2896 = vrot.lane.b32.xlu1 %v2895_v26, %s5951_s0 }
0x1be4   :  { %v6939_v27 = vpop.permute.xlu1 %2867 }
0x1be5   :  { %v6944_v0 = vsel %vm508_vm3, %v6939_v27, %v2872_v60 }
0x1be6   :  { %v2917_v29 = vrot.slane %v6944_v0, 2 }
0x1be8   :  { %v6948_v34 = vpop.permute.xlu1 %2888  ;;  %5195 = vmatmul.mubr.msk.f32.vlgmr.msra.gmra.mrb[26].mxu0 %vm310_vm6, %v2917_v29 }
0x1be9   :  { %v6954_v28 = vsel %vm515_vm4, %v6948_v34, %v2891_v30  ;;  %5578 = vmatpush3.bf16.msra.mxu0 %v6825_v25  ;;  %5216 = vmatprep.mubr.msk.f32.mxu0 %vm5946_vm0, %v5947_v49  ;;  %v3129_v30 = vrot.slane %v6944_v0, 6 }
0x1bea   :  { %v2991_v33 = vrot.slane %v6954_v28, 4  ;;  %5579 = vmatprep.subr.bf16.mxu0 %v5945_v40 }
0x1bec   :  { %5206 = vmatmul.mubr.msk.f32.vlgmr.msra.gmra.mrb[26].mxu1 %vm310_vm6, %v2991_v33  ;;  %v2883_v46 = vpop.permute.xlu1 %2882 }
0x1bed   :  { %5581 = vmatpush3.bf16.msra.mxu0 %v6847_v50  ;;  %5584 = vmatpush3.bf16.msra.mxu1 %v6827_v31  ;;  %v6972_v3 = vsel %vm508_vm3, %v2878_v1, %v2883_v46  ;;  %v3169_v46 = vld [vmem:[#allocation3 + $0x8] sm:$0x3] }
0x1bee   :  { %5585 = vmatprep.subr.bf16.mxu1 %v5945_v40  ;;  %5227 = vmatprep.mubr.msk.f32.mxu1 %vm5946_vm0, %v5947_v49  ;;  %v3073_v58 = vrot.slane %v6972_v3, 2 }
0x1bef   :  { %5588 = vmatprep.subr.bf16.mxu0 %v5945_v40 }
0x1bf0   :  { %v2897_v59 = vpop.permute.xlu1 %2896 }
0x1bf1   :  { %5587 = vmatpush3.bf16.msra.mxu1 %v6849_v61  ;;  %v6979_v6 = vsel %vm515_vm4, %v2897_v59, %v2899_v42 }
0x1bf2   :  { %5594 = vmatprep.subr.bf16.mxu1 %v5945_v40  ;;  %v3103_v2 = vrot.slane %v6979_v6, 4 }
0x1cbb   :  { %v2986_v38 = vpop.f32.mrb[26].mxu0 }
0x1cbc   :  { %v3064_v39 = vadd.f32 %v2986_v38, %v2914_v37  ;;  %v5196_v47 = vpop.f32.mrb[27].mxu0 }
0x1cbe   :  { %5823 = vtanh.f32 %v3064_v39  ;;  %v4632_v54 = vmul.f32 -1.442695, %v3064_v39  ;;  %v3145_v39 = vrot.slane %v6954_v28, 2  ;;  %v3168_v28 = vld [vmem:[#allocation2 + $0x6] sm:$0x3] }
0x1cbf   :  { %v3060_v57 = vpop.f32.mrb[26].mxu1 }
0x1cc0   :  { %v3094_v51 = vadd.f32 %v3060_v57, %v2915_v56  ;;  %v5207_v43 = vpop.f32.mrb[27].mxu1 }
0x1cc2   :  { %5825 = vtanh.f32 %v3094_v51  ;;  %v4633_v7 = vmul.f32 -1.442695, %v3094_v51 }
0x1cc3   :  { %5827 = vpow2.f32 %v4632_v54 }
0x1cc4   :  { %5829 = vpow2.f32 %v4633_v7  ;;  %v3153_v7 = vrot.slane %v6979_v6, 2 }
0x1cc8   :  { %v5824_v55 = vpop.eup %5823 }
0x1cc9   :  { %3079 = vrot.lane.b32.xlu0 %v5824_v55, %s5949_s27 }
0x1ccc   :  { %v5826_v62 = vpop.eup %5825 }
0x1ccd   :  { %3109 = vrot.lane.b32.xlu1 %v5826_v62, %s5949_s27  ;;  %3074 = vrot.lane.b32.xlu0 %v3073_v58, %s5949_s27  ;;  %v5828_v52 = vpop.eup %5827  ;;  %v3137_v58 = vrot.slane %v6972_v3, 6 }
0x1cce   :  { %v3068_v8 = vadd.f32 1.0, %v5828_v52  ;;  %v5830_v48 = vpop.eup %5829 }
0x1ccf   :  { %v3098_v11 = vadd.f32 1.0, %v5830_v48 }
0x1cd0   :  { %5831 = vrcp.f32 %v3068_v8 }
0x1cd1   :  { %3104 = vrot.lane.b32.xlu1 %v3103_v2, %s5949_s27  ;;  %5833 = vrcp.f32 %v3098_v11 }
0x1cda   :  { %v5832_v36 = vpop.eup %5831 }
0x1cdb   :  { %v5834_v45 = vpop.eup %5833 }
0x1d3b   :  { %v3080_v4 = vpop.permute.xlu0 %3079 }
0x1d3c   :  { %v3082_v63 = vmul.f32 %v5832_v36, %v3080_v4 }
0x1d3e   :  { %3084 = vrot.lane.b32.xlu0 %v3082_v63, %s5949_s27 }
0x1d3f   :  { %v3110_v14 = vpop.permute.xlu1 %3109  ;;  %v3075_v16 = vpop.permute.xlu0 %3074 }
0x1d40   :  { %v3112_v5 = vmul.f32 %v5834_v45, %v3110_v14  ;;  %v3077_v17 = vmul.f32 %v5832_v36, %v3075_v16 }
0x1d42   :  { %3114 = vrot.lane.b32.xlu0 %v3112_v5, %s5949_s27 }
0x1d43   :  { %v3105_v9 = vpop.permute.xlu1 %3104 }
0x1d44   :  { %v3107_v10 = vmul.f32 %v5834_v45, %v3105_v9 }
0x1db0   :  { %v3085_v12 = vpop.permute.xlu0 %3084 }
0x1db1   :  { %v3087_v18 = vadd.f32 %v3085_v12, %v3077_v17 }
0x1db3   :  { %5835 = vtanh.f32 %v3087_v18  ;;  %v3133_v26 = vrot.slane %v3087_v18, 4 }
0x1db4   :  { %v3115_v19 = vpop.permute.xlu0 %3114 }
0x1db5   :  { %v3117_v13 = vadd.f32 %v3115_v19, %v3107_v10 }
0x1db7   :  { %5837 = vtanh.f32 %v3117_v13  ;;  %v3149_v29 = vrot.slane %v3117_v13, 6 }
0x1dbd   :  { %v5836_v20 = vpop.eup %5835 }
0x1dbe   :  { %3090 = vrot.lane.b32.xlu1 %v5836_v20, %s5949_s27 }
0x1dc1   :  { %v5838_v21 = vpop.eup %5837 }
0x1dc2   :  { %3120 = vrot.lane.b32.xlu0 %v5838_v21, %s5949_s27 }
0x1e30   :  { %v3091_v22 = vpop.permute.xlu1 %3090 }
0x1e31   :  { %v3093_v23 = vmul.f32 %v5832_v36, %v3091_v22 }
0x1e33   :  { %v3125_v15 = vrot.slane %v3093_v23, 4 }
0x1e34   :  { %v3121_v24 = vpop.permute.xlu0 %3120 }
0x1e35   :  { %v3123_v41 = vmul.f32 %v5834_v45, %v3121_v24  ;;  %3126 = vrot.lane.b32.xlu1 %v3125_v15, %s5950_s29 }
0x1e37   :  { %v3141_v60 = vrot.slane %v3123_v41, 6 }
0x1e39   :  { %3134 = vrot.lane.b32.xlu1 %v3133_v26, %s5951_s0  ;;  %3142 = vrot.lane.b32.xlu0 %v3141_v60, %s5950_s29 }
0x1e3d   :  { %3150 = vrot.lane.b32.xlu1 %v3149_v29, %s5951_s0 }
0x1ea7   :  { %v6994_v33 = vpop.permute.xlu1 %3126 }
0x1ea8   :  { %v6999_v37 = vsel %vm508_vm3, %v6994_v33, %v3129_v30 }
0x1ea9   :  { %v3171_v38 = vrot.slane %v6999_v37, 4 }
0x1eab   :  { %5217 = vmatmul.mubr.msk.f32.vlgmr.msra.gmra.mrb[28].mxu0 %vm310_vm6, %v3171_v38  ;;  %v7004_v47 = vpop.permute.xlu0 %3142  ;;  %v3135_v42 = vpop.permute.xlu1 %3134 }
0x1eac   :  { %v7009_v56 = vsel %vm515_vm4, %v7004_v47, %v3145_v39  ;;  %5590 = vmatpush3.bf16.msra.mxu0 %v6825_v25  ;;  %5238 = vmatprep.mubr.msk.f32.mxu0 %vm5946_vm0, %v5947_v49  ;;  %v7030_v2 = vsel %vm508_vm3, %v3135_v42, %v3137_v58 }
0x1ead   :  { %v3245_v0 = vrot.slane %v7009_v56, 2  ;;  %5591 = vmatprep.subr.bf16.mxu0 %v5945_v40  ;;  %v3327_v52 = vrot.slane %v7030_v2, 4  ;;  %v3383_v56 = vrot.slane %v6999_v37, 6  ;;  %v3413_v37 = vld [vmem:[#allocation2 + $0x8] sm:$0x3] }
0x1eaf   :  { %5228 = vmatmul.mubr.msk.f32.vlgmr.msra.gmra.mrb[28].mxu1 %vm310_vm6, %v3245_v0  ;;  %v3151_v54 = vpop.permute.xlu1 %3150 }
0x1eb0   :  { %5596 = vmatpush3.bf16.msra.mxu1 %v6827_v31  ;;  %5593 = vmatpush3.bf16.msra.mxu0 %v6847_v50  ;;  %v3155_v48 = vsel %vm515_vm4, %v3151_v54, %v3153_v7  ;;  %v3391_v7 = vrot.slane %v7030_v2, 6 }
0x1eb1   :  { %5597 = vmatprep.subr.bf16.mxu1 %v5945_v40  ;;  %5249 = vmatprep.mubr.msk.f32.mxu1 %vm5946_vm0, %v5947_v49  ;;  %v3357_v3 = vrot.slane %v3155_v48, 2 }
0x1eb2   :  { %5600 = vmatprep.subr.bf16.mxu0 %v5945_v40 }
0x1eb4   :  { %5599 = vmatpush3.bf16.msra.mxu1 %v6849_v61 }
0x1eb5   :  { %5606 = vmatprep.subr.bf16.mxu1 %v5945_v40 }
0x1f7e   :  { %v3240_v57 = vpop.f32.mrb[28].mxu0 }
0x1f7f   :  { %v3318_v51 = vadd.f32 %v3240_v57, %v3168_v28  ;;  %v5218_v43 = vpop.f32.mrb[29].mxu0 }
0x1f81   :  { %5839 = vtanh.f32 %v3318_v51  ;;  %v4636_v11 = vmul.f32 -1.442695, %v3318_v51 }
0x1f82   :  { %v3314_v1 = vpop.f32.mrb[28].mxu1 }
0x1f83   :  { %v3348_v55 = vadd.f32 %v3314_v1, %v3169_v46  ;;  %v5229_v59 = vpop.f32.mrb[29].mxu1  ;;  %v3414_v1 = vld [vmem:[#allocation3 + $0x6] sm:$0x3] }
0x1f85   :  { %5841 = vtanh.f32 %v3348_v55  ;;  %v4637_v36 = vmul.f32 -1.442695, %v3348_v55 }
0x1f86   :  { %5843 = vpow2.f32 %v4636_v11 }
0x1f87   :  { %5845 = vpow2.f32 %v4637_v36 }
0x1f8b   :  { %v5840_v62 = vpop.eup %5839 }
0x1f8c   :  { %3333 = vrot.lane.b32.xlu0 %v5840_v62, %s5949_s27 }
0x1f8f   :  { %v5842_v8 = vpop.eup %5841 }
0x1f90   :  { %3328 = vrot.lane.b32.xlu0 %v3327_v52, %s5949_s27  ;;  %3363 = vrot.lane.b32.xlu1 %v5842_v8, %s5949_s27  ;;  %v5844_v4 = vpop.eup %5843 }
0x1f91   :  { %v3322_v63 = vadd.f32 1.0, %v5844_v4  ;;  %v5846_v6 = vpop.eup %5845 }
0x1f92   :  { %v3352_v45 = vadd.f32 1.0, %v5846_v6 }
0x1f93   :  { %5847 = vrcp.f32 %v3322_v63 }
0x1f94   :  { %3358 = vrot.lane.b32.xlu1 %v3357_v3, %s5949_s27  ;;  %5849 = vrcp.f32 %v3352_v45 }
0x1f9d   :  { %v5848_v14 = vpop.eup %5847 }
0x1f9e   :  { %v5850_v17 = vpop.eup %5849 }
0x1ffe   :  { %v3334_v5 = vpop.permute.xlu0 %3333 }
0x1fff   :  { %v3336_v16 = vmul.f32 %v5848_v14, %v3334_v5 }
0x2001   :  { %3338 = vrot.lane.b32.xlu0 %v3336_v16, %s5949_s27 }
0x2002   :  { %v3364_v9 = vpop.permute.xlu1 %3363  ;;  %v3329_v18 = vpop.permute.xlu0 %3328 }
0x2003   :  { %v3366_v12 = vmul.f32 %v5850_v17, %v3364_v9  ;;  %v3331_v10 = vmul.f32 %v5848_v14, %v3329_v18 }
0x2005   :  { %3368 = vrot.lane.b32.xlu0 %v3366_v12, %s5949_s27 }
0x2006   :  { %v7042_v19 = vpop.permute.xlu1 %3358 }
0x2007   :  { %v3361_v21 = vmul.f32 %v5850_v17, %v7042_v19 }
0x2073   :  { %v3339_v13 = vpop.permute.xlu0 %3338 }
0x2074   :  { %v3341_v20 = vadd.f32 %v3339_v13, %v3331_v10 }
0x2076   :  { %5851 = vtanh.f32 %v3341_v20  ;;  %v3387_v39 = vrot.slane %v3341_v20, 2 }
0x2077   :  { %v3369_v22 = vpop.permute.xlu0 %3368 }
0x2078   :  { %v7045_v23 = vadd.f32 %v3369_v22, %v3361_v21 }
0x207a   :  { %5853 = vtanh.f32 %v7045_v23  ;;  %v3398_v10 = vsel %vm515_vm4, %v7045_v23, %v7042_v19 }
0x2080   :  { %v5852_v15 = vpop.eup %5851 }
0x2081   :  { %3344 = vrot.lane.b32.xlu1 %v5852_v15, %s5949_s27 }
0x2084   :  { %v5854_v24 = vpop.eup %5853 }
0x2085   :  { %3394 = vrot.lane.b32.xlu1 %v3245_v0, %s5950_s29  ;;  %3374 = vrot.lane.b32.xlu0 %v5854_v24, %s5949_s27 }
0x20f3   :  { %v3345_v41 = vpop.permute.xlu1 %3344 }
0x20f4   :  { %v3347_v26 = vmul.f32 %v5848_v14, %v3345_v41 }
0x20f6   :  { %v3379_v60 = vrot.slane %v3347_v26, 2 }
0x20f7   :  { %v3375_v29 = vpop.permute.xlu0 %3374  ;;  %v3395_v38 = vpop.permute.xlu1 %3394 }
0x20f8   :  { %v7053_v30 = vmul.f32 %v5850_v17, %v3375_v29  ;;  %3380 = vrot.lane.b32.xlu0 %v3379_v60, %s5950_s29 }
0x20fa   :  { %v7059_v28 = vsel %vm515_vm4, %v7053_v30, %v3395_v38 }
0x20fb   :  { %3490 = vrot.lane.b32.xlu1 %v7059_v28, %s5950_s29 }
0x20fc   :  { %3388 = vrot.lane.b32.xlu0 %v3387_v39, %s5951_s0  ;;  %v3629_v39 = vrot.slane %v7059_v28, 2 }
0x216a   :  { %v7065_v0 = vpop.permute.xlu0 %3380 }
0x216b   :  { %v3385_v57 = vsel %vm508_vm3, %v7065_v0, %v3383_v56 }
0x216c   :  { %v3416_v51 = vrot.slane %v3385_v57, 6 }
0x216d   :  { %v3491_v43 = vpop.permute.xlu1 %3490 }
0x216e   :  { %5239 = vmatmul.mubr.msk.f32.vlgmr.msra.gmra.mrb[30].mxu0 %vm310_vm6, %v3416_v51  ;;  %5250 = vmatmul.mubr.msk.f32.vlgmr.msra.gmra.mrb[30].mxu1 %vm310_vm6, %v3491_v43  ;;  %v3389_v54 = vpop.permute.xlu0 %3388 }
0x216f   :  { %5602 = vmatpush3.bf16.msra.mxu0 %v6825_v25  ;;  %5260 = vmatprep.mubr.msk.f32.mxu0 %vm5946_vm0, %v5947_v49  ;;  %v3393_v8 = vsel %vm508_vm3, %v3389_v54, %v3391_v7 }
0x2170   :  { %5603 = vmatprep.subr.bf16.mxu0 %v5945_v40  ;;  %5608 = vmatpush3.bf16.msra.mxu1 %v6827_v31  ;;  %v3573_v3 = vrot.slane %v3393_v8, 6  ;;  %v3640_v8 = vrot.slane %v3398_v10, 2 }
0x2171   :  { %5609 = vmatprep.subr.bf16.mxu1 %v5945_v40  ;;  %5271 = vmatprep.mubr.msk.f32.mxu1 %vm5946_vm0, %v5947_v49 }
0x2173   :  { %5605 = vmatpush3.bf16.msra.mxu0 %v6847_v50 }
0x2174   :  { %5611 = vmatpush3.bf16.msra.mxu1 %v6849_v61  ;;  %5612 = vmatprep.subr.bf16.mxu0 %v5945_v40 }
0x2175   :  { %5618 = vmatprep.subr.bf16.mxu1 %v5945_v40 }
0x2241   :  { %v3485_v46 = vpop.f32.mrb[30].mxu0  ;;  %v3560_v55 = vpop.f32.mrb[30].mxu1 }
0x2242   :  { %v3564_v59 = vadd.f32 %v3485_v46, %v3413_v37  ;;  %v3594_v42 = vadd.f32 %v3560_v55, %v3414_v1  ;;  %v5240_v58 = vpop.f32.mrb[31].mxu0  ;;  %v5251_v62 = vpop.f32.mrb[31].mxu1  ;;  %v3649_v1 = vld [vmem:[#allocation2 + $0xa] sm:$0x3] }
0x2243   :  { %v3650_v58 = vld [vmem:[#allocation3 + $0x4] sm:$0x3] }
0x2244   :  { %5855 = vtanh.f32 %v3564_v59  ;;  %v4640_v11 = vmul.f32 -1.442695, %v3564_v59  ;;  %v4641_v36 = vmul.f32 -1.442695, %v3594_v42 }
0x2245   :  { %5857 = vtanh.f32 %v3594_v42 }
0x2246   :  { %5859 = vpow2.f32 %v4640_v11 }
0x2247   :  { %5861 = vpow2.f32 %v4641_v36 }
0x224e   :  { %v5856_v52 = vpop.eup %5855 }
0x224f   :  { %v5858_v48 = vpop.eup %5857  ;;  %3579 = vrot.lane.b32.xlu1 %v5856_v52, %s5949_s27 }
0x2250   :  { %3604 = vrot.lane.b32.xlu0 %v5858_v48, %s5949_s27  ;;  %v5860_v4 = vpop.eup %5859 }
0x2251   :  { %v5862_v63 = vpop.eup %5861  ;;  %v3568_v6 = vadd.f32 1.0, %v5860_v4 }
0x2252   :  { %v3598_v2 = vadd.f32 1.0, %v5862_v63 }
0x2253   :  { %3574 = vrot.lane.b32.xlu1 %v3573_v3, %s5949_s27  ;;  %5863 = vrcp.f32 %v3568_v6 }
0x2254   :  { %5865 = vrcp.f32 %v3598_v2 }
0x225d   :  { %v5864_v45 = vpop.eup %5863 }
0x225e   :  { %v5866_v5 = vpop.eup %5865 }
0x225f   :  { %v3602_v20 = vmul.f32 %v5866_v5, %v3398_v10 }
0x22c1   :  { %v3580_v14 = vpop.permute.xlu1 %3579 }
0x22c2   :  { %v3582_v16 = vmul.f32 %v5864_v45, %v3580_v14  ;;  %v3605_v17 = vpop.permute.xlu0 %3604 }
0x22c3   :  { %v3607_v9 = vmul.f32 %v5866_v5, %v3605_v17 }
0x22c4   :  { %3584 = vrot.lane.b32.xlu0 %v3582_v16, %s5949_s27 }
0x22c5   :  { %3609 = vrot.lane.b32.xlu1 %v3607_v9, %s5949_s27  ;;  %v7093_v12 = vpop.permute.xlu1 %3574 }
0x22c6   :  { %v3577_v18 = vmul.f32 %v5864_v45, %v7093_v12 }
0x22c9   :  { %3619 = vrot.lane.b32.xlu1 %v3416_v51, %s5950_s29 }
0x2336   :  { %v3585_v13 = vpop.permute.xlu0 %3584 }
0x2337   :  { %v3610_v21 = vpop.permute.xlu1 %3609  ;;  %v7100_v22 = vadd.f32 %v3585_v13, %v3577_v18 }
0x2338   :  { %v3612_v15 = vadd.f32 %v3610_v21, %v3602_v20 }
0x2339   :  { %5867 = vtanh.f32 %v7100_v22  ;;  %v3623_v20 = vsel %vm515_vm4, %v7100_v22, %v7093_v12 }
0x233a   :  { %5869 = vtanh.f32 %v3612_v15  ;;  %v3635_v57 = vrot.slane %v3612_v15, 2 }
0x233b   :  { %v3620_v29 = vpop.permute.xlu1 %3619 }
0x2343   :  { %v5868_v24 = vpop.eup %5867 }
0x2344   :  { %3590 = vrot.lane.b32.xlu0 %v5868_v24, %s5949_s27  ;;  %v5870_v41 = vpop.eup %5869 }
0x2348   :  { %3615 = vrot.lane.b32.xlu0 %v5870_v41, %s5949_s27 }
0x23b6   :  { %v3591_v26 = vpop.permute.xlu0 %3590 }
0x23b7   :  { %v7105_v60 = vmul.f32 %v5864_v45, %v3591_v26 }
0x23b9   :  { %v7110_v19 = vsel %vm515_vm4, %v7105_v60, %v3620_v29 }
0x23ba   :  { %3652 = vrot.lane.b32.xlu1 %v7110_v19, %s5950_s29  ;;  %v3616_v23 = vpop.permute.xlu0 %3615 }
0x23bb   :  { %v3618_v38 = vmul.f32 %v5866_v5, %v3616_v23 }
0x23bd   :  { %v3625_v56 = vrot.slane %v3618_v38, 2 }
0x23be   :  { %3630 = vrot.lane.b32.xlu1 %v3629_v39, %s5950_s29 }
0x23bf   :  { %3626 = vrot.lane.b32.xlu0 %v3625_v56, %s5950_s29  ;;  %v3860_v56 = vrot.slane %v7110_v19, 6 }
0x23c2   :  { %3636 = vrot.lane.b32.xlu1 %v3635_v57, %s5951_s0 }
0x242c   :  { %v3653_v51 = vpop.permute.xlu1 %3652 }
0x242d   :  { %5261 = vmatmul.mubr.msk.f32.vlgmr.msra.gmra.mrb[32].mxu0 %vm310_vm6, %v3653_v51 }
0x242e   :  { %5614 = vmatpush3.bf16.msra.mxu0 %v6825_v25  ;;  %5282 = vmatprep.mubr.msk.f32.mxu0 %vm5946_vm0, %v5947_v49 }
0x242f   :  { %5615 = vmatprep.subr.bf16.mxu0 %v5945_v40 }
0x2430   :  { %v3631_v43 = vpop.permute.xlu1 %3630 }
0x2431   :  { %v7123_v28 = vpop.permute.xlu0 %3626 }
0x2432   :  { %v7128_v37 = vsel %vm508_vm3, %v7123_v28, %v3631_v43  ;;  %5617 = vmatpush3.bf16.msra.mxu0 %v6847_v50 }
0x2433   :  { %v3727_v46 = vrot.slane %v7128_v37, 6  ;;  %5624 = vmatprep.subr.bf16.mxu0 %v5945_v40 }
0x2434   :  { %v3637_v5 = vpop.permute.xlu1 %3636 }
0x2435   :  { %5272 = vmatmul.mubr.msk.f32.vlgmr.msra.gmra.mrb[32].mxu1 %vm310_vm6, %v3727_v46 }
0x2436   :  { %5620 = vmatpush3.bf16.msra.mxu1 %v6827_v31  ;;  %5293 = vmatprep.mubr.msk.f32.mxu1 %vm5946_vm0, %v5947_v49 }
0x2437   :  { %5621 = vmatprep.subr.bf16.mxu1 %v5945_v40 }
0x243a   :  { %5623 = vmatpush3.bf16.msra.mxu1 %v6849_v61 }
0x243b   :  { %5630 = vmatprep.subr.bf16.mxu1 %v5945_v40 }
0x2500   :  { %v3722_v55 = vpop.f32.mrb[32].mxu0 }
0x2501   :  { %v3800_v59 = vadd.f32 %v3722_v55, %v3649_v1  ;;  %v5262_v42 = vpop.f32.mrb[33].mxu0  ;;  %v3871_v55 = vrot.slane %v3623_v20, 6 }
0x2503   :  { %5871 = vtanh.f32 %v3800_v59  ;;  %v4644_v3 = vmul.f32 -1.442695, %v3800_v59 }
0x2508   :  { %v3796_v62 = vpop.f32.mrb[32].mxu1 }
0x2509   :  { %v3825_v54 = vadd.f32 %v3796_v62, %v3650_v58  ;;  %v5273_v7 = vpop.f32.mrb[33].mxu1 }
0x250b   :  { %5873 = vtanh.f32 %v3825_v54  ;;  %v4645_v11 = vmul.f32 -1.442695, %v3825_v54  ;;  %v3881_v54 = vrot.slane %v7128_v37, 2 }
0x250c   :  { %5875 = vpow2.f32 %v4644_v3  ;;  %v3905_v3 = vld [vmem:[#allocation3 + $0x2] sm:$0x3] }
0x250d   :  { %v5872_v52 = vpop.eup %5871  ;;  %5877 = vpow2.f32 %v4645_v11 }
0x250e   :  { %3810 = vrot.lane.b32.xlu0 %v5872_v52, %s5949_s27 }
0x2512   :  { %3641 = vrot.lane.b32.xlu0 %v3640_v8, %s5951_s0 }
0x2515   :  { %v5874_v48 = vpop.eup %5873 }
0x2516   :  { %3840 = vrot.lane.b32.xlu1 %v5874_v48, %s5949_s27  ;;  %v5876_v36 = vpop.eup %5875 }
0x2517   :  { %v3804_v4 = vadd.f32 1.0, %v5876_v36  ;;  %v5878_v63 = vpop.eup %5877 }
0x2518   :  { %v3829_v6 = vadd.f32 1.0, %v5878_v63 }
0x2519   :  { %5879 = vrcp.f32 %v3804_v4 }
0x251a   :  { %5881 = vrcp.f32 %v3829_v6 }
0x2523   :  { %v5880_v2 = vpop.eup %5879 }
0x2524   :  { %v5882_v18 = vpop.eup %5881  ;;  %v3808_v21 = vmul.f32 %v5880_v2, %v3623_v20 }
0x2580   :  { %v3811_v45 = vpop.permute.xlu0 %3810 }
0x2581   :  { %v3813_v14 = vmul.f32 %v5880_v2, %v3811_v45 }
0x2583   :  { %3815 = vrot.lane.b32.xlu0 %v3813_v14, %s5949_s27 }
0x2584   :  { %v3642_v16 = vpop.permute.xlu0 %3641 }
0x2585   :  { %v7146_v17 = vsel %vm508_vm3, %v3637_v5, %v3642_v16 }
0x2586   :  { %v3834_v9 = vrot.slane %v7146_v17, 6  ;;  %v3889_v14 = vrot.slane %v7146_v17, 2 }
0x2588   :  { %v3841_v10 = vpop.permute.xlu1 %3840  ;;  %3835 = vrot.lane.b32.xlu1 %v3834_v9, %s5949_s27 }
0x2589   :  { %v3843_v13 = vmul.f32 %v5882_v18, %v3841_v10 }
0x258b   :  { %3845 = vrot.lane.b32.xlu0 %v3843_v13, %s5949_s27 }
0x25f5   :  { %v3816_v15 = vpop.permute.xlu0 %3815 }
0x25f6   :  { %v3818_v24 = vadd.f32 %v3816_v15, %v3808_v21 }
0x25f8   :  { %5883 = vtanh.f32 %v3818_v24  ;;  %v3866_v12 = vrot.slane %v3818_v24, 6 }
0x25fa   :  { %v3836_v41 = vpop.permute.xlu1 %3835 }
0x25fb   :  { %v3838_v26 = vmul.f32 %v5882_v18, %v3836_v41 }
0x25fd   :  { %v3846_v29 = vpop.permute.xlu0 %3845 }
0x25fe   :  { %v3848_v23 = vadd.f32 %v3846_v29, %v3838_v26 }
0x2600   :  { %5885 = vtanh.f32 %v3848_v23  ;;  %v3885_v59 = vrot.slane %v3848_v23, 4 }
0x2602   :  { %v5884_v38 = vpop.eup %5883 }
0x2603   :  { %3821 = vrot.lane.b32.xlu1 %v5884_v38, %s5949_s27 }
0x260a   :  { %v5886_v39 = vpop.eup %5885 }
0x260b   :  { %3851 = vrot.lane.b32.xlu0 %v5886_v39, %s5949_s27 }
0x260f   :  { %3861 = vrot.lane.b32.xlu0 %v3860_v56, %s5950_s29 }
0x2613   :  { %3867 = vrot.lane.b32.xlu0 %v3866_v12, %s5951_s0 }
0x2675   :  { %v3822_v22 = vpop.permute.xlu1 %3821 }
0x2676   :  { %v3824_v57 = vmul.f32 %v5880_v2, %v3822_v22 }
0x2678   :  { %v3856_v51 = vrot.slane %v3824_v57, 6 }
0x267a   :  { %3857 = vrot.lane.b32.xlu1 %v3856_v51, %s5950_s29 }
0x267d   :  { %v3852_v43 = vpop.permute.xlu0 %3851 }
0x267e   :  { %v3854_v46 = vmul.f32 %v5882_v18, %v3852_v43 }
0x2680   :  { %v3877_v1 = vrot.slane %v3854_v46, 4 }
0x2681   :  { %v3862_v19 = vpop.permute.xlu0 %3861 }
0x2682   :  { %3878 = vrot.lane.b32.xlu1 %v3877_v1, %s5950_s29 }
0x2686   :  { %3872 = vrot.lane.b32.xlu1 %v3871_v55, %s5951_s0 }
0x268a   :  { %3886 = vrot.lane.b32.xlu1 %v3885_v59, %s5951_s0 }
0x26ec   :  { %v7164_v42 = vpop.permute.xlu1 %3857 }
0x26ed   :  { %v7169_v58 = vsel %vm515_vm4, %v7164_v42, %v3862_v19 }
0x26ee   :  { %v3907_v62 = vrot.slane %v7169_v58, 2 }
0x26f0   :  { %5283 = vmatmul.mubr.msk.f32.vlgmr.msra.gmra.mrb[34].mxu0 %vm310_vm6, %v3907_v62 }
0x26f1   :  { %5626 = vmatpush3.bf16.msra.mxu0 %v6825_v25  ;;  %5304 = vmatprep.mubr.msk.f32.mxu0 %vm5946_vm0, %v5947_v49  ;;  %v3904_v25 = vld [vmem:[#allocation2 + $0xc] sm:$0x3] }
0x26f2   :  { %5627 = vmatprep.subr.bf16.mxu0 %v5945_v40 }
0x26f4   :  { %v7178_v7 = vpop.permute.xlu1 %3878 }
0x26f5   :  { %v7183_v52 = vsel %vm508_vm3, %v7178_v7, %v3881_v54  ;;  %5629 = vmatpush3.bf16.msra.mxu0 %v6847_v50 }
0x26f6   :  { %v3981_v8 = vrot.slane %v7183_v52, 4  ;;  %5636 = vmatprep.subr.bf16.mxu0 %v5945_v40 }
0x26f8   :  { %5294 = vmatmul.mubr.msk.f32.vlgmr.msra.gmra.mrb[34].mxu1 %vm310_vm6, %v3981_v8  ;;  %v3873_v63 = vpop.permute.xlu1 %3872 }
0x26f9   :  { %5632 = vmatpush3.bf16.msra.mxu1 %v6827_v31  ;;  %5315 = vmatprep.mubr.msk.f32.mxu1 %vm5946_vm0, %v5947_v49  ;;  %v3868_v31 = vpop.permute.xlu0 %3867 }
0x26fa   :  { %5633 = vmatprep.subr.bf16.mxu1 %v5945_v40  ;;  %v7197_v2 = vsel %vm515_vm4, %v3868_v31, %v3873_v63  ;;  %v4158_v31 = vld [vmem:[#allocation2 + $0xe] sm:$0x3] }
0x26fc   :  { %v3887_v45 = vpop.permute.xlu1 %3886 }
0x26fd   :  { %5635 = vmatpush3.bf16.msra.mxu1 %v6849_v61  ;;  %v4063_v61 = vrot.slane %v7197_v2, 2  ;;  %v7205_v16 = vsel %vm508_vm3, %v3887_v45, %v3889_v14  ;;  %v4159_v14 = vld [vmem:[#allocation3] sm:$0x3] }
0x26fe   :  { %5648 = vmatprep.subr.bf16.mxu1 %v5945_v40  ;;  %v4093_v9 = vrot.slane %v7205_v16, 4 }
0x27c3   :  { %v3976_v37 = vpop.f32.mrb[34].mxu0 }
0x27c4   :  { %v4054_v50 = vadd.f32 %v3976_v37, %v3904_v25  ;;  %v5284_v48 = vpop.f32.mrb[35].mxu0 }
0x27c6   :  { %5887 = vtanh.f32 %v4054_v50  ;;  %v4648_v18 = vmul.f32 -1.442695, %v4054_v50  ;;  %v4119_v50 = vrot.slane %v7169_v58, 6 }
0x27cb   :  { %v4050_v11 = vpop.f32.mrb[34].mxu1 }
0x27cc   :  { %v4084_v36 = vadd.f32 %v4050_v11, %v3905_v3  ;;  %v5295_v4 = vpop.f32.mrb[35].mxu1 }
0x27ce   :  { %5889 = vtanh.f32 %v4084_v36  ;;  %v4649_v10 = vmul.f32 -1.442695, %v4084_v36  ;;  %v4135_v36 = vrot.slane %v7183_v52, 2 }
0x27cf   :  { %5891 = vpow2.f32 %v4648_v18 }
0x27d0   :  { %v5888_v6 = vpop.eup %5887  ;;  %5893 = vpow2.f32 %v4649_v10  ;;  %v4127_v10 = vrot.slane %v7197_v2, 6 }
0x27d1   :  { %4069 = vrot.lane.b32.xlu0 %v5888_v6, %s5949_s27 }
0x27d5   :  { %4064 = vrot.lane.b32.xlu0 %v4063_v61, %s5949_s27 }
0x27d8   :  { %v5890_v5 = vpop.eup %5889 }
0x27d9   :  { %4099 = vrot.lane.b32.xlu1 %v5890_v5, %s5949_s27  ;;  %v5892_v13 = vpop.eup %5891 }
0x27da   :  { %v4058_v20 = vadd.f32 1.0, %v5892_v13  ;;  %v5894_v21 = vpop.eup %5893 }
0x27db   :  { %v4088_v17 = vadd.f32 1.0, %v5894_v21 }
0x27dc   :  { %5895 = vrcp.f32 %v4058_v20 }
0x27dd   :  { %4094 = vrot.lane.b32.xlu1 %v4093_v9, %s5949_s27  ;;  %5897 = vrcp.f32 %v4088_v17  ;;  %v4143_v17 = vrot.slane %v7205_v16, 2 }
0x27e6   :  { %v5896_v15 = vpop.eup %5895 }
0x27e7   :  { %v5898_v26 = vpop.eup %5897 }
0x2843   :  { %v4070_v24 = vpop.permute.xlu0 %4069 }
0x2844   :  { %v4072_v41 = vmul.f32 %v5896_v15, %v4070_v24 }
0x2846   :  { %4074 = vrot.lane.b32.xlu0 %v4072_v41, %s5949_s27 }
0x2847   :  { %v4065_v38 = vpop.permute.xlu0 %4064 }
0x2848   :  { %v4067_v39 = vmul.f32 %v5896_v15, %v4065_v38 }
0x284b   :  { %v4100_v29 = vpop.permute.xlu1 %4099 }
0x284c   :  { %v4102_v23 = vmul.f32 %v5898_v26, %v4100_v29 }
0x284e   :  { %4104 = vrot.lane.b32.xlu0 %v4102_v23, %s5949_s27 }
0x284f   :  { %v4095_v22 = vpop.permute.xlu1 %4094 }
0x2850   :  { %v4097_v57 = vmul.f32 %v5898_v26, %v4095_v22 }
0x28b8   :  { %v4075_v56 = vpop.permute.xlu0 %4074 }
0x28b9   :  { %v4077_v12 = vadd.f32 %v4075_v56, %v4067_v39 }
0x28bb   :  { %5899 = vtanh.f32 %v4077_v12  ;;  %v4123_v62 = vrot.slane %v4077_v12, 4 }
0x28c0   :  { %v4105_v51 = vpop.permute.xlu0 %4104 }
0x28c1   :  { %v4107_v43 = vadd.f32 %v4105_v51, %v4097_v57 }
0x28c3   :  { %5901 = vtanh.f32 %v4107_v43  ;;  %v4139_v25 = vrot.slane %v4107_v43, 6 }
0x28c5   :  { %v5900_v46 = vpop.eup %5899 }
0x28c6   :  { %4080 = vrot.lane.b32.xlu1 %v5900_v46, %s5949_s27 }
0x28cd   :  { %v5902_v1 = vpop.eup %5901 }
0x28ce   :  { %4110 = vrot.lane.b32.xlu0 %v5902_v1, %s5949_s27 }
0x2938   :  { %v4081_v55 = vpop.permute.xlu1 %4080 }
0x2939   :  { %v4083_v59 = vmul.f32 %v5896_v15, %v4081_v55 }
0x293b   :  { %v4115_v19 = vrot.slane %v4083_v59, 4 }
0x293d   :  { %4116 = vrot.lane.b32.xlu1 %v4115_v19, %s5950_s29 }
0x2940   :  { %v4111_v54 = vpop.permute.xlu0 %4110 }
0x2941   :  { %v4113_v8 = vmul.f32 %v5898_v26, %v4111_v54  ;;  %4124 = vrot.lane.b32.xlu1 %v4123_v62, %s5951_s0 }
0x2943   :  { %v4131_v37 = vrot.slane %v4113_v8, 6 }
0x2945   :  { %4140 = vrot.lane.b32.xlu1 %v4139_v25, %s5951_s0  ;;  %4132 = vrot.lane.b32.xlu0 %v4131_v37, %s5950_s29  ;;  %v2902_v37 = vsel %vm508_vm3, %v6939_v27, 0.0 }
0x29af   :  { %v7219_v48 = vpop.permute.xlu1 %4116 }
0x29b0   :  { %v4121_v3 = vsel %vm515_vm4, %v7219_v48, %v4119_v50  ;;  %v2905_v50 = vrot.slane %v2902_v37, 2 }
0x29b1   :  { %v4161_v11 = vrot.slane %v4121_v3, 4  ;;  %v3400_v3 = vsel %vm515_vm4, %v7053_v30, 0.0  ;;  %v2903_v30 = vsel %vm515_vm4, %v6948_v34, 0.0  ;;  %v4146_v34 = vsel %vm515_vm4, %v7219_v48, 0.0 }
0x29b2   :  { %v3646_v48 = vsel %vm508_vm3, %v7123_v28, 0.0 }
0x29b3   :  { %5305 = vmatmul.mubr.msk.f32.vlgmr.msra.gmra.mrb[36].mxu0 %vm310_vm6, %v4161_v11  ;;  %v4125_v18 = vpop.permute.xlu1 %4124  ;;  %v3408_v11 = vrot.slane %v3400_v3, 2 }
0x29b4   :  { %5334 = vmatprep.mubr.msk.f32.mxu0 %vm5946_vm0, %v5947_v49  ;;  %v4129_v20 = vsel %vm515_vm4, %v4125_v18, %v4127_v10 }
0x29b7   :  { %v7228_v4 = vpop.permute.xlu0 %4132  ;;  %v4141_v21 = vpop.permute.xlu1 %4140 }
0x29b8   :  { %v4137_v58 = vsel %vm508_vm3, %v7228_v4, %v4135_v36  ;;  %v4145_v24 = vsel %vm508_vm3, %v4141_v21, %v4143_v17  ;;  %v3892_v36 = vsel %vm515_vm4, %v7164_v42, 0.0  ;;  %v3157_v42 = vsel %vm515_vm4, %v7004_v47, 0.0 }
0x29b9   :  { %v4235_v63 = vrot.slane %v4137_v58, 2  ;;  %v4347_v2 = vrot.slane %v4145_v24, 2  ;;  %v3895_v58 = vrot.slane %v3892_v36, 2 }
0x29bb   :  { %5316 = vmatmul.mubr.msk.f32.vlgmr.msra.gmra.mrb[36].mxu1 %vm310_vm6, %v4235_v63 }
0x29bc   :  { %5345 = vmatprep.mubr.msk.f32.mxu1 %vm5946_vm0, %v5947_v49  ;;  %v4317_v49 = vrot.slane %v4129_v20, 4 }
0x2a86   :  { %v4230_v6 = vpop.f32.mrb[36].mxu0 }
0x2a87   :  { %v4308_v61 = vadd.f32 %v4230_v6, %v4158_v31  ;;  %v5306_v45 = vpop.f32.mrb[37].mxu0  ;;  %v3156_v6 = vsel %vm508_vm3, %v6994_v33, 0.0  ;;  %v3165_v33 = vrot.slane %v3157_v42, 4 }
0x2a88   :  { %v3399_v45 = vsel %vm508_vm3, %v7065_v0, 0.0  ;;  %v4149_v0 = vrot.slane %v4146_v34, 4 }
0x2a89   :  { %5903 = vtanh.f32 %v4308_v61  ;;  %v4652_v41 = vmul.f32 -1.442695, %v4308_v61  ;;  %v3159_v61 = vrot.slane %v3156_v6, 4  ;;  %v4488_v6 = vld [vmem:[%s7380_s16 + $0x10] sm:$0xff] }
0x2a8e   :  { %v4304_v5 = vpop.f32.mrb[36].mxu1 }
0x2a8f   :  { %v4338_v52 = vadd.f32 %v4304_v5, %v4159_v14  ;;  %v5317_v9 = vpop.f32.mrb[37].mxu1  ;;  %v2911_v5 = vrot.slane %v2903_v30, 6 }
0x2a90   :  { %v3402_v9 = vrot.slane %v3399_v45, 6  ;;  %v4654_v45 = vld [vmem:[%s7379_s15] ss:$0 sm:$0xff] }
0x2a91   :  { %5905 = vtanh.f32 %v4338_v52  ;;  %v4653_v26 = vmul.f32 -1.442695, %v4338_v52 }
0x2a92   :  { %5907 = vpow2.f32 %v4652_v41  ;;  %v4397_v41 = vld [vmem:[%s7378_s14] sm:$0xff] }
0x2a93   :  { %v5904_v13 = vpop.eup %5903  ;;  %5909 = vpow2.f32 %v4653_v26  ;;  %v4399_v26 = vld [vmem:[%s7378_s14 + $0x10] sm:$0xff] }
0x2a94   :  { %4323 = vrot.lane.b32.xlu0 %v5904_v13, %s5949_s27  ;;  %v2913_v13 = vadd.f32 %v2911_v5, %v6900_v35 }
0x2a96   :  { %v3167_v20 = vadd.f32 %v3165_v33, %v2913_v13 }
0x2a98   :  { %4318 = vrot.lane.b32.xlu0 %v4317_v49, %s5949_s27  ;;  %v3893_v49 = vsel %vm508_vm3, %v7178_v7, 0.0  ;;  %v4398_v7 = vld [vmem:[%s7378_s14 + $0x8] sm:$0xff] }
0x2a99   :  { %v5637_v28 = vpack.c.bf16 %v4398_v7, %v4397_v41 }
0x2a9b   :  { %v5906_v15 = vpop.eup %5905  ;;  %5638 = vmatpush3.bf16.msra.mxu0 %v5637_v28 }
0x2a9c   :  { %4353 = vrot.lane.b32.xlu1 %v5906_v15, %s5949_s27  ;;  %v5908_v29 = vpop.eup %5907  ;;  %v3901_v15 = vrot.slane %v3893_v49, 6  ;;  %5639 = vmatprep.subr.bf16.mxu0 %v5945_v40 }
0x2a9d   :  { %v4312_v23 = vadd.f32 1.0, %v5908_v29  ;;  %v5910_v38 = vpop.eup %5909 }
0x2a9e   :  { %v4342_v39 = vadd.f32 1.0, %v5910_v38 }
0x2a9f   :  { %5911 = vrcp.f32 %v4312_v23  ;;  %v4400_v23 = vld [vmem:[%s7378_s14 + $0x18] sm:$0xff] }
0x2aa0   :  { %4348 = vrot.lane.b32.xlu1 %v4347_v2, %s5949_s27  ;;  %5913 = vrcp.f32 %v4342_v39  ;;  %v4147_v39 = vsel %vm508_vm3, %v7228_v4, 0.0 }
0x2aa1   :  { %v4155_v44 = vrot.slane %v4147_v39, 4 }
0x2aa9   :  { %v5912_v16 = vpop.eup %5911 }
0x2aaa   :  { %v5914_v22 = vpop.eup %5913 }
0x2b06   :  { %v4324_v56 = vpop.permute.xlu0 %4323 }
0x2b07   :  { %v4326_v12 = vmul.f32 %v5912_v16, %v4324_v56 }
0x2b09   :  { %4328 = vrot.lane.b32.xlu0 %v4326_v12, %s5949_s27  ;;  %v4401_v12 = vld [vmem:[%s7378_s14 + $0x20] sm:$0xff] }
0x2b0a   :  { %v4319_v43 = vpop.permute.xlu0 %4318 }
0x2b0b   :  { %v4321_v46 = vmul.f32 %v5912_v16, %v4319_v43 }
0x2b0e   :  { %v4354_v57 = vpop.permute.xlu1 %4353 }
0x2b0f   :  { %v4356_v51 = vmul.f32 %v5914_v22, %v4354_v57 }
0x2b11   :  { %4358 = vrot.lane.b32.xlu0 %v4356_v51, %s5949_s27 }
0x2b12   :  { %v4349_v59 = vpop.permute.xlu1 %4348 }
0x2b13   :  { %v4351_v19 = vmul.f32 %v5914_v22, %v4349_v59  ;;  %v4404_v59 = vld [vmem:[%s7378_s14 + $0x38] sm:$0xff] }
0x2b7b   :  { %v4329_v1 = vpop.permute.xlu0 %4328 }
0x2b7c   :  { %v4331_v55 = vadd.f32 %v4329_v1, %v4321_v46 }
0x2b7e   :  { %5915 = vtanh.f32 %v4331_v55  ;;  %v4403_v55 = vld [vmem:[%s7378_s14 + $0x30] sm:$0xff] }
0x2b83   :  { %v4359_v62 = vpop.permute.xlu0 %4358 }
0x2b84   :  { %v4361_v54 = vadd.f32 %v4359_v62, %v4351_v19 }
0x2b86   :  { %5917 = vtanh.f32 %v4361_v54 }
0x2b88   :  { %v5916_v8 = vpop.eup %5915 }
0x2b89   :  { %4334 = vrot.lane.b32.xlu1 %v5916_v8, %s5949_s27 }
0x2b90   :  { %v5918_v25 = vpop.eup %5917 }
0x2b91   :  { %4364 = vrot.lane.b32.xlu0 %v5918_v25, %s5949_s27  ;;  %v5646_v25 = vpack.c.bf16 %v4404_v59, %v4403_v55 }
0x2b95   :  { %2906 = vrot.lane.b32.xlu0 %v2905_v50, %s5950_s29 }
0x2b99   :  { %3409 = vrot.lane.b32.xlu0 %v3408_v11, %s5950_s29 }
0x2b9d   :  { %3896 = vrot.lane.b32.xlu0 %v3895_v58, %s5950_s29 }
0x2bfb   :  { %v4335_v27 = vpop.permute.xlu1 %4334 }
0x2bfc   :  { %v4337_v63 = vmul.f32 %v5912_v16, %v4335_v27  ;;  %v5640_v16 = vpack.c.bf16 %v4400_v23, %v4399_v26 }
0x2bfe   :  { %v4369_v31 = vrot.slane %v4337_v63, 2  ;;  %5641 = vmatpush3.bf16.msra.mxu0 %v5640_v16  ;;  %v4486_v63 = vld [vmem:[%s7380_s16] sm:$0xff] }
0x2bff   :  { %5642 = vmatprep.subr.bf16.mxu0 %v5945_v40 }
0x2c00   :  { %4370 = vrot.lane.b32.xlu1 %v4369_v31, %s5950_s29  ;;  %v4487_v31 = vld [vmem:[%s7380_s16 + $0x8] sm:$0xff] }
0x2c01   :  { %v5649_v30 = vpack.c.bf16 %v4487_v31, %v4486_v63 }
0x2c03   :  { %v4365_v14 = vpop.permute.xlu0 %4364  ;;  %5650 = vmatpush3.bf16.msra.mxu1 %v5649_v30 }
0x2c04   :  { %v4367_v52 = vmul.f32 %v5914_v22, %v4365_v14  ;;  %3160 = vrot.lane.b32.xlu1 %v3159_v61, %s5950_s29  ;;  %v4402_v22 = vld [vmem:[%s7378_s14 + $0x28] sm:$0xff]  ;;  %v4489_v61 = vld [vmem:[%s7380_s16 + $0x18] sm:$0xff]  ;;  %5651 = vmatprep.subr.bf16.mxu1 %v5945_v40  ;;  %s5952_s16 = smov [#allocation5]  }
0x2c05   :  { %v5643_v43 = vpack.c.bf16 %v4402_v22, %v4401_v12  ;;  %v5652_v42 = vpack.c.bf16 %v4489_v61, %v4488_v6  ;;  %s4578_s12 = sshll.u32 %s5952_s16, 4  ;;  %s4579_s12 = int_to_ptr.vmem [resolvable:$true] %s4578_s12 }
0x2c06   :  { %v4374_v18 = vsel %vm508_vm3, %v4367_v52, 0.0  ;;  %s5921_s15 = scalar_lea.vmem %s4579_s12, 32  ;;  %p5926_p1 = scmp.lt.s32.totalorder %s4579_s12, %s4579_s12 }
0x2c07   :  { %v4382_v10 = vrot.slane %v4374_v18, 2  ;;  %v2907_v47 = vpop.permute.xlu0 %2906  ;;  %5644 = vmatpush3.bf16.msra.mxu0 %v5643_v43  ;;  %5653 = vmatpush3.bf16.msra.mxu1 %v5652_v42  ;;  %p5922_p0 = scmp.ne.s32.totalorder %s4579_s12, %s5921_s15  ;;  %p5927_p2 = scmp.lt.s32.totalorder %s5921_s15, %s5921_s15 }
0x2c08   :  { %3403 = vrot.lane.b32.xlu1 %v3402_v9, %s5950_s29  ;;  %v2909_v57 = vadd.f32 %v2907_v47, %v6892_v32  ;;  %v3645_v32 = vsel %vm515_vm4, %v7105_v60, 0.0  ;;  %5645 = vmatprep.subr.bf16.mxu0 %v5945_v40  ;;  %v4656_v9 = vld [vmem:[%s7381_s17] ss:$0 sm:$0xff] }
0x2c09   :  { %4383 = vrot.lane.b32.xlu0 %v4382_v10, %s5950_s29  ;;  %p5928_p3 = por %p5927_p2, %p5926_p1 }
0x2c0b   :  { %v3410_v21 = vpop.permute.xlu0 %3409  ;;  %5647 = vmatpush3.bf16.msra.mxu0 %v5646_v25  ;;  %p5929_p4 = pnand %p5928_p3, %p5922_p0 }
0x2c0c   :  { %v3412_v17 = vadd.f32 %v3410_v21, %v3167_v20  ;;  %4150 = vrot.lane.b32.xlu1 %v4149_v0, %s5950_s29 }
0x2c0e   :  { %v3648_v35 = vadd.f32 %v3646_v48, %v3412_v17 }
0x2c0f   :  { %v3897_v51 = vpop.permute.xlu0 %3896 }
0x2c10   :  { %v3903_v24 = vadd.f32 %v3901_v15, %v3648_v35 }
0x2c12   :  { %v4157_v1 = vadd.f32 %v4155_v44, %v3903_v24 }
0x2c72   :  { %v4371_v2 = vpop.permute.xlu1 %4370 }
0x2c73   :  { %v4373_v29 = vsel %vm515_vm4, %v4371_v2, 0.0 }
0x2c74   :  { %v4376_v38 = vrot.slane %v4373_v29, 6 }
0x2c76   :  { %4377 = vrot.lane.b32.xlu1 %v4376_v38, %s5950_s29  ;;  %v3161_v56 = vpop.permute.xlu1 %3160 }
0x2c77   :  { %v3163_v4 = vadd.f32 %v3161_v56, %v2909_v57 }
0x2c7a   :  { %v3404_v46 = vpop.permute.xlu1 %3403 }
0x2c7b   :  { %v3406_v19 = vadd.f32 %v3404_v46, %v3163_v4  ;;  %v4384_v62 = vpop.permute.xlu0 %4383 }
0x2c7c   :  { %v4386_v54 = vadd.f32 %v4384_v62, %v4157_v1 }
0x2c7d   :  { %v3647_v8 = vadd.f32 %v3645_v32, %v3406_v19 }
0x2c7e   :  { %v4392_v37 = vrot.slane %v4386_v54, 6  ;;  %v4151_v3 = vpop.permute.xlu1 %4150 }
0x2c7f   :  { %v3899_v50 = vadd.f32 %v3897_v51, %v3647_v8 }
0x2c80   :  { %4393 = vrot.lane.b32.xlu1 %v4392_v37, %s5949_s27 }
0x2c81   :  { %v4153_v11 = vadd.f32 %v4151_v3, %v3899_v50 }
0x2ce8   :  { %v4378_v36 = vpop.permute.xlu1 %4377 }
0x2ce9   :  { %v4380_v58 = vadd.f32 %v4378_v36, %v4153_v11 }
0x2ceb   :  { %4388 = vrot.lane.b32.xlu0 %v4380_v58, %s5950_s29 }
0x2cf2   :  { %v4394_v27 = vpop.permute.xlu1 %4393 }
0x2d5d   :  { %v4389_v53 = vpop.permute.xlu0 %4388 }
0x2d5e   :  { %v4396_v60 = vsel %vm310_vm6, %v4389_v53, %v4394_v27 }
0x2d5f   :  { %5335 = vmatmul.mubr.msk.f32.vlgmr.msra.gmra.mrb[38].mxu0 %vm2267_vm14, %v4396_v60 }
0x2e32   :  { %v4481_v14 = vpop.f32.mrb[38].mxu0 }
0x2e33   :  { %v4482_v5 = vadd.f32 %v4654_v45, %v4481_v14  ;;  %v5336_v52 = vpop.f32.mrb[39].mxu0 }
0x2e35   :  { %5919 = vtanh.f32 %v4482_v5 }
0x2e3f   :  { %v5920_v33 = vpop.eup %5919 }
0x2e40   :  { %5346 = vmatmul.mubr.msk.f32.vlgmr.msra.gmra.mrb[38].mxu1 %vm310_vm6, %v5920_v33 }
0x2f13   :  { %v4566_v18 = vpop.f32.mrb[38].mxu1 }
0x2f14   :  { %v4567_v40 = vadd.f32 %v4656_v9, %v4566_v18  ;;  %v5347_v34 = vpop.f32.mrb[39].mxu1 }
0x2f16   :  { %4571 = vst.msk [vmem:[#allocation5] sm:$0x3] %vm4570_vm15, %v4567_v40 }
0x2f17   :  { %5932 = shalt.err (!%p5929_p4)
}
0x2f18   :  { %s5933_s8 = scalar_lea.hbm %s7382_s18, 32 }
0x2f19   :  { %p5934_p5 = scmp.ne.s32.totalorder %s7382_s18, %s5933_s8  ;;  %p5937_p6 = scmp.lt.u32.totalorder %s5933_s8, %s7382_s18 }
0x2f1b   :  { %p5939_p7 = pnand %p5937_p6, %p5934_p5 }
0x2f1d   :  { %5942 = shalt.err (!%p5939_p7)
}
0x2f1e   :  { %4581 = dma.vmem_to_hbm [thread:$0]  %s4579_s12, 32, %s7382_s18, [#allocation6]  }
0x2f1f   :  { %5943 = dma.done.wait [#allocation6], 32  }
0x2f20   :  { %5944 = vsyncadd [#allocation6], 4294967264 }
0x2f21   :  { %4585 = vsyncpa [#allocation6], 1 }

</bundles_post_ra>
